<compile_context>
chip_gen: v7x
topology: tpu7x:2x2x1
jax: 0.10.0
libtpu: 0.0.40
codegen_flags: <defaults>
</compile_context>

<pallas_src>
import jax
import jax.numpy as jnp
from jax import lax
from jax.experimental import pallas as pl
from jax.experimental.pallas import tpu as pltpu


def _spec_kernel(frames_ref, bhi_ref, blo_ref, out_ref):
    """One (batch, frame-tile) grid step: fused windowed DFT via bf16_3x MXU matmul.

    frames_ref: (1, n_fft, frame_tile) f32   -- frames tile, time on lanes.
    bhi_ref:    (2*nf, n_fft)          bf16  -- VMEM-resident basis, high part.
    blo_ref:    (2*nf, n_fft)          bf16  -- VMEM-resident basis, low part.
    out_ref:    (1, 2*nf, frame_tile)  f32   -- rows 0..256  = Re bins 0..256,
                                                rows 257..511 = Im bins 1..255.
    """
    fr = frames_ref[0]                                        # (n_fft, tF) f32
    fr_hi = fr.astype(jnp.bfloat16)
    fr_lo = (fr - fr_hi.astype(jnp.float32)).astype(jnp.bfloat16)
    bhi = bhi_ref[...]
    # bf16_3x: hi*hi + hi*lo + lo*hi, accumulated in f32 (lo*lo term dropped).
    acc = jnp.dot(bhi, fr_hi, preferred_element_type=jnp.float32)
    acc += jnp.dot(bhi, fr_lo, preferred_element_type=jnp.float32)
    acc += jnp.dot(blo_ref[...], fr_hi, preferred_element_type=jnp.float32)
    out_ref[0] = acc.astype(out_ref.dtype)


def _hann_window(win_length, n_fft):
    """Periodic Hann window (torch.hann_window default), center-padded to n_fft."""
    n = jnp.arange(win_length, dtype=jnp.float32)
    w = 0.5 - 0.5 * jnp.cos(2.0 * jnp.pi * n / win_length)
    lpad = (n_fft - win_length) // 2
    return jnp.pad(w, (lpad, n_fft - win_length - lpad))


def _fused_basis(n_fft, win_length):
    """Fused (2*nf, n_fft) windowed-DFT basis.

    Rows 0..nf-1  : window * cos(2*pi*n*k/N), k = 0..nf-1, with k=0 zeroed
                    (implements stft[:, 0, :] = 0).
    Row  nf       : window * (-1)^n          (Nyquist real part; reuses the
                    identically-zero sin(DC) slot).
    Rows nf+1..   : -window * sin(2*pi*n*k/N), k = 1..nf-1 (imag parts).
    """
    nf = n_fft // 2
    window = _hann_window(win_length, n_fft)                        # (n_fft,)
    n = jnp.arange(n_fft, dtype=jnp.int32)[:, None]
    k = jnp.arange(nf, dtype=jnp.int32)[None, :]
    # Exact integer phase reduction -> accurate trig even for large n*k.
    ang = (2.0 * jnp.pi / n_fft) * jnp.mod(n * k, n_fft).astype(jnp.float32)
    cos_half = window[:, None] * jnp.cos(ang)                       # (n_fft, nf)
    cos_half = cos_half.at[:, 0].set(0.0)                           # DC zero folded in
    sin_half = -window[:, None] * jnp.sin(ang)                      # (n_fft, nf); col 0 == 0
    alt = jnp.where(jnp.arange(n_fft) % 2 == 0, 1.0, -1.0).astype(jnp.float32)
    sin_half = sin_half.at[:, 0].set(window * alt)                  # Nyquist cosine column
    return jnp.concatenate([cos_half, sin_half], axis=1).T          # (2*nf, n_fft)


def input_spec_forward(sig_time, n_fft=512, hop_length=256, win_length=512,
                       frame_tile=None):
    """sig_time: (B, L) float -> complex64 STFT of shape (B, n_fft//2+1, n_frames)."""
    B, L = sig_time.shape
    pad = n_fft // 2
    n_frames = 1 + L // hop_length
    n_freq = n_fft // 2 + 1                      # 257
    nf = n_fft // 2                              # 256
    n_out = 2 * nf                               # 512 fused output rows (re|im)

    if frame_tile is None:
        frame_tile = min(256, int(pl.cdiv(n_frames, 128)) * 128)
        # Keep >=2 grid steps when possible so both v7x TensorCores get work.
        while B * int(pl.cdiv(n_frames, frame_tile)) < 2 and frame_tile > 128:
            frame_tile //= 2
    assert frame_tile % 128 == 0, "frame_tile must be a multiple of 128 (lane-dense)"
    f_pad = int(pl.cdiv(n_frames, frame_tile)) * frame_tile

    # ---- wrapper-side layout plumbing (reflect pad + overlapping frames) ----
    # TODO(synk): the overlap-by-hop frame assembly could be done in-kernel from
    # hop-sized chunks to halve input DMA bytes; kept in the JAX wrapper here.
    sig_time = sig_time.astype(jnp.float32)
    padded = jnp.pad(sig_time, ((0, 0), (pad, pad)), mode="reflect")
    if n_fft % hop_length == 0:
        r = n_fft // hop_length
        n_chunks = n_frames + r - 1
        chunks = padded[:, : n_chunks * hop_length].reshape(B, n_chunks, hop_length)
        frames = jnp.concatenate(
            [chunks[:, k:k + n_frames, :] for k in range(r)], axis=-1)
        frames_t = jnp.transpose(frames, (0, 2, 1))                 # (B, n_fft, n_frames)
    else:
        idx = (jnp.arange(n_fft)[:, None]
               + jnp.arange(n_frames)[None, :] * hop_length)
        frames_t = padded[:, idx]                                   # (B, n_fft, n_frames)
    if f_pad != n_frames:
        frames_t = jnp.pad(frames_t, ((0, 0), (0, 0), (0, f_pad - n_frames)))

    # ---- fused basis, pre-split hi/lo for the in-kernel bf16_3x matmul ------
    basis = _fused_basis(n_fft, win_length)                         # (n_out, n_fft) f32
    b_hi = basis.astype(jnp.bfloat16)
    b_lo = (basis - b_hi.astype(jnp.float32)).astype(jnp.bfloat16)

    grid = (B, f_pad // frame_tile)
    out = pl.pallas_call(
        _spec_kernel,
        out_shape=jax.ShapeDtypeStruct((B, n_out, f_pad), jnp.float32),
        grid=grid,
        in_specs=[
            pl.BlockSpec((1, n_fft, frame_tile), lambda b, t: (b, 0, t)),
            pl.BlockSpec((n_out, n_fft), lambda b, t: (0, 0)),      # resident constant
            pl.BlockSpec((n_out, n_fft), lambda b, t: (0, 0)),      # resident constant
        ],
        out_specs=pl.BlockSpec((1, n_out, frame_tile), lambda b, t: (b, 0, t)),
        compiler_params=pltpu.CompilerParams(
            dimension_semantics=("parallel", "parallel")),
    )(frames_t, b_hi, b_lo)

    # Rows 0..256 are Re bins 0..256 (row nf carries the Nyquist real part);
    # rows nf+1..511 are Im bins 1..255; Im(DC) = Im(Nyquist) = 0.
    re = out[:, :n_freq, :n_frames]
    im = jnp.pad(out[:, nf + 1:, :n_frames], ((0, 0), (1, 1), (0, 0)))
    return lax.complex(re, im)                                      # (B, n_freq, n_frames)


def input_spec_reference(sig_time, n_fft=512, hop_length=256, win_length=512):
    """Pure-JAX reference mirroring torchaudio Spectrogram(power=None) + DC zero."""
    B, L = sig_time.shape
    pad = n_fft // 2
    n_frames = 1 + L // hop_length
    padded = jnp.pad(sig_time.astype(jnp.float32), ((0, 0), (pad, pad)), mode="reflect")
    idx = (jnp.arange(n_frames)[:, None] * hop_length
           + jnp.arange(n_fft)[None, :])
    frames = padded[:, idx]                                         # (B, n_frames, n_fft)
    window = _hann_window(win_length, n_fft)
    spec = jnp.fft.rfft(frames * window[None, None, :], axis=-1)
    spec = jnp.transpose(spec, (0, 2, 1)).astype(jnp.complex64)     # (B, n_freq, n_frames)
    return spec.at[:, 0, :].set(0)


if __name__ == "__main__":
    B = 2
    hop = 256
    L = hop * 15                      # 3840 samples -> 16 frames (small demo)
    key = jax.random.PRNGKey(0)
    sig = jax.random.normal(key, (B, L), dtype=jnp.float32)

    out = input_spec_forward(sig)
    out = jax.block_until_ready(out)

    ref = input_spec_reference(sig)
    assert out.shape == (B, 257, 16), out.shape
    assert out.dtype == jnp.complex64, out.dtype
    max_err = float(jnp.max(jnp.abs(out - ref)))
    assert jnp.allclose(out, ref, atol=1e-3, rtol=1e-3), \
        f"mismatch vs reference (max |err| = {max_err})"

    print("KERNEL_OK")
</pallas_src>

<mosaic_0001>
module attributes {stable_mosaic.version = 11 : i64} {
  func.func @_spec_kernel(%arg0: i32, %arg1: i32, %arg2: memref<1x512x128xf32, #tpu.memory_space<vmem>>, %arg3: memref<512x512xbf16, #tpu.memory_space<vmem>>, %arg4: memref<512x512xbf16, #tpu.memory_space<vmem>>, %arg5: memref<1x512x128xf32, #tpu.memory_space<vmem>>) attributes {dimension_semantics = [#tpu.dimension_semantics<parallel>, #tpu.dimension_semantics<parallel>], iteration_bounds = array<i64: 2, 1>, scalar_prefetch = 0 : i64, scratch_operands = 0 : i64, tpu.core_type = #tpu.core_type<tc>, window_params = [{transform_indices = @transform_0, window_bounds = array<i64: 1, 512, 128>}, {pipeline_mode = #tpu.pipeline_mode<synchronous>, transform_indices = @transform_1, window_bounds = array<i64: 512, 512>}, {pipeline_mode = #tpu.pipeline_mode<synchronous>, transform_indices = @transform_2, window_bounds = array<i64: 512, 512>}, {transform_indices = @transform_3, window_bounds = array<i64: 1, 512, 128>}]} {
    %c0 = arith.constant 0 : index
    %c0_0 = arith.constant 0 : index
    %c0_1 = arith.constant 0 : index
    %0 = vector.load %arg2[%c0, %c0_0, %c0_1] : memref<1x512x128xf32, #tpu.memory_space<vmem>>, vector<1x512x128xf32>
    %1 = vector.shape_cast %0 : vector<1x512x128xf32> to vector<512x128xf32>
    %2 = arith.truncf %1 : vector<512x128xf32> to vector<512x128xbf16>
    %3 = arith.extf %2 : vector<512x128xbf16> to vector<512x128xf32>
    %4 = arith.subf %1, %3 : vector<512x128xf32>
    %5 = arith.truncf %4 : vector<512x128xf32> to vector<512x128xbf16>
    %c0_2 = arith.constant 0 : index
    %c0_3 = arith.constant 0 : index
    %6 = vector.load %arg3[%c0_2, %c0_3] : memref<512x512xbf16, #tpu.memory_space<vmem>>, vector<512x512xbf16>
    %cst = arith.constant dense<0.000000e+00> : vector<512x128xf32>
    %7 = tpu.matmul %6, %2, %cst {dimension_numbers = #tpu.dot_dimension_numbers<[1], [0], [0], [1], [0, 0, 1, 1], [], []>} : vector<512x512xbf16>, vector<512x128xbf16>, vector<512x128xf32> -> vector<512x128xf32>
    %cst_4 = arith.constant dense<0.000000e+00> : vector<512x128xf32>
    %8 = tpu.matmul %6, %5, %cst_4 {dimension_numbers = #tpu.dot_dimension_numbers<[1], [0], [0], [1], [0, 0, 1, 1], [], []>} : vector<512x512xbf16>, vector<512x128xbf16>, vector<512x128xf32> -> vector<512x128xf32>
    %9 = arith.addf %7, %8 : vector<512x128xf32>
    %c0_5 = arith.constant 0 : index
    %c0_6 = arith.constant 0 : index
    %10 = vector.load %arg4[%c0_5, %c0_6] : memref<512x512xbf16, #tpu.memory_space<vmem>>, vector<512x512xbf16>
    %cst_7 = arith.constant dense<0.000000e+00> : vector<512x128xf32>
    %11 = tpu.matmul %10, %2, %cst_7 {dimension_numbers = #tpu.dot_dimension_numbers<[1], [0], [0], [1], [0, 0, 1, 1], [], []>} : vector<512x512xbf16>, vector<512x128xbf16>, vector<512x128xf32> -> vector<512x128xf32>
    %12 = arith.addf %9, %11 : vector<512x128xf32>
    %c0_8 = arith.constant 0 : index
    %c0_9 = arith.constant 0 : index
    %c0_10 = arith.constant 0 : index
    %13 = vector.load %arg5[%c0_8, %c0_9, %c0_10] : memref<1x512x128xf32, #tpu.memory_space<vmem>>, vector<1x512x128xf32>
    %14 = vector.shape_cast %13 : vector<1x512x128xf32> to vector<512x128xf32>
    %15 = vector.shape_cast %12 : vector<512x128xf32> to vector<1x512x128xf32>
    tpu.vector_store %arg5[%c0_8, %c0_9, %c0_10], %15 {strides = array<i32>} : memref<1x512x128xf32, #tpu.memory_space<vmem>>, vector<1x512x128xf32>,
    return
  }
  func.func @transform_0(%arg0: i32, %arg1: i32) -> (i32, i32, i32) {
    %c0_i32 = arith.constant 0 : i32
    %c0_i32_0 = arith.constant 0 : i32
    return %arg0, %c0_i32, %arg1 : i32, i32, i32
  }
  func.func @transform_1(%arg0: i32, %arg1: i32) -> (i32, i32) {
    %c0_i32 = arith.constant 0 : i32
    %c0_i32_0 = arith.constant 0 : i32
    %c0_i32_1 = arith.constant 0 : i32
    return %c0_i32, %c0_i32_0 : i32, i32
  }
  func.func @transform_2(%arg0: i32, %arg1: i32) -> (i32, i32) {
    %c0_i32 = arith.constant 0 : i32
    %c0_i32_0 = arith.constant 0 : i32
    %c0_i32_1 = arith.constant 0 : i32
    return %c0_i32, %c0_i32_0 : i32, i32
  }
  func.func @transform_3(%arg0: i32, %arg1: i32) -> (i32, i32, i32) {
    %c0_i32 = arith.constant 0 : i32
    %c0_i32_0 = arith.constant 0 : i32
    return %arg0, %c0_i32, %arg1 : i32, i32, i32
  }
}

</mosaic_0001>

<bundles_post_ra>
// kernel: tpu_custom_call.1
= control target key start
LH: loop header
LB: loop body
LE: loop exit
PB: predicated region body
PF: predicated region fallthrough
CT: control target
= control target key end

     0   :  { %8 = vsyncpa [#allocation3], 0  ;;  %s6869_s0 = inlined_call_operand.hbm [shape: f32[2,512,128], index: 0, kind: input, shape index: {}]   ;;  %s6870_s1 = inlined_call_operand.hbm [shape: bf16[512,512], index: 1, kind: input, shape index: {}]   ;;  %s6871_s2 = inlined_call_operand.hbm [shape: bf16[512,512], index: 2, kind: input, shape index: {}]   ;;  %s6872_s3 = inlined_call_operand.hbm [shape: f32[2,512,128], index: 3, kind: output, shape index: {}]  }
   0x1   :  { %10 = vsyncpa [#allocation3 + $0x1], 0 }
   0x2   :  { %11 = vsyncpa [#allocation6], 0 }
   0x3   :  { %12 = vsyncpa [#allocation4], 0 }
   0x4   :  { %14 = vsyncpa [#allocation4 + $0x1], 0  ;;  %s5572_s12 = smov 0   ;;  %s5574_s13 = smov 0  }
   0x5   :  { %s5576_s14 = smov 0   ;;  %s5578_s15 = smov 0  }
   0x6   :  { %s5580_s16 = smov 0   ;;  %s5582_s17 = smov 0  }
   0x7 LB: > { %s4009_s18 = sadd.s32 4294967295, %s5539_s17   ;;  %s4010_s19 = sadd.s32 4294967294, %s5539_s17   ;;  %s5539_s17 = sphi %s5582_s17, %s20_s17   ;;  %s5535_s16 = sphi %s5580_s16, %s7162_s16   ;;  %s5531_s15 = sphi %s5578_s15, %s7161_s15   ;;  %s5527_s14 = sphi %s5576_s14, %s7160_s14   ;;  %s5523_s13 = sphi %s5574_s13, %s7159_s13   ;;  %s5519_s12 = sphi %s5572_s12, %s7158_s12  }
   0x8   : > { %p54_p0 = scmp.ne.s32.totalorder %s5523_s13, %s5519_s12  ;;  %p5606_p1 = scmp.eq.s32.totalorder %s4009_s18, 0 }
   0x9   : > { %p5610_p2 = scmp.eq.s32.totalorder %s4009_s18, 1  ;;  %p128_p3 = scmp.eq.s32.totalorder %s4010_s19, 1 }
   0xa   : > { %s6967_s20 = scalar_select %p5606_p1, 1, 0 }
   0xb   : > { %p5616_p4 = por %p5606_p1, %p54_p0  ;;  %p4011_p5 = scmp.ge.s32.totalorder %s5539_s17, 1 }
   0xc   : > { %p5621_p6 = por %p128_p3, %p54_p0  ;;  %p135_p7 = scmp.lt.s32.totalorder %s5539_s17, 3 }
   0xd   : > { %s6969_s22 = scalar_select %p5616_p4, 1, 0 }
   0xe   : > { %s6970_s23 = scalar_select %p5621_p6, 1, 0 }
   0xf   : > { %p5626_p8 = pnand %p4011_p5, %p135_p7  ;;  %s5541_s25 = smov [#allocation5]  }
  0x10   : > { %s147_s26 = sshll.u32 %s5541_s25, 4  ;;  %s5542_s28 = smov [#allocation7]   ;;  %s5630_s26 = int_to_ptr.vmem [resolvable:$true] %s147_s26 }
  0x11   : > { %p4874_p9 = pneg %p5626_p8  ;;  %s160_s29 = sshll.u32 %s5542_s28, 4  ;;  %s5641_s29 = int_to_ptr.vmem [resolvable:$true] %s160_s29 }
  0x12   : > { %s5367_s5 = scalar_lea.hbm %s6870_s1, 16384 }
  0x13   : > { %p5637_p11 = pnand %p4874_p9, %p5606_p1  ;;  %p5368_p12 = scmp.ne.s32.totalorder %s6870_s1, %s5367_s5 }
  0x14   : > { %p5374_p5 = scmp.lt.u32.totalorder %s5367_s5, %s6870_s1 }
  0x15   : > { %p5369_p13 = pneg %p5637_p11 }
  0x17   : > { %p5370_p0 = pnand %p5369_p13, %p5368_p12 }
  0x19   : > { %p5371_p3 = pneg %p5370_p0 }
  0x1b   : > { %p5376_p7 = pnand %p5374_p5, %p5371_p3 }
  0x1d   : > { %5379 = shalt.err (!%p5376_p7)
}
  0x1e   : > { %s5380_s10 = scalar_lea.vmem %s5630_s26, 16384  ;;  %p5388_p1 = scmp.lt.s32.totalorder %s5630_s26, %s5630_s26 }
  0x1f   : > { %p5381_p9 = scmp.ne.s32.totalorder %s5630_s26, %s5380_s10  ;;  %p5389_p12 = scmp.lt.s32.totalorder %s5380_s10, %s5380_s10 }
  0x21   : > { %p5383_p10 = pnand %p5381_p9, %p5369_p13  ;;  %p5390_p0 = por %p5389_p12, %p5388_p1 }
  0x23   : > { %p5384_p6 = pneg %p5383_p10 }
  0x25   : > { %p5391_p4 = pnand %p5390_p0, %p5384_p6 }
  0x27   : > { %5394 = shalt.err (!%p5391_p4)
}
  0x28   : > { %s5543_s11 = smov 256   ;;  %s5544_s18 = smov 16  }
  0x29   : > { %4877 = dma.hbm_to_vmem [thread:$0]  (!%p5637_p11), %s6870_s1, 16384, %s5630_s26, [#allocation6], %s5543_s11, %s5543_s11, %s5544_s18  }
  0x2a   : > { %s5395_s4 = scalar_lea.hbm %s6871_s2, 16384 }
  0x2b   : > { %p5396_p1 = scmp.ne.s32.totalorder %s6871_s2, %s5395_s4  ;;  %p5402_p10 = scmp.lt.u32.totalorder %s5395_s4, %s6871_s2 }
  0x2d   : > { %p5398_p4 = pnand %p5396_p1, %p5369_p13 }
  0x2f   : > { %p5399_p6 = pneg %p5398_p4 }
  0x31   : > { %p5404_p3 = pnand %p5402_p10, %p5399_p6 }
  0x33   : > { %5407 = shalt.err (!%p5404_p3)
}
  0x34   : > { %s5408_s26 = scalar_lea.vmem %s5641_s29, 16384  ;;  %p5416_p12 = scmp.lt.s32.totalorder %s5641_s29, %s5641_s29 }
  0x35   : > { %p5409_p5 = scmp.ne.s32.totalorder %s5641_s29, %s5408_s26  ;;  %p5417_p0 = scmp.lt.s32.totalorder %s5408_s26, %s5408_s26 }
  0x37   : > { %p5411_p7 = pnand %p5409_p5, %p5369_p13  ;;  %p5418_p1 = por %p5417_p0, %p5416_p12 }
  0x39   : > { %p5412_p9 = pneg %p5411_p7 }
  0x3b   : > { %p5419_p4 = pnand %p5418_p1, %p5412_p9 }
  0x3d   : > { %5422 = shalt.err (!%p5419_p4)
}
  0x3e   : > { %4880 = dma.hbm_to_vmem [thread:$0]  (!%p5637_p11), %s6871_s2, 16384, %s5641_s29, [#allocation6], %s5543_s11, %s5543_s11, %s5544_s18  }
  0x3f   : > { %s32_s19 = sadd.s32 1, %s5535_s16  ;;  %s41_s25 = sadd.s32 1, %s5527_s14 }
  0x40   : > { %p34_p13 = scmp.ge.s32.totalorder %s32_s19, 2  ;;  %p48_p6 = scmp.ne.s32.totalorder %s5527_s14, %s5523_s13 }
  0x41   : > { %p49_p10 = scmp.eq.s32.totalorder %s5539_s17, 0  ;;  %p4891_p3 = scmp.lt.s32.totalorder %s5539_s17, 2 }
  0x42   : > { %s7164_s19 = smov (%p34_p13, %s32_s19), 0  ;;  %p5705_p7 = por %p5610_p2, %p48_p6 }
  0x43   : > { %p50_p5 = por %p49_p10, %p48_p6  ;;  %s36_s28 = ssub.s32 %s5535_s16, %s7164_s19 }
  0x44   : > { %s6973_s27 = scalar_select %p5705_p7, 1, 0 }
  0x45   : > { %s174_s30 = sand.u32 1, %s5527_s14   ;;  %p39_p9 = scmp.eq.s32.totalorder %s36_s28, 0 }
  0x46   : > { %s4015_s29 = sshll.u32 %s174_s30, 9  ;;  %s4284_s11 = sshll.u32 %s5535_s16, 13 }
  0x47   : > { %s5714_s18 = scalar_select %p39_p9, %s5527_s14, %s41_s25  }
  0x48   : > { %s5719_s6 = scalar_lea.hbm %s6869_s0, %s4284_s11  ;;  %s178_s21 = scalar_lea.vmem [#allocation2], %s4015_s29 }
  0x49   : > { %s186_s7 = sshll.u32 %s178_s21, 4  ;;  %p5723_p2 = pnand %p4891_p3, %p50_p5  ;;  %s5727_s7 = int_to_ptr.vmem [resolvable:$true] %s186_s7 }
  0x4a   : > { %s5729_s26 = scalar_lea.sflag [#allocation3], %s174_s30  ;;  %s5423_s9 = scalar_lea.hbm %s5719_s6, 8192 }
  0x4b   : > { %p5424_p11 = scmp.ne.s32.totalorder %s5719_s6, %s5423_s9  ;;  %p5425_p12 = pneg %p5723_p2 }
  0x4c   : > { %s5428_s28 = scalar_lea.hbm %s6869_s0, 16384  ;;  %p5429_p4 = scmp.lt.u32.totalorder %s5719_s6, %s6869_s0 }
  0x4d   : > { %p5426_p0 = pnand %p5425_p12, %p5424_p11  ;;  %p5430_p13 = scmp.lt.u32.totalorder %s5428_s28, %s5423_s9 }
  0x4e   : > { %p5432_p10 = scmp.lt.u32.totalorder %s5423_s9, %s5719_s6 }
  0x4f   : > { %p5427_p1 = pneg %p5426_p0  ;;  %p5431_p6 = por %p5430_p13, %p5429_p4 }
  0x51   : > { %p5433_p3 = por %p5432_p10, %p5431_p6 }
  0x53   : > { %p5434_p5 = pnand %p5433_p3, %p5427_p1 }
  0x55   : > { %5437 = shalt.err (!%p5434_p5)
}
  0x56   : > { %s5438_s30 = scalar_lea.vmem %s5727_s7, 8192  ;;  %s5545_s4 = smov [#allocation2]  }
  0x57   : > { %p5439_p9 = scmp.ne.s32.totalorder %s5727_s7, %s5438_s30  ;;  %s5443_s5 = sshll.u32 %s5545_s4, 4  ;;  %s5444_s5 = int_to_ptr.vmem [resolvable:$false] %s5443_s5 }
  0x58   : > { %s5445_s21 = scalar_lea.vmem %s5444_s5, 16384  ;;  %p5446_p7 = scmp.lt.s32.totalorder %s5727_s7, %s5444_s5 }
  0x59   : > { %p5441_p11 = pnand %p5439_p9, %p5425_p12  ;;  %p5447_p4 = scmp.lt.s32.totalorder %s5445_s21, %s5438_s30 }
  0x5b   : > { %p5442_p0 = pneg %p5441_p11  ;;  %p5448_p13 = por %p5447_p4, %p5446_p7 }
  0x5d   : > { %p5449_p6 = pnand %p5448_p13, %p5442_p0 }
  0x5f   : > { %5452 = shalt.err (!%p5449_p6)
}
  0x60   : > { %s5546_s9 = smov 128   ;;  %s5547_s10 = smov 8  }
  0x61   : > { %4884 = dma.hbm_to_vmem [thread:$0]  (!%p5723_p2), %s5719_s6, 8192, %s5727_s7, %s5729_s26, %s5546_s9, %s5546_s9, %s5547_s10  }
  0x62   : > { %198 = sbr.rel (%p5626_p8) target bundleno = 1177 (0x499), region = 32 }
  0x69   : > { %s5760_s25 = sand.u32 1, %s5523_s13   ;;  %p6975_p7 = scmp.ne.s32.totalorder %s6969_s22, 0 }
  0x6a   : > { %s4019_s28 = sshll.u32 %s5760_s25, 9  ;;  %s201_s29 = scalar_lea.sflag [#allocation3], %s5760_s25 }
  0x6b   : > { %s5766_s11 = scalar_lea.vmem [#allocation2], %s4019_s28 }
  0x6c   : > { %5506 = dma.done.wait (%p6975_p7), %s201_s29, 8192  }
  0x6d   : > { %5508 = vsyncadd (%p6975_p7), %s201_s29, 4294959104  ;;  %p6976_p2 = scmp.ne.s32.totalorder %s6967_s20, 0 }
  0x6f   : > { %5510 = dma.done.wait (%p6976_p2), [#allocation6], 32768  }
  0x70   : > { %5512 = vsyncadd (%p6976_p2), [#allocation6], 4294934528  ;;  %v6877_v0 = vmov 0   ;;  %v5779_v1 = vld [vmem:[%s5766_s11 + $0x100] sm:$0xff]  ;;  %v5782_v2 = vld [vmem:[%s5766_s11 + $0x108] sm:$0xff]  ;;  %s6738_s20 = scalar_lea.vmem [#allocation8], %s4019_s28 }
  0x71   : > { %2127 = vmatprep.subr.bf16.mxu0 %v6877_v0  ;;  %1260 = vmatprep.subr.bf16.mxu1 %v6877_v0  ;;  %v5785_v3 = vld [vmem:[%s5766_s11 + $0x110] sm:$0xff]  ;;  %v5789_v4 = vpack.c.bf16 %v5782_v2, %v5779_v1  ;;  %v5792_v5 = vld [vmem:[%s5766_s11 + $0x118] sm:$0xff]  ;;  %v236_v6 = vld [vmem:[%s5766_s11] sm:$0xff]  ;;  %s4285_s22 = sshll.u32 %s5531_s15, 13  ;;  %s3905_s24 = sshll.u32 %s6738_s20, 4  ;;  %s6818_s24 = int_to_ptr.vmem [resolvable:$true] %s3905_s24 }
  0x72   : > { %v237_v7 = vld [vmem:[%s5766_s11 + $0x8] sm:$0xff]  ;;  %v238_v9 = vld [vmem:[%s5766_s11 + $0x10] sm:$0xff]  ;;  %v5802_v10 = vpack.c.bf16 %v5792_v5, %v5785_v3  ;;  %v5805_v11 = vld [vmem:[%s5766_s11 + $0x120] sm:$0xff]  ;;  %s6816_s8 = scalar_lea.hbm %s6872_s3, %s4285_s22  ;;  %s3891_s15 = scalar_lea.sflag [#allocation4], %s5760_s25 }
  0x73   : > { %6977 = vst [vmem:[#allocation12_spill] sm:$0xff] %v5789_v4  ;;  %v5796_v8 = vpack.c.bf16 %v237_v7, %v236_v6  ;;  %2128 = vmatpush1.bf16.msra.mxu0 %v5789_v4  ;;  %v239_v12 = vld [vmem:[%s5766_s11 + $0x18] sm:$0xff]  ;;  %v5812_v15 = vld [vmem:[%s5766_s11 + $0x128] sm:$0xff]  ;;  %v240_v17 = vld [vmem:[%s5766_s11 + $0x20] sm:$0xff]  ;;  %s5453_s26 = scalar_lea.vmem %s6818_s24, 8192  ;;  %p7155_p12 = scmp.ne.s32.totalorder %s6973_s27, 0 }
  0x74   : > { %6978 = vst [vmem:[#allocation13_spill] sm:$0xff] %v5802_v10  ;;  %2129 = vmatprep.subr.bf16.mxu0 %v6877_v0  ;;  %v5814_v16 = vpack.c.bf16 %v239_v12, %v238_v9  ;;  %v241_v18 = vld [vmem:[%s5766_s11 + $0x28] sm:$0xff]  ;;  %v242_v20 = vld [vmem:[%s5766_s11 + $0x30] sm:$0xff]  ;;  %v243_v21 = vld [vmem:[%s5766_s11 + $0x38] sm:$0xff]  ;;  %v5827_v26 = vpack.c.bf16 %v5812_v15, %v5805_v11  ;;  %p5454_p8 = scmp.ne.s32.totalorder %s6818_s24, %s5453_s26  ;;  %s5549_s30 = smov [#allocation8]  }
  0x75   : > { %v332_v13 = vunpack.c.l.bf16 %v5796_v8  ;;  %v333_v14 = vunpack.c.h.bf16 %v5796_v8  ;;  %v5818_v19 = vpack.c.bf16 %v241_v18, %v240_v17  ;;  %v5831_v29 = vpack.c.bf16 %v243_v21, %v242_v20  ;;  %v244_v30 = vld [vmem:[%s5766_s11 + $0x40] sm:$0xff]  ;;  %v245_v31 = vld [vmem:[%s5766_s11 + $0x48] sm:$0xff]  ;;  %v5837_v35 = vld [vmem:[%s5766_s11 + $0x130] sm:$0xff]  ;;  %s5457_s4 = sshll.u32 %s5549_s30, 4  ;;  %s5458_s4 = int_to_ptr.vmem [resolvable:$false] %s5457_s4 }
  0x76   : > { %v334_v24 = vunpack.c.l.bf16 %v5814_v16  ;;  %v335_v25 = vunpack.c.h.bf16 %v5814_v16  ;;  %6979 = vst [vmem:[#allocation14_spill] sm:$0xff] %v5827_v26  ;;  %v5840_v36 = vld [vmem:[%s5766_s11 + $0x138] sm:$0xff]  ;;  %v5844_v42 = vpack.c.bf16 %v245_v31, %v244_v30  ;;  %v246_v43 = vld [vmem:[%s5766_s11 + $0x50] sm:$0xff]  ;;  %v5856_v46 = vld [vmem:[%s5766_s11 + $0x140] sm:$0xff]  ;;  %p5455_p1 = pnand %p5454_p8, %p7155_p12  ;;  %s5459_s5 = scalar_lea.vmem %s5458_s4, 16384 }
  0x77   : > { %v396_v22 = vsub.f32 %v236_v6, %v332_v13  ;;  %v397_v23 = vsub.f32 %v237_v7, %v333_v14  ;;  %2130 = vmatpush1.bf16.msra.mxu0 %v5802_v10  ;;  %v336_v27 = vunpack.c.l.bf16 %v5818_v19  ;;  %v337_v28 = vunpack.c.h.bf16 %v5818_v19  ;;  %v247_v44 = vld [vmem:[%s5766_s11 + $0x58] sm:$0xff]  ;;  %v5859_v47 = vld [vmem:[%s5766_s11 + $0x148] sm:$0xff]  ;;  %v248_v55 = vld [vmem:[%s5766_s11 + $0x60] sm:$0xff]  ;;  %p5460_p3 = scmp.lt.s32.totalorder %s6818_s24, %s5458_s4  ;;  %p5461_p5 = scmp.lt.s32.totalorder %s5459_s5, %s5453_s26 }
  0x78   : > { %2131 = vmatprep.subr.bf16.mxu0 %v6877_v0  ;;  %v398_v33 = vsub.f32 %v238_v9, %v334_v24  ;;  %v399_v34 = vsub.f32 %v239_v12, %v335_v25  ;;  %v338_v40 = vunpack.c.l.bf16 %v5831_v29  ;;  %v339_v41 = vunpack.c.h.bf16 %v5831_v29  ;;  %v249_v56 = vld [vmem:[%s5766_s11 + $0x68] sm:$0xff]  ;;  %v5875_v57 = vld [vmem:[%s5766_s11 + $0x150] sm:$0xff]  ;;  %v5878_v58 = vld [vmem:[%s5766_s11 + $0x158] sm:$0xff]  ;;  %p5456_p10 = pneg %p5455_p1 }
  0x79   : > { %v460_v32 = vpack.c.bf16 %v397_v23, %v396_v22  ;;  %v400_v37 = vsub.f32 %v240_v17, %v336_v27  ;;  %v401_v38 = vsub.f32 %v241_v18, %v337_v28  ;;  %v5852_v45 = vpack.c.bf16 %v5840_v36, %v5837_v35  ;;  %v250_v7 = vld [vmem:[%s5766_s11 + $0x70] sm:$0xff]  ;;  %v251_v9 = vld [vmem:[%s5766_s11 + $0x78] sm:$0xff]  ;;  %v5893_v13 = vld [vmem:[%s5766_s11 + $0x160] sm:$0xff]  ;;  %p5462_p9 = por %p5461_p5, %p5460_p3 }
  0x7a   : > { %v461_v39 = vpack.c.bf16 %v399_v34, %v398_v33  ;;  %v5861_v49 = vpack.c.bf16 %v247_v44, %v246_v43  ;;  %v402_v50 = vsub.f32 %v242_v20, %v338_v40  ;;  %v403_v51 = vsub.f32 %v243_v21, %v339_v41  ;;  %v5896_v14 = vld [vmem:[%s5766_s11 + $0x168] sm:$0xff]  ;;  %v252_v17 = vld [vmem:[%s5766_s11 + $0x80] sm:$0xff]  ;;  %v5906_v28 = vld [vmem:[%s5766_s11 + $0x170] sm:$0xff] }
  0x7b   : > { %1261 = vmatpush1.bf16.msra.mxu1 %v460_v32  ;;  %2132 = vmatpush1.bf16.msra.mxu0 %v5827_v26  ;;  %6980 = vst [vmem:[#allocation15_spill] sm:$0xff] %v5852_v45  ;;  %v462_v48 = vpack.c.bf16 %v401_v38, %v400_v37  ;;  %v340_v52 = vunpack.c.l.bf16 %v5844_v42  ;;  %v341_v53 = vunpack.c.h.bf16 %v5844_v42  ;;  %v5869_v54 = vpack.c.bf16 %v5859_v47, %v5856_v46  ;;  %v253_v18 = vld [vmem:[%s5766_s11 + $0x88] sm:$0xff]  ;;  %v5917_v33 = vld [vmem:[%s5766_s11 + $0x178] sm:$0xff]  ;;  %v4957_v37 = vld [vmem:[#allocation5 + $0x4] ss:$16 sps:$4 sm:$0xff]   ;;  %p5463_p11 = pnand %p5462_p9, %p5456_p10 }
  0x7c   : > { %1262 = vmatprep.subr.bf16.mxu1 %v6877_v0  ;;  %2133 = vmatprep.subr.bf16.mxu0 %v6877_v0  ;;  %v342_v59 = vunpack.c.l.bf16 %v5861_v49  ;;  %v343_v60 = vunpack.c.h.bf16 %v5861_v49  ;;  %v463_v61 = vpack.c.bf16 %v403_v51, %v402_v50  ;;  %v5882_v6 = vpack.c.bf16 %v249_v56, %v248_v55  ;;  %v4954_v24 = vld [vmem:[#allocation5 + $0xc] ss:$16 sps:$4 sm:$0xff]   ;;  %v5923_v38 = vld [vmem:[%s5766_s11 + $0x90] sm:$0xff] }
  0x7d   : > { %6981 = vst [vmem:[#allocation16_spill] sm:$0xff] %v5869_v54  ;;  %v404_v62 = vsub.f32 %v244_v30, %v340_v52  ;;  %v405_v63 = vsub.f32 %v245_v31, %v341_v53  ;;  %v5890_v12 = vpack.c.bf16 %v5878_v58, %v5875_v57  ;;  %v364_v20 = vunpack.c.l.bf16 %v5789_v4  ;;  %2159 = vmatprep.mubr.bf16.mxu0 %v4954_v24 }
  0x7e   : > { %v365_v21 = vunpack.c.h.bf16 %v5789_v4  ;;  %v406_v22 = vsub.f32 %v246_v43, %v342_v59  ;;  %v5903_v23 = vpack.c.bf16 %v251_v9, %v250_v7  ;;  %v407_v27 = vsub.f32 %v247_v44, %v343_v60  ;;  %v5934_v44 = vld [vmem:[%s5766_s11 + $0x98] sm:$0xff]  ;;  %1292 = vmatprep.mubr.bf16.mxu1 %v4957_v37  ;;  %v5946_v59 = vld [vmem:[%s5766_s11 + $0x180] sm:$0xff] }
  0x7f   : > { %1263 = vmatpush1.bf16.msra.mxu1 %v461_v39  ;;  %2134 = vmatpush1.bf16.msra.mxu0 %v5852_v45  ;;  %6982 = vst [vmem:[#allocation17_spill] sm:$0xff] %v5890_v12  ;;  %v464_v25 = vpack.c.bf16 %v405_v63, %v404_v62  ;;  %v344_v30 = vunpack.c.l.bf16 %v5882_v6  ;;  %v345_v31 = vunpack.c.h.bf16 %v5882_v6  ;;  %v5914_v32 = vpack.c.bf16 %v5896_v14, %v5893_v13 }
  0x80   : > { %1264 = vmatprep.subr.bf16.mxu1 %v6877_v0  ;;  %2135 = vmatprep.subr.bf16.mxu0 %v6877_v0  ;;  %v5919_v34 = vpack.c.bf16 %v253_v18, %v252_v17  ;;  %v5926_v39 = vsub.f32 %v5779_v1, %v364_v20  ;;  %v5929_v40 = vsub.f32 %v5782_v2, %v365_v21  ;;  %v346_v41 = vunpack.c.l.bf16 %v5903_v23 }
  0x81   : > { %6983 = vst [vmem:[#allocation18_spill] sm:$0xff] %v5914_v32  ;;  %v347_v43 = vunpack.c.h.bf16 %v5903_v23  ;;  %v367_v50 = vunpack.c.h.bf16 %v5802_v10  ;;  %v465_v51 = vpack.c.bf16 %v407_v27, %v406_v22  ;;  %v408_v1 = vsub.f32 %v248_v55, %v344_v30  ;;  %v5968_v27 = vld [vmem:[%s5766_s11 + $0xa8] sm:$0xff] }
  0x82   : > { %v409_v52 = vsub.f32 %v249_v56, %v345_v31  ;;  %v368_v2 = vunpack.c.l.bf16 %v5827_v26  ;;  %v5943_v53 = vpack.c.bf16 %v5917_v33, %v5906_v28  ;;  %v348_v60 = vunpack.c.l.bf16 %v5919_v34  ;;  %v5952_v56 = vld [vmem:[%s5766_s11 + $0x188] sm:$0xff] }
  0x83   : > { %1265 = vmatpush1.bf16.msra.mxu1 %v462_v48  ;;  %2136 = vmatpush1.bf16.msra.mxu0 %v5869_v54  ;;  %v366_v48 = vunpack.c.l.bf16 %v5802_v10  ;;  %v349_v55 = vunpack.c.h.bf16 %v5919_v34  ;;  %v369_v62 = vunpack.c.h.bf16 %v5827_v26  ;;  %v410_v63 = vsub.f32 %v250_v7, %v346_v41  ;;  %v5983_v7 = vld [vmem:[%s5766_s11 + $0x190] sm:$0xff] }
  0x84   : > { %1266 = vmatprep.subr.bf16.mxu1 %v6877_v0  ;;  %2137 = vmatprep.subr.bf16.mxu0 %v6877_v0  ;;  %6984 = vst [vmem:[#allocation19_spill] sm:$0xff] %v5943_v53  ;;  %v411_v20 = vsub.f32 %v251_v9, %v347_v43  ;;  %v466_v24 = vpack.c.bf16 %v409_v52, %v408_v1  ;;  %v5986_v9 = vld [vmem:[%s5766_s11 + $0x198] sm:$0xff]  ;;  %v262_v10 = vld [vmem:[%s5766_s11 + $0xd0] sm:$0xff] }
  0x85   : > { %v5962_v22 = vsub.f32 %v5785_v3, %v366_v48  ;;  %v5971_v30 = vsub.f32 %v5792_v5, %v367_v50  ;;  %v5974_v31 = vsub.f32 %v5805_v11, %v368_v2  ;;  %v5980_v3 = vpack.c.bf16 %v5952_v56, %v5946_v59  ;;  %v5990_v5 = vld [vmem:[%s5766_s11 + $0xb0] sm:$0xff]  ;;  %v259_v52 = vld [vmem:[%s5766_s11 + $0xb8] sm:$0xff] }
  0x86   : > { %v412_v37 = vsub.f32 %v252_v17, %v348_v60  ;;  %v413_v41 = vsub.f32 %v253_v18, %v349_v55  ;;  %v5995_v43 = vsub.f32 %v5812_v15, %v369_v62  ;;  %v370_v48 = vunpack.c.l.bf16 %v5852_v45 }
  0x87   : > { %1267 = vmatpush1.bf16.msra.mxu1 %v463_v61  ;;  %2138 = vmatpush1.bf16.msra.mxu0 %v5890_v12  ;;  %v5956_v61 = vpack.c.bf16 %v5934_v44, %v5923_v38  ;;  %v371_v50 = vunpack.c.h.bf16 %v5852_v45  ;;  %v372_v55 = vunpack.c.l.bf16 %v5869_v54  ;;  %v6019_v62 = vpack.c.bf16 %v5986_v9, %v5983_v7  ;;  %v6048_v45 = vld [vmem:[%s5766_s11 + $0x1b0] sm:$0xff] }
  0x88   : > { %1268 = vmatprep.subr.bf16.mxu1 %v6877_v0  ;;  %2139 = vmatprep.subr.bf16.mxu0 %v6877_v0  ;;  %v6009_v2 = vsub.f32 %v5837_v35, %v370_v48  ;;  %v374_v35 = vunpack.c.l.bf16 %v5890_v12  ;;  %v375_v15 = vunpack.c.h.bf16 %v5890_v12  ;;  %v468_v11 = vpack.c.bf16 %v413_v41, %v412_v37  ;;  %6985 = vst [vmem:[#allocation20_spill] sm:$0xff] %v6048_v45 }
  0x89   : > { %v350_v1 = vunpack.c.l.bf16 %v5956_v61  ;;  %v351_v17 = vunpack.c.h.bf16 %v5956_v61  ;;  %v6012_v60 = vsub.f32 %v5840_v36, %v371_v50  ;;  %v6028_v36 = vld [vmem:[%s5766_s11 + $0x1a8] sm:$0xff]  ;;  %v6036_v50 = vsub.f32 %v5856_v46, %v372_v55 }
  0x8a   : > { %v6053_v37 = vsub.f32 %v5878_v58, %v375_v15  ;;  %v376_v15 = vunpack.c.l.bf16 %v5914_v32  ;;  %v263_v58 = vld [vmem:[%s5766_s11 + $0xd8] sm:$0xff] }
  0x8b   : > { %1269 = vmatpush1.bf16.msra.mxu1 %v464_v25  ;;  %2140 = vmatpush1.bf16.msra.mxu0 %v5914_v32  ;;  %v5965_v25 = vld [vmem:[%s5766_s11 + $0xa0] sm:$0xff]  ;;  %v414_v21 = vsub.f32 %v5923_v38, %v350_v1  ;;  %v415_v48 = vsub.f32 %v5934_v44, %v351_v17  ;;  %v6986_v38 = vmov 0   ;;  %v261_v44 = vld [vmem:[%s5766_s11 + $0xc8] sm:$0xff] }
  0x8c   : > { %1270 = vmatprep.subr.bf16.mxu1 %v6877_v0  ;;  %2141 = vmatprep.subr.bf16.mxu0 %v6877_v0  ;;  %v6003_v18 = vpack.c.bf16 %v5968_v27, %v5965_v25 }
  0x8e   : > { %v352_v46 = vunpack.c.l.bf16 %v6003_v18  ;;  %v353_v55 = vunpack.c.h.bf16 %v6003_v18 }
  0x8f   : > { %1271 = vmatpush1.bf16.msra.mxu1 %v465_v51  ;;  %2142 = vmatpush1.bf16.msra.mxu0 %v5943_v53  ;;  %v467_v51 = vpack.c.bf16 %v411_v20, %v410_v63  ;;  %v6022_v63 = vld [vmem:[%s5766_s11 + $0x1a0] sm:$0xff]  ;;  %v373_v20 = vunpack.c.h.bf16 %v5869_v54  ;;  %v6044_v54 = vsub.f32 %v5875_v57, %v374_v35  ;;  %v469_v35 = vpack.c.bf16 %v415_v48, %v414_v21 }
  0x90   : > { %1272 = vmatprep.subr.bf16.mxu1 %v6877_v0  ;;  %2143 = vmatprep.subr.bf16.mxu0 %v6877_v0  ;;  %v260_v57 = vld [vmem:[%s5766_s11 + $0xc0] sm:$0xff]  ;;  %v416_v41 = vsub.f32 %v5965_v25, %v352_v46  ;;  %v417_v12 = vsub.f32 %v5968_v27, %v353_v55  ;;  %v6091_v21 = vsub.f32 %v5893_v13, %v376_v15  ;;  %v6098_v27 = vld [vmem:[%s5766_s11 + $0x1c8] sm:$0xff]  ;;  %v6106_v15 = vld [vmem:[%s5766_s11 + $0x1d0] sm:$0xff] }
  0x91   : > { %v6077_v26 = vpack.c.bf16 %v261_v44, %v260_v57  ;;  %6990 = vst [vmem:[#allocation24_spill] sm:$0xff] %v6098_v27  ;;  %v6101_v48 = vpack.c.bf16 %v263_v58, %v262_v10  ;;  %6992 = vst [vmem:[#allocation26_spill] sm:$0xff] %v6106_v15 }
  0x92   : > { %v470_v13 = vpack.c.bf16 %v417_v12, %v416_v41  ;;  %v265_v12 = vld [vmem:[%s5766_s11 + $0xe8] sm:$0xff] }
  0x93   : > { %1273 = vmatpush1.bf16.msra.mxu1 %v466_v24  ;;  %2144 = vmatpush1.bf16.msra.mxu0 %v5980_v3  ;;  %v6031_v24 = vpack.c.bf16 %v259_v52, %v5990_v5  ;;  %6991 = vst [vmem:[#allocation25_spill] sm:$0xff] %v6101_v48  ;;  %v358_v41 = vunpack.c.l.bf16 %v6101_v48 }
  0x94   : > { %1274 = vmatprep.subr.bf16.mxu1 %v6877_v0  ;;  %2145 = vmatprep.subr.bf16.mxu0 %v6877_v0  ;;  %v6041_v0 = vsub.f32 %v5859_v47, %v373_v20  ;;  %v6059_v47 = vpack.c.bf16 %v6028_v36, %v6022_v63  ;;  %v377_v20 = vunpack.c.h.bf16 %v5914_v32  ;;  %v6088_v32 = vld [vmem:[%s5766_s11 + $0x1c0] sm:$0xff] }
  0x95   : > { %v354_v1 = vunpack.c.l.bf16 %v6031_v24  ;;  %v355_v17 = vunpack.c.h.bf16 %v6031_v24  ;;  %6989 = vst [vmem:[#allocation23_spill] sm:$0xff] %v6088_v32 }
  0x96   : > { %v6094_v25 = vsub.f32 %v5896_v14, %v377_v20  ;;  %v356_v14 = vunpack.c.l.bf16 %v6077_v26  ;;  %v357_v20 = vunpack.c.h.bf16 %v6077_v26 }
  0x97   : > { %1275 = vmatpush1.bf16.msra.mxu1 %v467_v51  ;;  %2146 = vmatpush1.bf16.msra.mxu0 %v6019_v62  ;;  %v6067_v51 = vld [vmem:[%s5766_s11 + $0x1b8] sm:$0xff]  ;;  %v419_v55 = vsub.f32 %v259_v52, %v355_v17  ;;  %v359_v17 = vunpack.c.h.bf16 %v6101_v48 }
  0x98   : > { %1276 = vmatprep.subr.bf16.mxu1 %v6986_v38  ;;  %2147 = vmatprep.subr.bf16.mxu0 %v6986_v38  ;;  %6987 = vst [vmem:[#allocation21_spill] sm:$0xff] %v6067_v51  ;;  %v6085_v4 = vpack.c.bf16 %v6067_v51, %v6048_v45  ;;  %v6120_v52 = vld [vmem:[%s5766_s11 + $0x1d8] sm:$0xff]  ;;  %v420_v46 = vsub.f32 %v260_v57, %v356_v14  ;;  %v6125_v45 = vld [vmem:[%s5766_s11 + $0x1e0] sm:$0xff]  ;;  %v6139_v57 = vld [vmem:[%s5766_s11 + $0x1e8] sm:$0xff] }
  0x99   : > { %6993 = vst [vmem:[#allocation27_spill] sm:$0xff] %v6120_v52  ;;  %v421_v51 = vsub.f32 %v261_v44, %v357_v20  ;;  %v267_v48 = vld [vmem:[%s5766_s11 + $0xf8] sm:$0xff]  ;;  %6995 = vst [vmem:[#allocation29_spill] sm:$0xff] %v6139_v57  ;;  %v422_v44 = vsub.f32 %v262_v10, %v358_v41 }
  0x9a   : > { %6988 = vst [vmem:[#allocation22_spill] sm:$0xff] %v6085_v4  ;;  %v6156_v10 = vld [vmem:[%s5766_s11 + $0x1f8] sm:$0xff] }
  0x9b   : > { %1277 = vmatpush1.bf16.msra.mxu1 %v468_v11  ;;  %2148 = vmatpush1.bf16.msra.mxu0 %v6059_v47  ;;  %v418_v11 = vsub.f32 %v5990_v5, %v354_v1  ;;  %v6114_v5 = vpack.c.bf16 %v6098_v27, %v6088_v32  ;;  %v264_v1 = vld [vmem:[%s5766_s11 + $0xe0] sm:$0xff]  ;;  %v6133_v32 = vpack.c.bf16 %v6120_v52, %v6106_v15  ;;  %v6152_v15 = vld [vmem:[%s5766_s11 + $0x1f0] sm:$0xff] }
  0x9c   : > { %1278 = vmatprep.subr.bf16.mxu1 %v6986_v38  ;;  %2149 = vmatprep.subr.bf16.mxu0 %v6986_v38  ;;  %v6127_v27 = vpack.c.bf16 %v265_v12, %v264_v1  ;;  %v6149_v52 = vpack.c.bf16 %v6139_v57, %v6125_v45  ;;  %v6166_v57 = vpack.c.bf16 %v6156_v10, %v6152_v15 }
  0x9d   : > { %6994 = vst [vmem:[#allocation28_spill] sm:$0xff] %v6133_v32 }
  0x9e   : > { %v361_v14 = vunpack.c.h.bf16 %v6127_v27 }
  0x9f   : > { %1279 = vmatpush1.bf16.msra.mxu1 %v469_v35  ;;  %2150 = vmatpush1.bf16.msra.mxu0 %v6085_v4  ;;  %v471_v35 = vpack.c.bf16 %v419_v55, %v418_v11  ;;  %v266_v4 = vld [vmem:[%s5766_s11 + $0xf0] sm:$0xff]  ;;  %v423_v11 = vsub.f32 %v263_v58, %v359_v17  ;;  %v360_v55 = vunpack.c.l.bf16 %v6127_v27  ;;  %v378_v58 = vunpack.c.l.bf16 %v5943_v53 }
  0xa0   : > { %1280 = vmatprep.subr.bf16.mxu1 %v6986_v38  ;;  %2151 = vmatprep.subr.bf16.mxu0 %v6986_v38  ;;  %v6143_v20 = vpack.c.bf16 %v267_v48, %v266_v4  ;;  %v425_v17 = vsub.f32 %v265_v12, %v361_v14 }
  0xa1   : > { %v424_v41 = vsub.f32 %v264_v1, %v360_v55 }
  0xa3   : > { %1281 = vmatpush1.bf16.msra.mxu1 %v470_v13  ;;  %2152 = vmatpush1.bf16.msra.mxu0 %v6114_v5  ;;  %v472_v13 = vpack.c.bf16 %v421_v51, %v420_v46  ;;  %v473_v51 = vpack.c.bf16 %v423_v11, %v422_v44  ;;  %v379_v46 = vunpack.c.h.bf16 %v5943_v53  ;;  %v6169_v44 = vsub.f32 %v5906_v28, %v378_v58  ;;  %v4958_v53 = vld [vmem:[#allocation5 + $0x2c] ss:$16 sps:$4 sm:$0xff]   ;;  %v4961_v58 = vld [vmem:[#allocation5 + $0x24] ss:$16 sps:$4 sm:$0xff]  }
  0xa4   : > { %1282 = vmatprep.subr.bf16.mxu1 %v6986_v38  ;;  %2153 = vmatprep.subr.bf16.mxu0 %v6986_v38  ;;  %v474_v12 = vpack.c.bf16 %v425_v17, %v424_v41 }
  0xa5   : > { %v6172_v11 = vsub.f32 %v5917_v33, %v379_v46  ;;  %v4955_v33 = vld [vmem:[#allocation5] ss:$16 sps:$4 sm:$0xff]  }
  0xa6   : > { %v4963_v46 = vld [vmem:[#allocation5 + $0x20] ss:$16 sps:$4 sm:$0xff]  }
  0xa7   : > { %1283 = vmatpush1.bf16.msra.mxu1 %v471_v35  ;;  %2154 = vmatpush1.bf16.msra.mxu0 %v6133_v32  ;;  %v362_v35 = vunpack.c.l.bf16 %v6143_v20  ;;  %v363_v32 = vunpack.c.h.bf16 %v6143_v20  ;;  %v483_v1 = vpack.c.bf16 %v6172_v11, %v6169_v44  ;;  %v4987_v44 = vld [vmem:[#allocation5 + $0xa0] ss:$16 sps:$4 sm:$0xff]  }
  0xa8   : > { %1284 = vmatprep.subr.bf16.mxu1 %v6986_v38  ;;  %2155 = vmatprep.subr.bf16.mxu0 %v6986_v38 }
  0xa9   : > { %v426_v55 = vsub.f32 %v266_v4, %v362_v35  ;;  %v427_v14 = vsub.f32 %v267_v48, %v363_v32  ;;  %v4964_v4 = vld [vmem:[#allocation5 + $0x4c] ss:$16 sps:$4 sm:$0xff]   ;;  %v380_v32 = vunpack.c.l.bf16 %v5980_v3  ;;  %v381_v48 = vunpack.c.h.bf16 %v5980_v3  ;;  %v4966_v35 = vld [vmem:[#allocation5 + $0x48] ss:$16 sps:$4 sm:$0xff]  }
  0xab   : > { %1285 = vmatpush1.bf16.msra.mxu1 %v472_v13  ;;  %2156 = vmatpush1.bf16.msra.mxu0 %v6149_v52  ;;  %v4952_v13 = vld [vmem:[#allocation5 + $0x8] ss:$16 sps:$4 sm:$0xff]   ;;  %v475_v28 = vpack.c.bf16 %v427_v14, %v426_v55  ;;  %v6192_v41 = vsub.f32 %v5946_v59, %v380_v32  ;;  %v6195_v17 = vsub.f32 %v5952_v56, %v381_v48  ;;  %v4969_v59 = vld [vmem:[#allocation5 + $0x40] ss:$16 sps:$4 sm:$0xff]   ;;  %v4973_v14 = vld [vmem:[#allocation5 + $0x64] ss:$16 sps:$4 sm:$0xff]   ;;  %v384_v32 = vunpack.c.l.bf16 %v6059_v47 }
  0xac   : > { %1286 = vmatprep.subr.bf16.mxu1 %v6986_v38  ;;  %2157 = vmatprep.subr.bf16.mxu0 %v6986_v38  ;;  %v6998_v56 = vpack.c.bf16 %v5995_v43, %v5974_v31  ;;  %v4972_v55 = vld [vmem:[#allocation5 + $0x68] ss:$16 sps:$4 sm:$0xff]   ;;  %v4975_v31 = vld [vmem:[#allocation5 + $0x60] ss:$16 sps:$4 sm:$0xff]   ;;  %v7000_v43 = vpack.c.bf16 %v6041_v0, %v6036_v50  ;;  %v7002_v50 = vpack.c.bf16 %v6094_v25, %v6091_v21  ;;  %v385_v48 = vunpack.c.h.bf16 %v6059_v47 }
  0xad   : > { %v4981_v0 = vld [vmem:[#allocation5 + $0x80] ss:$16 sps:$4 sm:$0xff]  }
  0xae   : > { %v449_v11 = vsub.f32 %v6028_v36, %v385_v48  ;;  %v6282_v36 = vld [vmem:[#allocation5 + $0xe8] ss:$16 sps:$4 sm:$0xff]   ;;  %v7008_v48 = vld [vmem:[#allocation24_spill] sm:$0xff] }
  0xaf   : > { %1287 = vmatpush1.bf16.msra.mxu1 %v473_v51  ;;  %2158 = vmatpush1.bf16.msra.mxu0 %v6166_v57  ;;  %v4960_v51 = vld [vmem:[#allocation5 + $0x28] ss:$16 sps:$4 sm:$0xff]  }
  0xb0   : > { %1288 = vmatprep.subr.bf16.mxu1 %v6986_v38  ;;  %3184 = vmatprep.subr.bf16.mxu0 %v6986_v38 }
  0xb2   : > { %2160 = vmatmul.mubr.bf16.vlgmr.msra.gmra.mrb[0].mxu0 %v4952_v13  ;;  %v4970_v13 = vld [vmem:[#allocation5 + $0x6c] ss:$16 sps:$4 sm:$0xff]  }
  0xb3   : > { %1289 = vmatpush1.bf16.msra.mxu1 %v474_v12  ;;  %2167 = vmatprep.mubr.bf16.mxu0 %v4958_v53  ;;  %v6996_v53 = vpack.c.bf16 %v5929_v40, %v5926_v39  ;;  %v4967_v12 = vld [vmem:[#allocation5 + $0x44] ss:$16 sps:$4 sm:$0xff]   ;;  %v484_v39 = vpack.c.bf16 %v6195_v17, %v6192_v41  ;;  %v6997_v40 = vpack.c.bf16 %v5971_v30, %v5962_v22  ;;  %v6213_v22 = vld [vmem:[#allocation5 + $0x8c] ss:$16 sps:$4 sm:$0xff]  }
  0xb4   : > { %1290 = vmatprep.subr.bf16.mxu1 %v6986_v38  ;;  %3185 = vmatpush1.bf16.msra.mxu0 %v5796_v8  ;;  %v6999_v30 = vpack.c.bf16 %v6012_v60, %v6009_v2  ;;  %v4979_v2 = vld [vmem:[#allocation5 + $0x84] ss:$16 sps:$4 sm:$0xff]   ;;  %v6230_v60 = vld [vmem:[#allocation5 + $0xac] ss:$16 sps:$4 sm:$0xff]  }
  0xb5   : > { %3186 = vmatprep.subr.bf16.mxu0 %v6986_v38  ;;  %v4997_v41 = vld [vmem:[#allocation5 + $0xe4] ss:$16 sps:$4 sm:$0xff]   ;;  %v6286_v17 = vld [vmem:[#allocation5 + $0x10c] ss:$16 sps:$4 sm:$0xff]  }
  0xb7   : > { %1291 = vmatpush1.bf16.msra.mxu1 %v475_v28  ;;  %v6226_v28 = vld [vmem:[#allocation5 + $0x88] ss:$16 sps:$4 sm:$0xff]  }
  0xb8   : > { %1549 = vmatprep.subr.bf16.mxu1 %v6986_v38  ;;  %3187 = vmatpush1.bf16.msra.mxu0 %v5814_v16 }
  0xb9   : > { %3188 = vmatprep.subr.bf16.mxu0 %v6986_v38 }
  0xba   : > { %1293 = vmatmul.mubr.bf16.vlgmr.msra.gmra.mrb[0].mxu1 %v4955_v33  ;;  %2168 = vmatmul.mubr.bf16.gmra.mrb[4].mxu0 %v4960_v51  ;;  %v7001_v33 = vpack.c.bf16 %v6053_v37, %v6044_v54  ;;  %v382_v54 = vunpack.c.l.bf16 %v6019_v62  ;;  %v383_v37 = vunpack.c.h.bf16 %v6019_v62  ;;  %v6246_v51 = vld [vmem:[#allocation5 + $0xa8] ss:$16 sps:$4 sm:$0xff]  }
  0xbb   : > { %1550 = vmatpush1.bf16.msra.mxu1 %v6996_v53  ;;  %1300 = vmatprep.mubr.bf16.mxu1 %v4961_v58  ;;  %v4985_v58 = vld [vmem:[#allocation5 + $0xa4] ss:$16 sps:$4 sm:$0xff]  }
  0xbc   : > { %2175 = vmatprep.mubr.bf16.mxu0 %v4964_v4  ;;  %1551 = vmatprep.subr.bf16.mxu1 %v6986_v38  ;;  %v6250_v4 = vld [vmem:[#allocation5 + $0xcc] ss:$16 sps:$4 sm:$0xff]   ;;  %v446_v21 = vsub.f32 %v5983_v7, %v382_v54  ;;  %v447_v25 = vsub.f32 %v5986_v9, %v383_v37  ;;  %v448_v9 = vsub.f32 %v6022_v63, %v384_v32  ;;  %v4991_v53 = vld [vmem:[#allocation5 + $0xc4] ss:$16 sps:$4 sm:$0xff]   ;;  %v4993_v63 = vld [vmem:[#allocation5 + $0xc0] ss:$16 sps:$4 sm:$0xff]  }
  0xbd   : > { %3189 = vmatpush1.bf16.msra.mxu0 %v5818_v19  ;;  %v5009_v54 = vld [vmem:[#allocation5 + $0x124] ss:$16 sps:$4 sm:$0xff]   ;;  %v6310_v37 = vld [vmem:[#allocation5 + $0x14c] ss:$16 sps:$4 sm:$0xff]  }
  0xbe   : > { %3190 = vmatprep.subr.bf16.mxu0 %v6986_v38  ;;  %v485_v7 = vpack.c.bf16 %v447_v25, %v446_v21  ;;  %v389_v21 = vunpack.c.h.bf16 %v6114_v5  ;;  %v7007_v25 = vld [vmem:[#allocation23_spill] sm:$0xff] }
  0xbf   : > { %1552 = vmatpush1.bf16.msra.mxu1 %v6997_v40 }
  0xc0   : > { %1553 = vmatprep.subr.bf16.mxu1 %v6986_v38 }
  0xc1   : > { %3191 = vmatpush1.bf16.msra.mxu0 %v5831_v29 }
  0xc2   : > { %1301 = vmatmul.mubr.bf16.gmra.mrb[4].mxu1 %v4963_v46  ;;  %3192 = vmatprep.subr.bf16.mxu0 %v6986_v38  ;;  %v6274_v46 = vld [vmem:[#allocation5 + $0xec] ss:$16 sps:$4 sm:$0xff]  }
  0xc3   : > { %2176 = vmatmul.mubr.bf16.gmra.mrb[8].mxu0 %v4966_v35  ;;  %1308 = vmatprep.mubr.bf16.mxu1 %v4967_v12  ;;  %v486_v35 = vpack.c.bf16 %v449_v11, %v448_v9  ;;  %v7003_v12 = vld [vmem:[#allocation25_spill] sm:$0xff] }
  0xc4   : > { %2183 = vmatprep.mubr.bf16.mxu0 %v4970_v13  ;;  %1554 = vmatpush1.bf16.msra.mxu1 %v6998_v56  ;;  %v7004_v13 = vld [vmem:[#allocation22_spill] sm:$0xff]  ;;  %v7005_v56 = vld [vmem:[#allocation20_spill] sm:$0xff]  ;;  %v6318_v11 = vld [vmem:[#allocation5 + $0x148] ss:$16 sps:$4 sm:$0xff]  }
  0xc5   : > { %1555 = vmatprep.subr.bf16.mxu1 %v6986_v38  ;;  %3193 = vmatpush1.bf16.msra.mxu0 %v5844_v42  ;;  %v387_v40 = vunpack.c.h.bf16 %v7004_v13 }
  0xc6   : > { %3194 = vmatprep.subr.bf16.mxu0 %v6986_v38 }
  0xc8   : > { %1556 = vmatpush1.bf16.msra.mxu1 %v6999_v30 }
  0xc9   : > { %1557 = vmatprep.subr.bf16.mxu1 %v6986_v38  ;;  %3195 = vmatpush1.bf16.msra.mxu0 %v5861_v49 }
  0xca   : > { %1309 = vmatmul.mubr.bf16.gmra.mrb[8].mxu1 %v4969_v59  ;;  %3196 = vmatprep.subr.bf16.mxu0 %v6986_v38  ;;  %v4999_v59 = vld [vmem:[#allocation5 + $0xe0] ss:$16 sps:$4 sm:$0xff]  }
  0xcb   : > { %2184 = vmatmul.mubr.bf16.gmra.mrb[12].mxu0 %v4972_v55  ;;  %1316 = vmatprep.mubr.bf16.mxu1 %v4973_v14  ;;  %v7006_v14 = vld [vmem:[#allocation21_spill] sm:$0xff] }
  0xcc   : > { %2191 = vmatprep.mubr.bf16.mxu0 %v6213_v22  ;;  %1558 = vmatpush1.bf16.msra.mxu1 %v7000_v43  ;;  %v451_v30 = vsub.f32 %v7006_v14, %v387_v40  ;;  %v5003_v43 = vld [vmem:[#allocation5 + $0x104] ss:$16 sps:$4 sm:$0xff]   ;;  %v6327_v40 = vld [vmem:[#allocation5 + $0x18c] ss:$16 sps:$4 sm:$0xff]  }
  0xcd   : > { %1559 = vmatprep.subr.bf16.mxu1 %v6986_v38  ;;  %3197 = vmatpush1.bf16.msra.mxu0 %v5882_v6  ;;  %v7010_v14 = vld [vmem:[#allocation26_spill] sm:$0xff] }
  0xce   : > { %3198 = vmatprep.subr.bf16.mxu0 %v6986_v38 }
  0xd0   : > { %1560 = vmatpush1.bf16.msra.mxu1 %v7001_v33 }
  0xd1   : > { %1561 = vmatprep.subr.bf16.mxu1 %v6986_v38  ;;  %3199 = vmatpush1.bf16.msra.mxu0 %v5903_v23 }
  0xd2   : > { %1317 = vmatmul.mubr.bf16.gmra.mrb[12].mxu1 %v4975_v31  ;;  %3200 = vmatprep.subr.bf16.mxu0 %v6986_v38  ;;  %v6297_v31 = vld [vmem:[#allocation5 + $0x108] ss:$16 sps:$4 sm:$0xff]  }
  0xd3   : > { %2192 = vmatmul.mubr.bf16.gmra.mrb[16].mxu0 %v6226_v28  ;;  %1324 = vmatprep.mubr.bf16.mxu1 %v4979_v2  ;;  %v6300_v2 = vld [vmem:[#allocation5 + $0x12c] ss:$16 sps:$4 sm:$0xff]  }
  0xd4   : > { %2199 = vmatprep.mubr.bf16.mxu0 %v6230_v60  ;;  %1562 = vmatpush1.bf16.msra.mxu1 %v7002_v50  ;;  %v6308_v50 = vld [vmem:[#allocation5 + $0x128] ss:$16 sps:$4 sm:$0xff]  }
  0xd5   : > { %1563 = vmatprep.subr.bf16.mxu1 %v6986_v38  ;;  %3201 = vmatpush1.bf16.msra.mxu0 %v5919_v34 }
  0xd6   : > { %3202 = vmatprep.subr.bf16.mxu0 %v6986_v38 }
  0xd8   : > { %1564 = vmatpush1.bf16.msra.mxu1 %v483_v1  ;;  %v6270_v1 = vld [vmem:[#allocation5 + $0xc8] ss:$16 sps:$4 sm:$0xff]  }
  0xd9   : > { %1565 = vmatprep.subr.bf16.mxu1 %v6986_v38  ;;  %3203 = vmatpush1.bf16.msra.mxu0 %v5956_v61 }
  0xda   : > { %1325 = vmatmul.mubr.bf16.gmra.mrb[16].mxu1 %v4981_v0  ;;  %3204 = vmatprep.subr.bf16.mxu0 %v6986_v38  ;;  %v5005_v0 = vld [vmem:[#allocation5 + $0x100] ss:$16 sps:$4 sm:$0xff]  }
  0xdb   : > { %2200 = vmatmul.mubr.bf16.gmra.mrb[20].mxu0 %v6246_v51  ;;  %1332 = vmatprep.mubr.bf16.mxu1 %v4985_v58  ;;  %v388_v58 = vunpack.c.l.bf16 %v6114_v5 }
  0xdc   : > { %2207 = vmatprep.mubr.bf16.mxu0 %v6250_v4  ;;  %1566 = vmatpush1.bf16.msra.mxu1 %v484_v39  ;;  %v386_v39 = vunpack.c.l.bf16 %v7004_v13 }
  0xdd   : > { %1567 = vmatprep.subr.bf16.mxu1 %v6986_v38  ;;  %3205 = vmatpush1.bf16.msra.mxu0 %v6003_v18  ;;  %v452_v32 = vsub.f32 %v7007_v25, %v388_v58  ;;  %v6337_v58 = vld [vmem:[#allocation5 + $0x188] ss:$16 sps:$4 sm:$0xff]   ;;  %v6341_v25 = vld [vmem:[#allocation5 + $0x1ac] ss:$16 sps:$4 sm:$0xff]  }
  0xde   : > { %3206 = vmatprep.subr.bf16.mxu0 %v6986_v38  ;;  %v450_v55 = vsub.f32 %v7005_v56, %v386_v39  ;;  %v5021_v39 = vld [vmem:[#allocation5 + $0x164] ss:$16 sps:$4 sm:$0xff]  }
  0xe0   : > { %1568 = vmatpush1.bf16.msra.mxu1 %v485_v7  ;;  %v487_v33 = vpack.c.bf16 %v451_v30, %v450_v55  ;;  %v5011_v7 = vld [vmem:[#allocation5 + $0x120] ss:$16 sps:$4 sm:$0xff]  }
  0xe1   : > { %1569 = vmatprep.subr.bf16.mxu1 %v6986_v38  ;;  %3207 = vmatpush1.bf16.msra.mxu0 %v6031_v24 }
  0xe2   : > { %1333 = vmatmul.mubr.bf16.gmra.mrb[20].mxu1 %v4987_v44  ;;  %3208 = vmatprep.subr.bf16.mxu0 %v6986_v38  ;;  %v453_v44 = vsub.f32 %v7008_v48, %v389_v21  ;;  %v6339_v21 = vld [vmem:[#allocation5 + $0x184] ss:$16 sps:$4 sm:$0xff]   ;;  %v6350_v48 = vld [vmem:[#allocation5 + $0x1a8] ss:$16 sps:$4 sm:$0xff]  }
  0xe3   : > { %2208 = vmatmul.mubr.bf16.gmra.mrb[24].mxu0 %v6270_v1  ;;  %1340 = vmatprep.mubr.bf16.mxu1 %v4991_v53  ;;  %v5015_v53 = vld [vmem:[#allocation5 + $0x144] ss:$16 sps:$4 sm:$0xff]   ;;  %7013 = vst [vmem:[#allocation22_spill] sm:$0xff] %v6339_v21 }
  0xe4   : > { %2215 = vmatprep.mubr.bf16.mxu0 %v6274_v46  ;;  %1570 = vmatpush1.bf16.msra.mxu1 %v486_v35  ;;  %v488_v9 = vpack.c.bf16 %v453_v44, %v452_v32  ;;  %v6320_v35 = vld [vmem:[#allocation5 + $0x16c] ss:$16 sps:$4 sm:$0xff]   ;;  %v6348_v32 = vld [vmem:[#allocation5 + $0x180] ss:$16 sps:$4 sm:$0xff]   ;;  %v6352_v44 = vld [vmem:[#allocation5 + $0x1a4] ss:$16 sps:$4 sm:$0xff]  }
  0xe5   : > { %1571 = vmatprep.subr.bf16.mxu1 %v6986_v38  ;;  %3209 = vmatpush1.bf16.msra.mxu0 %v6077_v26  ;;  %7014 = vst [vmem:[#allocation20_spill] sm:$0xff] %v6348_v32  ;;  %7015 = vst [vmem:[#allocation21_spill] sm:$0xff] %v6352_v44 }
  0xe6   : > { %3210 = vmatprep.subr.bf16.mxu0 %v6986_v38 }
  0xe8   : > { %1572 = vmatpush1.bf16.msra.mxu1 %v487_v33 }
  0xe9   : > { %3211 = vmatpush1.bf16.msra.mxu0 %v7003_v12  ;;  %1573 = vmatprep.subr.bf16.mxu1 %v6986_v38 }
  0xea   : > { %1341 = vmatmul.mubr.bf16.gmra.mrb[24].mxu1 %v4993_v63  ;;  %3212 = vmatprep.subr.bf16.mxu0 %v6986_v38  ;;  %v5017_v63 = vld [vmem:[#allocation5 + $0x140] ss:$16 sps:$4 sm:$0xff]  }
  0xeb   : > { %2216 = vmatmul.mubr.bf16.gmra.mrb[28].mxu0 %v6282_v36  ;;  %1348 = vmatprep.mubr.bf16.mxu1 %v4997_v41  ;;  %v6325_v41 = vld [vmem:[#allocation5 + $0x168] ss:$16 sps:$4 sm:$0xff]  }
  0xec   : > { %2223 = vmatprep.mubr.bf16.mxu0 %v6286_v17  ;;  %1574 = vmatpush1.bf16.msra.mxu1 %v488_v9  ;;  %v392_v9 = vunpack.c.l.bf16 %v6149_v52 }
  0xed   : > { %3213 = vmatpush1.bf16.msra.mxu0 %v6127_v27  ;;  %1575 = vmatprep.subr.bf16.mxu1 %v6986_v38 }
  0xee   : > { %3214 = vmatprep.subr.bf16.mxu0 %v6986_v38 }
  0xf1   : > { %3215 = vmatpush1.bf16.msra.mxu0 %v6143_v20 }
  0xf2   : > { %1349 = vmatmul.mubr.bf16.gmra.mrb[28].mxu1 %v4999_v59  ;;  %3473 = vmatprep.subr.bf16.mxu0 %v6986_v38  ;;  %v7009_v59 = vld [vmem:[#allocation28_spill] sm:$0xff] }
  0xf3   : > { %2224 = vmatmul.mubr.bf16.gmra.mrb[32].mxu0 %v6297_v31  ;;  %1356 = vmatprep.mubr.bf16.mxu1 %v5003_v43  ;;  %v390_v56 = vunpack.c.l.bf16 %v7009_v59  ;;  %v391_v55 = vunpack.c.h.bf16 %v7009_v59  ;;  %v7011_v43 = vld [vmem:[#allocation27_spill] sm:$0xff] }
  0xf4   : > { %2231 = vmatprep.mubr.bf16.mxu0 %v6300_v2 }
  0xf5   : > { %v454_v30 = vsub.f32 %v7010_v14, %v390_v56  ;;  %v455_v33 = vsub.f32 %v7011_v43, %v391_v55  ;;  %v6364_v55 = vld [vmem:[#allocation5 + $0x1a0] ss:$16 sps:$4 sm:$0xff]   ;;  %v6368_v43 = vld [vmem:[#allocation5 + $0x1c4] ss:$16 sps:$4 sm:$0xff]  }
  0xf6   : > { %7017 = vst [vmem:[#allocation23_spill] sm:$0xff] %v6364_v55  ;;  %7018 = vst [vmem:[#allocation24_spill] sm:$0xff] %v6368_v43 }
  0xfa   : > { %1357 = vmatmul.mubr.bf16.gmra.mrb[32].mxu1 %v5005_v0  ;;  %v6335_v0 = vld [vmem:[#allocation5 + $0x160] ss:$16 sps:$4 sm:$0xff]  }
  0xfb   : > { %2232 = vmatmul.mubr.bf16.gmra.mrb[36].mxu0 %v6308_v50  ;;  %1364 = vmatprep.mubr.bf16.mxu1 %v5009_v54  ;;  %7012 = vst [vmem:[#allocation25_spill] sm:$0xff] %v6335_v0  ;;  %v489_v54 = vpack.c.bf16 %v455_v33, %v454_v30  ;;  %v6366_v30 = vld [vmem:[#allocation5 + $0x1c8] ss:$16 sps:$4 sm:$0xff]   ;;  %v6370_v33 = vld [vmem:[#allocation5 + $0x1ec] ss:$16 sps:$4 sm:$0xff]  }
  0xfc   : > { %2239 = vmatprep.mubr.bf16.mxu0 %v6310_v37 }
  0xfd   : > { %1576 = vmatpush1.bf16.msra.mxu1 %v489_v54  ;;  %v6379_v54 = vld [vmem:[#allocation5 + $0x1e8] ss:$16 sps:$4 sm:$0xff]  }
  0xfe   : > { %1577 = vmatprep.subr.bf16.mxu1 %v6986_v38 }
 0x102   : > { %1365 = vmatmul.mubr.bf16.gmra.mrb[36].mxu1 %v5011_v7  ;;  %v6354_v7 = vld [vmem:[#allocation5 + $0x1cc] ss:$16 sps:$4 sm:$0xff]  }
 0x103   : > { %2240 = vmatmul.mubr.bf16.gmra.mrb[40].mxu0 %v6318_v11  ;;  %1372 = vmatprep.mubr.bf16.mxu1 %v5015_v53  ;;  %v393_v53 = vunpack.c.h.bf16 %v6149_v52 }
 0x104   : > { %2247 = vmatprep.mubr.bf16.mxu0 %v6320_v35 }
 0x10a   : > { %1373 = vmatmul.mubr.bf16.gmra.mrb[40].mxu1 %v5017_v63  ;;  %v456_v63 = vsub.f32 %v6125_v45, %v392_v9  ;;  %v6377_v45 = vld [vmem:[#allocation5 + $0x1c0] ss:$16 sps:$4 sm:$0xff]   ;;  %v6381_v9 = vld [vmem:[#allocation5 + $0x1e4] ss:$16 sps:$4 sm:$0xff]  }
 0x10b   : > { %2248 = vmatmul.mubr.bf16.gmra.mrb[44].mxu0 %v6325_v41  ;;  %1380 = vmatprep.mubr.bf16.mxu1 %v5021_v39  ;;  %v7016_v39 = vld [vmem:[#allocation29_spill] sm:$0xff]  ;;  %7019 = vst [vmem:[#allocation28_spill] sm:$0xff] %v6377_v45  ;;  %7020 = vst [vmem:[#allocation26_spill] sm:$0xff] %v6381_v9 }
 0x10c   : > { %2255 = vmatprep.mubr.bf16.mxu0 %v6327_v40  ;;  %v457_v56 = vsub.f32 %v7016_v39, %v393_v53  ;;  %v6383_v53 = vld [vmem:[#allocation5 + $0x20c] ss:$16 sps:$4 sm:$0xff]   ;;  %v395_v39 = vunpack.c.h.bf16 %v6166_v57 }
 0x10e   : > { %v490_v14 = vpack.c.bf16 %v457_v56, %v456_v63  ;;  %v394_v63 = vunpack.c.l.bf16 %v6166_v57 }
 0x110   : > { %1578 = vmatpush1.bf16.msra.mxu1 %v490_v14  ;;  %v458_v56 = vsub.f32 %v6152_v15, %v394_v63  ;;  %v459_v14 = vsub.f32 %v6156_v10, %v395_v39  ;;  %v6406_v15 = vld [vmem:[#allocation5 + $0x200] ss:$16 sps:$4 sm:$0xff]   ;;  %v6408_v10 = vld [vmem:[#allocation5 + $0x228] ss:$16 sps:$4 sm:$0xff]   ;;  %v6410_v63 = vld [vmem:[#allocation5 + $0x224] ss:$16 sps:$4 sm:$0xff]  }
 0x111   : > { %1579 = vmatprep.subr.bf16.mxu1 %v6986_v38  ;;  %7023 = vst [vmem:[#allocation30_spill] sm:$0xff] %v6406_v15  ;;  %7024 = vst [vmem:[#allocation31_spill] sm:$0xff] %v6410_v63  ;;  %v6412_v39 = vld [vmem:[#allocation5 + $0x24c] ss:$16 sps:$4 sm:$0xff]  }
 0x112   : > { %1381 = vmatmul.mubr.bf16.gmra.mrb[44].mxu1 %v6335_v0  ;;  %v6448_v0 = vld [vmem:[#allocation5 + $0x2ac] ss:$16 sps:$4 sm:$0xff]  }
 0x113   : > { %2256 = vmatmul.mubr.bf16.gmra.mrb[48].mxu0 %v6337_v58  ;;  %1388 = vmatprep.mubr.bf16.mxu1 %v6339_v21  ;;  %v6446_v21 = vld [vmem:[#allocation5 + $0x284] ss:$16 sps:$4 sm:$0xff]   ;;  %7036 = vst [vmem:[#allocation43_spill] sm:$0xff] %v6448_v0 }
 0x114   : > { %2263 = vmatprep.mubr.bf16.mxu0 %v6341_v25  ;;  %7035 = vst [vmem:[#allocation42_spill] sm:$0xff] %v6446_v21 }
 0x11a   : > { %1389 = vmatmul.mubr.bf16.gmra.mrb[48].mxu1 %v6348_v32  ;;  %v6399_v32 = vld [vmem:[#allocation5 + $0x22c] ss:$16 sps:$4 sm:$0xff]  }
 0x11b   : > { %2264 = vmatmul.mubr.bf16.gmra.mrb[52].mxu0 %v6350_v48  ;;  %1396 = vmatprep.mubr.bf16.mxu1 %v6352_v44  ;;  %v6395_v44 = vld [vmem:[#allocation5 + $0x208] ss:$16 sps:$4 sm:$0xff]  }
 0x11c   : > { %2271 = vmatprep.mubr.bf16.mxu0 %v6354_v7 }
 0x122   : > { %1397 = vmatmul.mubr.bf16.gmra.mrb[52].mxu1 %v6364_v55  ;;  %v491_v55 = vpack.c.bf16 %v459_v14, %v458_v56  ;;  %v6420_v56 = vld [vmem:[#allocation5 + $0x248] ss:$16 sps:$4 sm:$0xff]   ;;  %v6422_v14 = vld [vmem:[#allocation5 + $0x244] ss:$16 sps:$4 sm:$0xff]  }
 0x123   : > { %2272 = vmatmul.mubr.bf16.gmra.mrb[56].mxu0 %v6366_v30  ;;  %1404 = vmatprep.mubr.bf16.mxu1 %v6368_v43  ;;  %v6393_v43 = vld [vmem:[#allocation5 + $0x1e0] ss:$16 sps:$4 sm:$0xff]   ;;  %7026 = vst [vmem:[#allocation33_spill] sm:$0xff] %v6420_v56  ;;  %7027 = vst [vmem:[#allocation34_spill] sm:$0xff] %v6422_v14 }
 0x124   : > { %2279 = vmatprep.mubr.bf16.mxu0 %v6370_v33  ;;  %7021 = vst [vmem:[#allocation27_spill] sm:$0xff] %v6393_v43  ;;  %1580 = vmatpush1.bf16.msra.mxu1 %v491_v55  ;;  %v6418_v55 = vld [vmem:[#allocation5 + $0x220] ss:$16 sps:$4 sm:$0xff]  }
 0x125   : > { %1838 = vmatprep.subr.bf16.mxu1 %v6986_v38  ;;  %7025 = vst [vmem:[#allocation32_spill] sm:$0xff] %v6418_v55 }
 0x12a   : > { %1405 = vmatmul.mubr.bf16.gmra.mrb[56].mxu1 %v6377_v45  ;;  %v6397_v45 = vld [vmem:[#allocation5 + $0x204] ss:$16 sps:$4 sm:$0xff]  }
 0x12b   : > { %2280 = vmatmul.mubr.bf16.gmra.mrb[60].mxu0 %v6379_v54  ;;  %1412 = vmatprep.mubr.bf16.mxu1 %v6381_v9  ;;  %7022 = vst [vmem:[#allocation29_spill] sm:$0xff] %v6397_v45  ;;  %v6436_v9 = vld [vmem:[#allocation5 + $0x28c] ss:$16 sps:$4 sm:$0xff]  }
 0x12c   : > { %2287 = vmatprep.mubr.bf16.mxu0 %v6383_v53  ;;  %7032 = vst [vmem:[#allocation39_spill] sm:$0xff] %v6436_v9 }
 0x132   : > { %1413 = vmatmul.mubr.bf16.gmra.mrb[60].mxu1 %v6393_v43  ;;  %v6434_v43 = vld [vmem:[#allocation5 + $0x264] ss:$16 sps:$4 sm:$0xff]  }
 0x133   : > { %2288 = vmatmul.mubr.bf16.gmra.mrb[64].mxu0 %v6395_v44  ;;  %1420 = vmatprep.mubr.bf16.mxu1 %v6397_v45  ;;  %v6424_v45 = vld [vmem:[#allocation5 + $0x26c] ss:$16 sps:$4 sm:$0xff]   ;;  %7031 = vst [vmem:[#allocation38_spill] sm:$0xff] %v6434_v43 }
 0x134   : > { %2295 = vmatprep.mubr.bf16.mxu0 %v6399_v32  ;;  %7028 = vst [vmem:[#allocation35_spill] sm:$0xff] %v6424_v45 }
 0x13a   : > { %1421 = vmatmul.mubr.bf16.gmra.mrb[64].mxu1 %v6406_v15  ;;  %v6430_v15 = vld [vmem:[#allocation5 + $0x240] ss:$16 sps:$4 sm:$0xff]  }
 0x13b   : > { %2296 = vmatmul.mubr.bf16.gmra.mrb[68].mxu0 %v6408_v10  ;;  %1428 = vmatprep.mubr.bf16.mxu1 %v6410_v63  ;;  %7029 = vst [vmem:[#allocation36_spill] sm:$0xff] %v6430_v15  ;;  %v6432_v63 = vld [vmem:[#allocation5 + $0x268] ss:$16 sps:$4 sm:$0xff]  }
 0x13c   : > { %2303 = vmatprep.mubr.bf16.mxu0 %v6412_v39  ;;  %7030 = vst [vmem:[#allocation37_spill] sm:$0xff] %v6432_v63 }
 0x142   : > { %1429 = vmatmul.mubr.bf16.gmra.mrb[68].mxu1 %v6418_v55  ;;  %v6442_v55 = vld [vmem:[#allocation5 + $0x260] ss:$16 sps:$4 sm:$0xff]  }
 0x143   : > { %2304 = vmatmul.mubr.bf16.gmra.mrb[72].mxu0 %v6420_v56  ;;  %1436 = vmatprep.mubr.bf16.mxu1 %v6422_v14  ;;  %7033 = vst [vmem:[#allocation40_spill] sm:$0xff] %v6442_v55  ;;  %v6444_v14 = vld [vmem:[#allocation5 + $0x288] ss:$16 sps:$4 sm:$0xff]   ;;  %v5150_v56 = vld [vmem:[#allocation7 + $0x44] ss:$16 sps:$4 sm:$0xff]  }
 0x144   : > { %2311 = vmatprep.mubr.bf16.mxu0 %v6424_v45  ;;  %7034 = vst [vmem:[#allocation41_spill] sm:$0xff] %v6444_v14  ;;  %v7080_v45 = vld [vmem:[#allocation12_spill] sm:$0xff] }
 0x14a   : > { %1437 = vmatmul.mubr.bf16.gmra.mrb[72].mxu1 %v6430_v15  ;;  %v6454_v15 = vld [vmem:[#allocation5 + $0x280] ss:$16 sps:$4 sm:$0xff]  }
 0x14b   : > { %2312 = vmatmul.mubr.bf16.gmra.mrb[76].mxu0 %v6432_v63  ;;  %1444 = vmatprep.mubr.bf16.mxu1 %v6434_v43  ;;  %7037 = vst [vmem:[#allocation44_spill] sm:$0xff] %v6454_v15  ;;  %v6456_v43 = vld [vmem:[#allocation5 + $0x2a8] ss:$16 sps:$4 sm:$0xff]   ;;  %v6460_v63 = vld [vmem:[#allocation5 + $0x2cc] ss:$16 sps:$4 sm:$0xff]  }
 0x14c   : > { %2319 = vmatprep.mubr.bf16.mxu0 %v6436_v9  ;;  %7038 = vst [vmem:[#allocation45_spill] sm:$0xff] %v6456_v43  ;;  %v6458_v9 = vld [vmem:[#allocation5 + $0x2a4] ss:$16 sps:$4 sm:$0xff]   ;;  %7040 = vst [vmem:[#allocation47_spill] sm:$0xff] %v6460_v63 }
 0x14d   : > { %7039 = vst [vmem:[#allocation46_spill] sm:$0xff] %v6458_v9 }
 0x152   : > { %1445 = vmatmul.mubr.bf16.gmra.mrb[76].mxu1 %v6442_v55  ;;  %v6466_v55 = vld [vmem:[#allocation5 + $0x2a0] ss:$16 sps:$4 sm:$0xff]  }
 0x153   : > { %2320 = vmatmul.mubr.bf16.gmra.mrb[80].mxu0 %v6444_v14  ;;  %1452 = vmatprep.mubr.bf16.mxu1 %v6446_v21  ;;  %7041 = vst [vmem:[#allocation48_spill] sm:$0xff] %v6466_v55  ;;  %v6468_v21 = vld [vmem:[#allocation5 + $0x2c8] ss:$16 sps:$4 sm:$0xff]   ;;  %v6472_v14 = vld [vmem:[#allocation5 + $0x2ec] ss:$16 sps:$4 sm:$0xff]  }
 0x154   : > { %2327 = vmatprep.mubr.bf16.mxu0 %v6448_v0  ;;  %7042 = vst [vmem:[#allocation49_spill] sm:$0xff] %v6468_v21  ;;  %v6470_v0 = vld [vmem:[#allocation5 + $0x2c4] ss:$16 sps:$4 sm:$0xff]   ;;  %7044 = vst [vmem:[#allocation51_spill] sm:$0xff] %v6472_v14 }
 0x155   : > { %7043 = vst [vmem:[#allocation50_spill] sm:$0xff] %v6470_v0 }
 0x15a   : > { %1453 = vmatmul.mubr.bf16.gmra.mrb[80].mxu1 %v6454_v15  ;;  %v6478_v15 = vld [vmem:[#allocation5 + $0x2c0] ss:$16 sps:$4 sm:$0xff]  }
 0x15b   : > { %2328 = vmatmul.mubr.bf16.gmra.mrb[84].mxu0 %v6456_v43  ;;  %1460 = vmatprep.mubr.bf16.mxu1 %v6458_v9  ;;  %7045 = vst [vmem:[#allocation52_spill] sm:$0xff] %v6478_v15  ;;  %v6480_v9 = vld [vmem:[#allocation5 + $0x2e8] ss:$16 sps:$4 sm:$0xff]   ;;  %v6484_v43 = vld [vmem:[#allocation5 + $0x30c] ss:$16 sps:$4 sm:$0xff]  }
 0x15c   : > { %2335 = vmatprep.mubr.bf16.mxu0 %v6460_v63  ;;  %7046 = vst [vmem:[#allocation53_spill] sm:$0xff] %v6480_v9  ;;  %v6482_v63 = vld [vmem:[#allocation5 + $0x2e4] ss:$16 sps:$4 sm:$0xff]   ;;  %7048 = vst [vmem:[#allocation55_spill] sm:$0xff] %v6484_v43 }
 0x15d   : > { %7047 = vst [vmem:[#allocation54_spill] sm:$0xff] %v6482_v63 }
 0x162   : > { %1461 = vmatmul.mubr.bf16.gmra.mrb[84].mxu1 %v6466_v55  ;;  %v6490_v55 = vld [vmem:[#allocation5 + $0x2e0] ss:$16 sps:$4 sm:$0xff]  }
 0x163   : > { %2336 = vmatmul.mubr.bf16.gmra.mrb[88].mxu0 %v6468_v21  ;;  %1468 = vmatprep.mubr.bf16.mxu1 %v6470_v0  ;;  %7049 = vst [vmem:[#allocation56_spill] sm:$0xff] %v6490_v55  ;;  %v6492_v0 = vld [vmem:[#allocation5 + $0x308] ss:$16 sps:$4 sm:$0xff]   ;;  %v6496_v21 = vld [vmem:[#allocation5 + $0x32c] ss:$16 sps:$4 sm:$0xff]  }
 0x164   : > { %2343 = vmatprep.mubr.bf16.mxu0 %v6472_v14  ;;  %7050 = vst [vmem:[#allocation57_spill] sm:$0xff] %v6492_v0  ;;  %v6494_v14 = vld [vmem:[#allocation5 + $0x304] ss:$16 sps:$4 sm:$0xff]   ;;  %7052 = vst [vmem:[#allocation59_spill] sm:$0xff] %v6496_v21 }
 0x165   : > { %7051 = vst [vmem:[#allocation58_spill] sm:$0xff] %v6494_v14 }
 0x16a   : > { %1469 = vmatmul.mubr.bf16.gmra.mrb[88].mxu1 %v6478_v15  ;;  %v6502_v15 = vld [vmem:[#allocation5 + $0x300] ss:$16 sps:$4 sm:$0xff]  }
 0x16b   : > { %2344 = vmatmul.mubr.bf16.gmra.mrb[92].mxu0 %v6480_v9  ;;  %1476 = vmatprep.mubr.bf16.mxu1 %v6482_v63  ;;  %7053 = vst [vmem:[#allocation60_spill] sm:$0xff] %v6502_v15  ;;  %v6504_v63 = vld [vmem:[#allocation5 + $0x328] ss:$16 sps:$4 sm:$0xff]   ;;  %v6508_v9 = vld [vmem:[#allocation5 + $0x34c] ss:$16 sps:$4 sm:$0xff]  }
 0x16c   : > { %2351 = vmatprep.mubr.bf16.mxu0 %v6484_v43  ;;  %7054 = vst [vmem:[#allocation61_spill] sm:$0xff] %v6504_v63  ;;  %v6506_v43 = vld [vmem:[#allocation5 + $0x324] ss:$16 sps:$4 sm:$0xff]   ;;  %7056 = vst [vmem:[#allocation63_spill] sm:$0xff] %v6508_v9 }
 0x16d   : > { %7055 = vst [vmem:[#allocation62_spill] sm:$0xff] %v6506_v43 }
 0x172   : > { %1477 = vmatmul.mubr.bf16.gmra.mrb[92].mxu1 %v6490_v55  ;;  %v6514_v55 = vld [vmem:[#allocation5 + $0x320] ss:$16 sps:$4 sm:$0xff]  }
 0x173   : > { %2352 = vmatmul.mubr.bf16.gmra.mrb[96].mxu0 %v6492_v0  ;;  %1484 = vmatprep.mubr.bf16.mxu1 %v6494_v14  ;;  %7057 = vst [vmem:[#allocation64_spill] sm:$0xff] %v6514_v55  ;;  %v6516_v14 = vld [vmem:[#allocation5 + $0x348] ss:$16 sps:$4 sm:$0xff]   ;;  %v6520_v0 = vld [vmem:[#allocation5 + $0x36c] ss:$16 sps:$4 sm:$0xff]  }
 0x174   : > { %2359 = vmatprep.mubr.bf16.mxu0 %v6496_v21  ;;  %7058 = vst [vmem:[#allocation65_spill] sm:$0xff] %v6516_v14  ;;  %v6518_v21 = vld [vmem:[#allocation5 + $0x344] ss:$16 sps:$4 sm:$0xff]   ;;  %7060 = vst [vmem:[#allocation67_spill] sm:$0xff] %v6520_v0 }
 0x175   : > { %7059 = vst [vmem:[#allocation66_spill] sm:$0xff] %v6518_v21 }
 0x17a   : > { %1485 = vmatmul.mubr.bf16.gmra.mrb[96].mxu1 %v6502_v15  ;;  %v6526_v15 = vld [vmem:[#allocation5 + $0x340] ss:$16 sps:$4 sm:$0xff]  }
 0x17b   : > { %2360 = vmatmul.mubr.bf16.gmra.mrb[100].mxu0 %v6504_v63  ;;  %1492 = vmatprep.mubr.bf16.mxu1 %v6506_v43  ;;  %7061 = vst [vmem:[#allocation68_spill] sm:$0xff] %v6526_v15  ;;  %v6528_v43 = vld [vmem:[#allocation5 + $0x368] ss:$16 sps:$4 sm:$0xff]   ;;  %v6532_v63 = vld [vmem:[#allocation5 + $0x38c] ss:$16 sps:$4 sm:$0xff]  }
 0x17c   : > { %2367 = vmatprep.mubr.bf16.mxu0 %v6508_v9  ;;  %7062 = vst [vmem:[#allocation69_spill] sm:$0xff] %v6528_v43  ;;  %v6530_v9 = vld [vmem:[#allocation5 + $0x364] ss:$16 sps:$4 sm:$0xff]   ;;  %7064 = vst [vmem:[#allocation71_spill] sm:$0xff] %v6532_v63 }
 0x17d   : > { %7063 = vst [vmem:[#allocation70_spill] sm:$0xff] %v6530_v9 }
 0x182   : > { %1493 = vmatmul.mubr.bf16.gmra.mrb[100].mxu1 %v6514_v55  ;;  %v6538_v55 = vld [vmem:[#allocation5 + $0x360] ss:$16 sps:$4 sm:$0xff]  }
 0x183   : > { %2368 = vmatmul.mubr.bf16.gmra.mrb[104].mxu0 %v6516_v14  ;;  %1500 = vmatprep.mubr.bf16.mxu1 %v6518_v21  ;;  %7065 = vst [vmem:[#allocation72_spill] sm:$0xff] %v6538_v55  ;;  %v6540_v21 = vld [vmem:[#allocation5 + $0x388] ss:$16 sps:$4 sm:$0xff]   ;;  %v6544_v14 = vld [vmem:[#allocation5 + $0x3ac] ss:$16 sps:$4 sm:$0xff]  }
 0x184   : > { %2375 = vmatprep.mubr.bf16.mxu0 %v6520_v0  ;;  %7066 = vst [vmem:[#allocation73_spill] sm:$0xff] %v6540_v21  ;;  %v6542_v0 = vld [vmem:[#allocation5 + $0x384] ss:$16 sps:$4 sm:$0xff]   ;;  %7068 = vst [vmem:[#allocation75_spill] sm:$0xff] %v6544_v14 }
 0x185   : > { %7067 = vst [vmem:[#allocation74_spill] sm:$0xff] %v6542_v0 }
 0x18a   : > { %1501 = vmatmul.mubr.bf16.gmra.mrb[104].mxu1 %v6526_v15  ;;  %v6550_v15 = vld [vmem:[#allocation5 + $0x380] ss:$16 sps:$4 sm:$0xff]  }
 0x18b   : > { %2376 = vmatmul.mubr.bf16.gmra.mrb[108].mxu0 %v6528_v43  ;;  %1508 = vmatprep.mubr.bf16.mxu1 %v6530_v9  ;;  %7069 = vst [vmem:[#allocation76_spill] sm:$0xff] %v6550_v15  ;;  %v6552_v9 = vld [vmem:[#allocation5 + $0x3a8] ss:$16 sps:$4 sm:$0xff]   ;;  %v6556_v43 = vld [vmem:[#allocation5 + $0x3cc] ss:$16 sps:$4 sm:$0xff]  }
 0x18c   : > { %2383 = vmatprep.mubr.bf16.mxu0 %v6532_v63  ;;  %7070 = vst [vmem:[#allocation77_spill] sm:$0xff] %v6552_v9  ;;  %v6554_v63 = vld [vmem:[#allocation5 + $0x3a4] ss:$16 sps:$4 sm:$0xff]   ;;  %7072 = vst [vmem:[#allocation79_spill] sm:$0xff] %v6556_v43 }
 0x18d   : > { %7071 = vst [vmem:[#allocation78_spill] sm:$0xff] %v6554_v63 }
 0x192   : > { %1509 = vmatmul.mubr.bf16.gmra.mrb[108].mxu1 %v6538_v55  ;;  %v6562_v55 = vld [vmem:[#allocation5 + $0x3a0] ss:$16 sps:$4 sm:$0xff]  }
 0x193   : > { %2384 = vmatmul.mubr.bf16.gmra.mrb[112].mxu0 %v6540_v21  ;;  %1516 = vmatprep.mubr.bf16.mxu1 %v6542_v0  ;;  %7073 = vst [vmem:[#allocation80_spill] sm:$0xff] %v6562_v55  ;;  %v6564_v0 = vld [vmem:[#allocation5 + $0x3c8] ss:$16 sps:$4 sm:$0xff]   ;;  %v6568_v21 = vld [vmem:[#allocation5 + $0x3ec] ss:$16 sps:$4 sm:$0xff]  }
 0x194   : > { %2391 = vmatprep.mubr.bf16.mxu0 %v6544_v14  ;;  %7074 = vst [vmem:[#allocation81_spill] sm:$0xff] %v6564_v0  ;;  %v6566_v14 = vld [vmem:[#allocation5 + $0x3c4] ss:$16 sps:$4 sm:$0xff]   ;;  %7076 = vst [vmem:[#allocation83_spill] sm:$0xff] %v6568_v21 }
 0x195   : > { %7075 = vst [vmem:[#allocation82_spill] sm:$0xff] %v6566_v14 }
 0x19a   : > { %1517 = vmatmul.mubr.bf16.gmra.mrb[112].mxu1 %v6550_v15  ;;  %v6574_v15 = vld [vmem:[#allocation5 + $0x3c0] ss:$16 sps:$4 sm:$0xff]  }
 0x19b   : > { %2392 = vmatmul.mubr.bf16.gmra.mrb[116].mxu0 %v6552_v9  ;;  %1524 = vmatprep.mubr.bf16.mxu1 %v6554_v63  ;;  %7077 = vst [vmem:[#allocation84_spill] sm:$0xff] %v6574_v15  ;;  %v6576_v63 = vld [vmem:[#allocation5 + $0x3e8] ss:$16 sps:$4 sm:$0xff]   ;;  %v5146_v9 = vld [vmem:[#allocation7 + $0x4] ss:$16 sps:$4 sm:$0xff]  }
 0x19c   : > { %2399 = vmatprep.mubr.bf16.mxu0 %v6556_v43  ;;  %7078 = vst [vmem:[#allocation85_spill] sm:$0xff] %v6576_v63  ;;  %v6578_v43 = vld [vmem:[#allocation5 + $0x3e4] ss:$16 sps:$4 sm:$0xff]  }
 0x1a2   : > { %1525 = vmatmul.mubr.bf16.gmra.mrb[116].mxu1 %v6562_v55  ;;  %v6583_v55 = vld [vmem:[#allocation5 + $0x3e0] ss:$16 sps:$4 sm:$0xff]  }
 0x1a3   : > { %2400 = vmatmul.mubr.bf16.gmra.mrb[120].mxu0 %v6564_v0  ;;  %1532 = vmatprep.mubr.bf16.mxu1 %v6566_v14  ;;  %7079 = vst [vmem:[#allocation86_spill] sm:$0xff] %v6583_v55  ;;  %v5144_v0 = vld [vmem:[#allocation7] ss:$16 sps:$4 sm:$0xff]   ;;  %v5147_v14 = vld [vmem:[#allocation7 + $0x24] ss:$16 sps:$4 sm:$0xff]  }
 0x1a4   : > { %2407 = vmatprep.mubr.bf16.mxu0 %v6568_v21  ;;  %v5336_v21 = vld [vmem:[#allocation5 + $0xc] ss:$16 sps:$4 sm:$0xff]  }
 0x1aa   : > { %1533 = vmatmul.mubr.bf16.gmra.mrb[120].mxu1 %v6574_v15  ;;  %v5149_v15 = vld [vmem:[#allocation7 + $0x20] ss:$16 sps:$4 sm:$0xff]  }
 0x1ab   : > { %2408 = vmatmul.mubr.bf16.gmra.mrb[124].mxu0 %v6576_v63  ;;  %1540 = vmatprep.mubr.bf16.mxu1 %v6578_v43  ;;  %v7081_v63 = vld [vmem:[#allocation13_spill] sm:$0xff] }
 0x1ac   : > { %3216 = vmatprep.mubr.bf16.mxu0 %v5146_v9  ;;  %v5337_v9 = vld [vmem:[#allocation5 + $0x8] ss:$16 sps:$4 sm:$0xff]  }
 0x1b2   : > { %1541 = vmatmul.mubr.bf16.gmra.mrb[124].mxu1 %v6583_v55  ;;  %v5338_v55 = vld [vmem:[#allocation5 + $0x2c] ss:$16 sps:$4 sm:$0xff]  }
 0x1b3   : > { %3217 = vmatmul.mubr.bf16.vlgmr.msra.gmra.mrb[0].mxu0 %v5144_v0  ;;  %1581 = vmatprep.mubr.bf16.mxu1 %v5336_v21  ;;  %v7082_v0 = vld [vmem:[#allocation14_spill] sm:$0xff] }
 0x1b4   : > { %3224 = vmatprep.mubr.bf16.mxu0 %v5147_v14  ;;  %3474 = vmatpush1.bf16.msra.mxu0 %v7080_v45  ;;  %v5152_v21 = vld [vmem:[#allocation7 + $0x40] ss:$16 sps:$4 sm:$0xff]   ;;  %v5153_v45 = vld [vmem:[#allocation7 + $0x64] ss:$16 sps:$4 sm:$0xff]   ;;  %v5339_v14 = vld [vmem:[#allocation5 + $0x28] ss:$16 sps:$4 sm:$0xff]  }
 0x1b5   : > { %3475 = vmatprep.subr.bf16.mxu0 %v6986_v38 }
 0x1b8   : > { %3476 = vmatpush1.bf16.msra.mxu0 %v7081_v63  ;;  %v7083_v63 = vld [vmem:[#allocation15_spill] sm:$0xff] }
 0x1b9   : > { %3477 = vmatprep.subr.bf16.mxu0 %v6986_v38 }
 0x1ba   : > { %1582 = vmatmul.mubr.bf16.vlgmr.msra.gmra.mrb[0].mxu1 %v5337_v9  ;;  %v5341_v9 = vld [vmem:[#allocation5 + $0x48] ss:$16 sps:$4 sm:$0xff]  }
 0x1bb   : > { %1839 = vmatpush1.bf16.msra.mxu1 %v5796_v8  ;;  %3225 = vmatmul.mubr.bf16.gmra.mrb[4].mxu0 %v5149_v15  ;;  %v5340_v8 = vld [vmem:[#allocation5 + $0x4c] ss:$16 sps:$4 sm:$0xff]   ;;  %v7084_v15 = vld [vmem:[#allocation16_spill] sm:$0xff] }
 0x1bc   : > { %1589 = vmatprep.mubr.bf16.mxu1 %v5338_v55  ;;  %3232 = vmatprep.mubr.bf16.mxu0 %v5150_v56  ;;  %v5156_v55 = vld [vmem:[#allocation7 + $0x84] ss:$16 sps:$4 sm:$0xff]   ;;  %v7085_v56 = vld [vmem:[#allocation17_spill] sm:$0xff] }
 0x1bd   : > { %1840 = vmatprep.subr.bf16.mxu1 %v6986_v38  ;;  %3478 = vmatpush1.bf16.msra.mxu0 %v7082_v0  ;;  %v7086_v0 = vld [vmem:[#allocation18_spill] sm:$0xff] }
 0x1be   : > { %3479 = vmatprep.subr.bf16.mxu0 %v6986_v38 }
 0x1bf   : > { %1841 = vmatpush1.bf16.msra.mxu1 %v5814_v16  ;;  %v5155_v16 = vld [vmem:[#allocation7 + $0x60] ss:$16 sps:$4 sm:$0xff]  }
 0x1c0   : > { %1842 = vmatprep.subr.bf16.mxu1 %v6986_v38 }
 0x1c1   : > { %3480 = vmatpush1.bf16.msra.mxu0 %v7083_v63  ;;  %v5343_v63 = vld [vmem:[#allocation5 + $0x68] ss:$16 sps:$4 sm:$0xff]  }
 0x1c2   : > { %1590 = vmatmul.mubr.bf16.gmra.mrb[4].mxu1 %v5339_v14  ;;  %3481 = vmatprep.subr.bf16.mxu0 %v6986_v38  ;;  %v7098_v14 = vld [vmem:[#allocation53_spill] sm:$0xff] }
 0x1c3   : > { %3233 = vmatmul.mubr.bf16.gmra.mrb[8].mxu0 %v5152_v21  ;;  %1597 = vmatprep.mubr.bf16.mxu1 %v5340_v8  ;;  %v5159_v21 = vld [vmem:[#allocation7 + $0xa4] ss:$16 sps:$4 sm:$0xff]   ;;  %v7099_v8 = vld [vmem:[#allocation55_spill] sm:$0xff] }
 0x1c4   : > { %3240 = vmatprep.mubr.bf16.mxu0 %v5153_v45  ;;  %1843 = vmatpush1.bf16.msra.mxu1 %v5818_v19  ;;  %v5342_v19 = vld [vmem:[#allocation5 + $0x6c] ss:$16 sps:$4 sm:$0xff]  }
 0x1c5   : > { %1844 = vmatprep.subr.bf16.mxu1 %v6986_v38  ;;  %3482 = vmatpush1.bf16.msra.mxu0 %v7084_v15  ;;  %v7087_v45 = vld [vmem:[#allocation19_spill] sm:$0xff]  ;;  %v5221_v15 = vld [vmem:[#allocation7 + $0x320] ss:$16 sps:$4 sm:$0xff]  }
 0x1c6   : > { %3483 = vmatprep.subr.bf16.mxu0 %v6986_v38 }
 0x1c8   : > { %1845 = vmatpush1.bf16.msra.mxu1 %v5831_v29  ;;  %v5158_v29 = vld [vmem:[#allocation7 + $0x80] ss:$16 sps:$4 sm:$0xff]  }
 0x1c9   : > { %1846 = vmatprep.subr.bf16.mxu1 %v6986_v38  ;;  %3484 = vmatpush1.bf16.msra.mxu0 %v7085_v56  ;;  %v7101_v56 = vld [vmem:[#allocation59_spill] sm:$0xff] }
 0x1ca   : > { %1598 = vmatmul.mubr.bf16.gmra.mrb[8].mxu1 %v5341_v9  ;;  %3485 = vmatprep.subr.bf16.mxu0 %v6986_v38  ;;  %v5224_v9 = vld [vmem:[#allocation7 + $0x340] ss:$16 sps:$4 sm:$0xff]  }
 0x1cb   : > { %3241 = vmatmul.mubr.bf16.gmra.mrb[12].mxu0 %v5155_v16  ;;  %1605 = vmatprep.mubr.bf16.mxu1 %v5342_v19  ;;  %v5222_v16 = vld [vmem:[#allocation7 + $0x344] ss:$16 sps:$4 sm:$0xff]  }
 0x1cc   : > { %3248 = vmatprep.mubr.bf16.mxu0 %v5156_v55  ;;  %1847 = vmatpush1.bf16.msra.mxu1 %v5844_v42  ;;  %v5161_v42 = vld [vmem:[#allocation7 + $0xa0] ss:$16 sps:$4 sm:$0xff]   ;;  %v7100_v55 = vld [vmem:[#allocation57_spill] sm:$0xff]  ;;  %v5225_v19 = vld [vmem:[#allocation7 + $0x364] ss:$16 sps:$4 sm:$0xff]  }
 0x1cd   : > { %1848 = vmatprep.subr.bf16.mxu1 %v6986_v38  ;;  %3486 = vmatpush1.bf16.msra.mxu0 %v7086_v0  ;;  %v7102_v0 = vld [vmem:[#allocation61_spill] sm:$0xff] }
 0x1ce   : > { %3487 = vmatprep.subr.bf16.mxu0 %v6986_v38 }
 0x1d0   : > { %1849 = vmatpush1.bf16.msra.mxu1 %v5861_v49  ;;  %v5162_v49 = vld [vmem:[#allocation7 + $0xc4] ss:$16 sps:$4 sm:$0xff]  }
 0x1d1   : > { %1850 = vmatprep.subr.bf16.mxu1 %v6986_v38  ;;  %3488 = vmatpush1.bf16.msra.mxu0 %v7087_v45  ;;  %v5228_v45 = vld [vmem:[#allocation7 + $0x384] ss:$16 sps:$4 sm:$0xff]  }
 0x1d2   : > { %1606 = vmatmul.mubr.bf16.gmra.mrb[12].mxu1 %v5343_v63  ;;  %3489 = vmatprep.subr.bf16.mxu0 %v6986_v38  ;;  %v7104_v63 = vld [vmem:[#allocation65_spill] sm:$0xff] }
 0x1d3   : > { %3249 = vmatmul.mubr.bf16.gmra.mrb[16].mxu0 %v5158_v29  ;;  %1613 = vmatprep.mubr.bf16.mxu1 %v6213_v22  ;;  %v5188_v22 = vld [vmem:[#allocation7 + $0x1c0] ss:$16 sps:$4 sm:$0xff]   ;;  %v7103_v29 = vld [vmem:[#allocation63_spill] sm:$0xff] }
 0x1d4   : > { %3256 = vmatprep.mubr.bf16.mxu0 %v5159_v21  ;;  %1851 = vmatpush1.bf16.msra.mxu1 %v5882_v6  ;;  %v5164_v6 = vld [vmem:[#allocation7 + $0xc0] ss:$16 sps:$4 sm:$0xff]  }
 0x1d5   : > { %1852 = vmatprep.subr.bf16.mxu1 %v6986_v38  ;;  %3490 = vmatpush1.bf16.msra.mxu0 %v5980_v3  ;;  %v5170_v3 = vld [vmem:[#allocation7 + $0x100] ss:$16 sps:$4 sm:$0xff]  }
 0x1d6   : > { %3491 = vmatprep.subr.bf16.mxu0 %v6986_v38  ;;  %v5227_v21 = vld [vmem:[#allocation7 + $0x360] ss:$16 sps:$4 sm:$0xff]  }
 0x1d8   : > { %1853 = vmatpush1.bf16.msra.mxu1 %v5903_v23  ;;  %v5165_v23 = vld [vmem:[#allocation7 + $0xe4] ss:$16 sps:$4 sm:$0xff]  }
 0x1d9   : > { %1854 = vmatprep.subr.bf16.mxu1 %v6986_v38  ;;  %3492 = vmatpush1.bf16.msra.mxu0 %v6019_v62  ;;  %v5174_v62 = vld [vmem:[#allocation7 + $0x144] ss:$16 sps:$4 sm:$0xff]  }
 0x1da   : > { %1614 = vmatmul.mubr.bf16.gmra.mrb[16].mxu1 %v6226_v28  ;;  %3493 = vmatprep.subr.bf16.mxu0 %v6986_v38  ;;  %v5189_v28 = vld [vmem:[#allocation7 + $0x1e4] ss:$16 sps:$4 sm:$0xff]  }
 0x1db   : > { %3257 = vmatmul.mubr.bf16.gmra.mrb[20].mxu0 %v5161_v42  ;;  %1621 = vmatprep.mubr.bf16.mxu1 %v6230_v60  ;;  %v5191_v60 = vld [vmem:[#allocation7 + $0x1e0] ss:$16 sps:$4 sm:$0xff]   ;;  %v7105_v42 = vld [vmem:[#allocation67_spill] sm:$0xff] }
 0x1dc   : > { %3264 = vmatprep.mubr.bf16.mxu0 %v5162_v49  ;;  %1855 = vmatpush1.bf16.msra.mxu1 %v5919_v34  ;;  %v5167_v34 = vld [vmem:[#allocation7 + $0xe0] ss:$16 sps:$4 sm:$0xff]  }
 0x1dd   : > { %1856 = vmatprep.subr.bf16.mxu1 %v6986_v38  ;;  %3494 = vmatpush1.bf16.msra.mxu0 %v6059_v47  ;;  %v5177_v47 = vld [vmem:[#allocation7 + $0x164] ss:$16 sps:$4 sm:$0xff]   ;;  %v5230_v49 = vld [vmem:[#allocation7 + $0x380] ss:$16 sps:$4 sm:$0xff]  }
 0x1de   : > { %3495 = vmatprep.subr.bf16.mxu0 %v6986_v38 }
 0x1e0   : > { %1857 = vmatpush1.bf16.msra.mxu1 %v5956_v61  ;;  %v5168_v61 = vld [vmem:[#allocation7 + $0x104] ss:$16 sps:$4 sm:$0xff]  }
 0x1e1   : > { %1858 = vmatprep.subr.bf16.mxu1 %v6986_v38  ;;  %3496 = vmatpush1.bf16.msra.mxu0 %v7004_v13  ;;  %v5203_v13 = vld [vmem:[#allocation7 + $0x260] ss:$16 sps:$4 sm:$0xff]  }
 0x1e2   : > { %1622 = vmatmul.mubr.bf16.gmra.mrb[20].mxu1 %v6246_v51  ;;  %3497 = vmatprep.subr.bf16.mxu0 %v6986_v38  ;;  %v5192_v51 = vld [vmem:[#allocation7 + $0x204] ss:$16 sps:$4 sm:$0xff]  }
 0x1e3   : > { %3265 = vmatmul.mubr.bf16.gmra.mrb[24].mxu0 %v5164_v6  ;;  %1629 = vmatprep.mubr.bf16.mxu1 %v6250_v4  ;;  %v5194_v4 = vld [vmem:[#allocation7 + $0x200] ss:$16 sps:$4 sm:$0xff]   ;;  %v5231_v6 = vld [vmem:[#allocation7 + $0x3a4] ss:$16 sps:$4 sm:$0xff]  }
 0x1e4   : > { %3272 = vmatprep.mubr.bf16.mxu0 %v5165_v23  ;;  %1859 = vmatpush1.bf16.msra.mxu1 %v6003_v18  ;;  %v5171_v18 = vld [vmem:[#allocation7 + $0x124] ss:$16 sps:$4 sm:$0xff]   ;;  %v7106_v23 = vld [vmem:[#allocation69_spill] sm:$0xff] }
 0x1e5   : > { %1860 = vmatprep.subr.bf16.mxu1 %v6986_v38  ;;  %3498 = vmatpush1.bf16.msra.mxu0 %v6114_v5  ;;  %v5182_v5 = vld [vmem:[#allocation7 + $0x180] ss:$16 sps:$4 sm:$0xff]  }
 0x1e6   : > { %3499 = vmatprep.subr.bf16.mxu0 %v6986_v38 }
 0x1e8   : > { %1861 = vmatpush1.bf16.msra.mxu1 %v6031_v24  ;;  %v5176_v24 = vld [vmem:[#allocation7 + $0x140] ss:$16 sps:$4 sm:$0xff]  }
 0x1e9   : > { %1862 = vmatprep.subr.bf16.mxu1 %v6986_v38  ;;  %3500 = vmatpush1.bf16.msra.mxu0 %v7009_v59  ;;  %v5210_v59 = vld [vmem:[#allocation7 + $0x2c4] ss:$16 sps:$4 sm:$0xff]  }
 0x1ea   : > { %1630 = vmatmul.mubr.bf16.gmra.mrb[24].mxu1 %v6270_v1  ;;  %3501 = vmatprep.subr.bf16.mxu0 %v6986_v38  ;;  %v5195_v1 = vld [vmem:[#allocation7 + $0x224] ss:$16 sps:$4 sm:$0xff]  }
 0x1eb   : > { %3273 = vmatmul.mubr.bf16.gmra.mrb[28].mxu0 %v5167_v34  ;;  %1637 = vmatprep.mubr.bf16.mxu1 %v6274_v46  ;;  %v5197_v46 = vld [vmem:[#allocation7 + $0x220] ss:$16 sps:$4 sm:$0xff]   ;;  %v7107_v34 = vld [vmem:[#allocation71_spill] sm:$0xff] }
 0x1ec   : > { %3280 = vmatprep.mubr.bf16.mxu0 %v5168_v61  ;;  %1863 = vmatpush1.bf16.msra.mxu1 %v6077_v26  ;;  %v5173_v26 = vld [vmem:[#allocation7 + $0x120] ss:$16 sps:$4 sm:$0xff]  }
 0x1ed   : > { %1864 = vmatprep.subr.bf16.mxu1 %v6986_v38  ;;  %3502 = vmatpush1.bf16.msra.mxu0 %v6149_v52  ;;  %v5183_v52 = vld [vmem:[#allocation7 + $0x1a4] ss:$16 sps:$4 sm:$0xff]   ;;  %v5233_v61 = vld [vmem:[#allocation7 + $0x3a0] ss:$16 sps:$4 sm:$0xff]  }
 0x1ee   : > { %3503 = vmatprep.subr.bf16.mxu0 %v6986_v38 }
 0x1f0   : > { %1865 = vmatpush1.bf16.msra.mxu1 %v7003_v12  ;;  %v5201_v12 = vld [vmem:[#allocation7 + $0x264] ss:$16 sps:$4 sm:$0xff]  }
 0x1f1   : > { %1866 = vmatprep.subr.bf16.mxu1 %v6986_v38  ;;  %3504 = vmatpush1.bf16.msra.mxu0 %v6166_v57  ;;  %v5185_v57 = vld [vmem:[#allocation7 + $0x1a0] ss:$16 sps:$4 sm:$0xff]  }
 0x1f2   : > { %1638 = vmatmul.mubr.bf16.gmra.mrb[28].mxu1 %v6282_v36  ;;  %v5198_v36 = vld [vmem:[#allocation7 + $0x244] ss:$16 sps:$4 sm:$0xff]  }
 0x1f3   : > { %3281 = vmatmul.mubr.bf16.gmra.mrb[32].mxu0 %v5170_v3  ;;  %1645 = vmatprep.mubr.bf16.mxu1 %v6286_v17  ;;  %v5200_v17 = vld [vmem:[#allocation7 + $0x240] ss:$16 sps:$4 sm:$0xff]   ;;  %v5234_v3 = vld [vmem:[#allocation7 + $0x3c4] ss:$16 sps:$4 sm:$0xff]  }
 0x1f4   : > { %3288 = vmatprep.mubr.bf16.mxu0 %v5171_v18  ;;  %1867 = vmatpush1.bf16.msra.mxu1 %v6127_v27  ;;  %v5179_v27 = vld [vmem:[#allocation7 + $0x160] ss:$16 sps:$4 sm:$0xff]   ;;  %v7108_v18 = vld [vmem:[#allocation73_spill] sm:$0xff] }
 0x1f5   : > { %1868 = vmatprep.subr.bf16.mxu1 %v6986_v38  ;;  %v5180_v38 = vld [vmem:[#allocation7 + $0x184] ss:$16 sps:$4 sm:$0xff]  }
 0x1f8   : > { %1869 = vmatpush1.bf16.msra.mxu1 %v6143_v20  ;;  %v5186_v20 = vld [vmem:[#allocation7 + $0x1c4] ss:$16 sps:$4 sm:$0xff]  }
 0x1fa   : > { %1646 = vmatmul.mubr.bf16.gmra.mrb[32].mxu1 %v6297_v31  ;;  %v5204_v31 = vld [vmem:[#allocation7 + $0x284] ss:$16 sps:$4 sm:$0xff]  }
 0x1fb   : > { %3289 = vmatmul.mubr.bf16.gmra.mrb[36].mxu0 %v5173_v26  ;;  %1653 = vmatprep.mubr.bf16.mxu1 %v6300_v2  ;;  %v7088_v2 = vld [vmem:[#allocation33_spill] sm:$0xff]  ;;  %v7109_v26 = vld [vmem:[#allocation75_spill] sm:$0xff] }
 0x1fc   : > { %3296 = vmatprep.mubr.bf16.mxu0 %v5174_v62  ;;  %v5236_v62 = vld [vmem:[#allocation7 + $0x3c0] ss:$16 sps:$4 sm:$0xff]  }
 0x202   : > { %1654 = vmatmul.mubr.bf16.gmra.mrb[36].mxu1 %v6308_v50  ;;  %v7089_v50 = vld [vmem:[#allocation35_spill] sm:$0xff] }
 0x203   : > { %3297 = vmatmul.mubr.bf16.gmra.mrb[40].mxu0 %v5176_v24  ;;  %1661 = vmatprep.mubr.bf16.mxu1 %v6310_v37  ;;  %v5206_v37 = vld [vmem:[#allocation7 + $0x280] ss:$16 sps:$4 sm:$0xff]   ;;  %v5237_v24 = vld [vmem:[#allocation7 + $0x3e4] ss:$16 sps:$4 sm:$0xff]  }
 0x204   : > { %3304 = vmatprep.mubr.bf16.mxu0 %v5177_v47  ;;  %v7110_v47 = vld [vmem:[#allocation77_spill] sm:$0xff] }
 0x20a   : > { %1662 = vmatmul.mubr.bf16.gmra.mrb[40].mxu1 %v6318_v11  ;;  %v5207_v11 = vld [vmem:[#allocation7 + $0x2a4] ss:$16 sps:$4 sm:$0xff]  }
 0x20b   : > { %3305 = vmatmul.mubr.bf16.gmra.mrb[44].mxu0 %v5179_v27  ;;  %1669 = vmatprep.mubr.bf16.mxu1 %v6320_v35  ;;  %v7090_v35 = vld [vmem:[#allocation37_spill] sm:$0xff]  ;;  %v7111_v27 = vld [vmem:[#allocation79_spill] sm:$0xff] }
 0x20c   : > { %3312 = vmatprep.mubr.bf16.mxu0 %v5180_v38  ;;  %v5239_v38 = vld [vmem:[#allocation7 + $0x3e0] ss:$16 sps:$4 sm:$0xff]  }
 0x212   : > { %1670 = vmatmul.mubr.bf16.gmra.mrb[44].mxu1 %v6325_v41  ;;  %v7091_v41 = vld [vmem:[#allocation39_spill] sm:$0xff] }
 0x213   : > { %3313 = vmatmul.mubr.bf16.gmra.mrb[48].mxu0 %v5182_v5  ;;  %1677 = vmatprep.mubr.bf16.mxu1 %v6327_v40  ;;  %v5209_v40 = vld [vmem:[#allocation7 + $0x2a0] ss:$16 sps:$4 sm:$0xff]   ;;  %v5242_v5 = vld [vmem:[#allocation7 + $0xc] ss:$16 sps:$4 sm:$0xff]  }
 0x214   : > { %3320 = vmatprep.mubr.bf16.mxu0 %v5183_v52  ;;  %v7112_v52 = vld [vmem:[#allocation81_spill] sm:$0xff] }
 0x21a   : > { %1678 = vmatmul.mubr.bf16.gmra.mrb[48].mxu1 %v6337_v58  ;;  %v7092_v58 = vld [vmem:[#allocation41_spill] sm:$0xff] }
 0x21b   : > { %3321 = vmatmul.mubr.bf16.gmra.mrb[52].mxu0 %v5185_v57  ;;  %1685 = vmatprep.mubr.bf16.mxu1 %v6341_v25  ;;  %v7093_v25 = vld [vmem:[#allocation43_spill] sm:$0xff] }
 0x21c   : > { %3328 = vmatprep.mubr.bf16.mxu0 %v5186_v20  ;;  %v7113_v57 = vld [vmem:[#allocation83_spill] sm:$0xff] }
 0x21d   : > { %v5240_v20 = vld [vmem:[#allocation7 + $0x8] ss:$16 sps:$4 sm:$0xff]  }
 0x222   : > { %1686 = vmatmul.mubr.bf16.gmra.mrb[52].mxu1 %v6350_v48  ;;  %v5213_v48 = vld [vmem:[#allocation7 + $0x2e4] ss:$16 sps:$4 sm:$0xff]  }
 0x223   : > { %3329 = vmatmul.mubr.bf16.gmra.mrb[56].mxu0 %v5188_v22  ;;  %1693 = vmatprep.mubr.bf16.mxu1 %v6354_v7  ;;  %v7095_v7 = vld [vmem:[#allocation47_spill] sm:$0xff] }
 0x224   : > { %3336 = vmatprep.mubr.bf16.mxu0 %v5189_v28  ;;  %v5243_v22 = vld [vmem:[#allocation7 + $0x2c] ss:$16 sps:$4 sm:$0xff]  }
 0x225   : > { %v7114_v28 = vld [vmem:[#allocation85_spill] sm:$0xff] }
 0x22a   : > { %1694 = vmatmul.mubr.bf16.gmra.mrb[56].mxu1 %v6366_v30  ;;  %v5215_v30 = vld [vmem:[#allocation7 + $0x2e0] ss:$16 sps:$4 sm:$0xff]  }
 0x22b   : > { %3337 = vmatmul.mubr.bf16.gmra.mrb[60].mxu0 %v5191_v60  ;;  %1701 = vmatprep.mubr.bf16.mxu1 %v6370_v33  ;;  %v5216_v33 = vld [vmem:[#allocation7 + $0x304] ss:$16 sps:$4 sm:$0xff]  }
 0x22c   : > { %3344 = vmatprep.mubr.bf16.mxu0 %v5192_v51  ;;  %v5344_v60 = vld [vmem:[#allocation5 + $0x4] ss:$16 sps:$4 sm:$0xff]   ;;  %v5245_v51 = vld [vmem:[#allocation7 + $0x28] ss:$16 sps:$4 sm:$0xff]  }
 0x232   : > { %1702 = vmatmul.mubr.bf16.gmra.mrb[60].mxu1 %v6379_v54  ;;  %v7096_v54 = vld [vmem:[#allocation49_spill] sm:$0xff] }
 0x233   : > { %3345 = vmatmul.mubr.bf16.gmra.mrb[64].mxu0 %v5194_v4  ;;  %1709 = vmatprep.mubr.bf16.mxu1 %v6383_v53  ;;  %v7097_v53 = vld [vmem:[#allocation51_spill] sm:$0xff] }
 0x234   : > { %3352 = vmatprep.mubr.bf16.mxu0 %v5195_v1  ;;  %v5246_v4 = vld [vmem:[#allocation7 + $0x4c] ss:$16 sps:$4 sm:$0xff]   ;;  %v5345_v1 = vld [vmem:[#allocation5] ss:$16 sps:$4 sm:$0xff]  }
 0x23a   : > { %1710 = vmatmul.mubr.bf16.gmra.mrb[64].mxu1 %v6395_v44  ;;  %v7094_v44 = vld [vmem:[#allocation45_spill] sm:$0xff] }
 0x23b   : > { %3353 = vmatmul.mubr.bf16.gmra.mrb[68].mxu0 %v5197_v46  ;;  %1717 = vmatprep.mubr.bf16.mxu1 %v6399_v32  ;;  %v5212_v32 = vld [vmem:[#allocation7 + $0x2c0] ss:$16 sps:$4 sm:$0xff]   ;;  %v5346_v46 = vld [vmem:[#allocation5 + $0x24] ss:$16 sps:$4 sm:$0xff]  }
 0x23c   : > { %3360 = vmatprep.mubr.bf16.mxu0 %v5198_v36  ;;  %v5248_v36 = vld [vmem:[#allocation7 + $0x48] ss:$16 sps:$4 sm:$0xff]  }
 0x242   : > { %1718 = vmatmul.mubr.bf16.gmra.mrb[68].mxu1 %v6408_v10  ;;  %v5218_v10 = vld [vmem:[#allocation7 + $0x300] ss:$16 sps:$4 sm:$0xff]  }
 0x243   : > { %3361 = vmatmul.mubr.bf16.gmra.mrb[72].mxu0 %v5200_v17  ;;  %1725 = vmatprep.mubr.bf16.mxu1 %v6412_v39  ;;  %v5219_v39 = vld [vmem:[#allocation7 + $0x324] ss:$16 sps:$4 sm:$0xff]   ;;  %v5249_v17 = vld [vmem:[#allocation7 + $0x6c] ss:$16 sps:$4 sm:$0xff]  }
 0x244   : > { %3368 = vmatprep.mubr.bf16.mxu0 %v5201_v12  ;;  %v5347_v12 = vld [vmem:[#allocation5 + $0x20] ss:$16 sps:$4 sm:$0xff]  }
 0x24a   : > { %1726 = vmatmul.mubr.bf16.gmra.mrb[72].mxu1 %v7088_v2  ;;  %v5252_v2 = vld [vmem:[#allocation7 + $0x8c] ss:$16 sps:$4 sm:$0xff]  }
 0x24b   : > { %3369 = vmatmul.mubr.bf16.gmra.mrb[76].mxu0 %v5203_v13  ;;  %1733 = vmatprep.mubr.bf16.mxu1 %v7089_v50  ;;  %v5348_v13 = vld [vmem:[#allocation5 + $0x44] ss:$16 sps:$4 sm:$0xff]   ;;  %v5349_v50 = vld [vmem:[#allocation5 + $0x40] ss:$16 sps:$4 sm:$0xff]  }
 0x24c   : > { %3376 = vmatprep.mubr.bf16.mxu0 %v5204_v31  ;;  %v5251_v31 = vld [vmem:[#allocation7 + $0x68] ss:$16 sps:$4 sm:$0xff]  }
 0x252   : > { %1734 = vmatmul.mubr.bf16.gmra.mrb[76].mxu1 %v7090_v35  ;;  %v5255_v35 = vld [vmem:[#allocation7 + $0xac] ss:$16 sps:$4 sm:$0xff]  }
 0x253   : > { %3377 = vmatmul.mubr.bf16.gmra.mrb[80].mxu0 %v5206_v37  ;;  %1741 = vmatprep.mubr.bf16.mxu1 %v7091_v41  ;;  %v5350_v37 = vld [vmem:[#allocation5 + $0x64] ss:$16 sps:$4 sm:$0xff]   ;;  %v5351_v41 = vld [vmem:[#allocation5 + $0x60] ss:$16 sps:$4 sm:$0xff]  }
 0x254   : > { %3384 = vmatprep.mubr.bf16.mxu0 %v5207_v11  ;;  %v5254_v11 = vld [vmem:[#allocation7 + $0x88] ss:$16 sps:$4 sm:$0xff]  }
 0x25a   : > { %1742 = vmatmul.mubr.bf16.gmra.mrb[80].mxu1 %v7092_v58  ;;  %v5258_v58 = vld [vmem:[#allocation7 + $0xcc] ss:$16 sps:$4 sm:$0xff]  }
 0x25b   : > { %3385 = vmatmul.mubr.bf16.gmra.mrb[84].mxu0 %v5209_v40  ;;  %1749 = vmatprep.mubr.bf16.mxu1 %v7093_v25  ;;  %v5352_v40 = vld [vmem:[#allocation5 + $0x84] ss:$16 sps:$4 sm:$0xff]   ;;  %v5353_v25 = vld [vmem:[#allocation5 + $0x80] ss:$16 sps:$4 sm:$0xff]  }
 0x25c   : > { %3392 = vmatprep.mubr.bf16.mxu0 %v5210_v59  ;;  %v5257_v59 = vld [vmem:[#allocation7 + $0xa8] ss:$16 sps:$4 sm:$0xff]  }
 0x262   : > { %1750 = vmatmul.mubr.bf16.gmra.mrb[84].mxu1 %v7094_v44  ;;  %v5261_v44 = vld [vmem:[#allocation7 + $0xec] ss:$16 sps:$4 sm:$0xff]  }
 0x263   : > { %3393 = vmatmul.mubr.bf16.gmra.mrb[88].mxu0 %v5212_v32  ;;  %1757 = vmatprep.mubr.bf16.mxu1 %v7095_v7  ;;  %v5354_v32 = vld [vmem:[#allocation5 + $0xa4] ss:$16 sps:$4 sm:$0xff]   ;;  %v5355_v7 = vld [vmem:[#allocation5 + $0xa0] ss:$16 sps:$4 sm:$0xff]  }
 0x264   : > { %3400 = vmatprep.mubr.bf16.mxu0 %v5213_v48  ;;  %v5260_v48 = vld [vmem:[#allocation7 + $0xc8] ss:$16 sps:$4 sm:$0xff]  }
 0x26a   : > { %1758 = vmatmul.mubr.bf16.gmra.mrb[88].mxu1 %v7096_v54  ;;  %v5264_v54 = vld [vmem:[#allocation7 + $0x10c] ss:$16 sps:$4 sm:$0xff]  }
 0x26b   : > { %3401 = vmatmul.mubr.bf16.gmra.mrb[92].mxu0 %v5215_v30  ;;  %1765 = vmatprep.mubr.bf16.mxu1 %v7097_v53  ;;  %v5356_v30 = vld [vmem:[#allocation5 + $0xc4] ss:$16 sps:$4 sm:$0xff]   ;;  %v5357_v53 = vld [vmem:[#allocation5 + $0xc0] ss:$16 sps:$4 sm:$0xff]  }
 0x26c   : > { %3408 = vmatprep.mubr.bf16.mxu0 %v5216_v33  ;;  %v5263_v33 = vld [vmem:[#allocation7 + $0xe8] ss:$16 sps:$4 sm:$0xff]  }
 0x272   : > { %1766 = vmatmul.mubr.bf16.gmra.mrb[92].mxu1 %v7098_v14  ;;  %v5267_v14 = vld [vmem:[#allocation7 + $0x12c] ss:$16 sps:$4 sm:$0xff]  }
 0x273   : > { %3409 = vmatmul.mubr.bf16.gmra.mrb[96].mxu0 %v5218_v10  ;;  %1773 = vmatprep.mubr.bf16.mxu1 %v7099_v8  ;;  %v5358_v10 = vld [vmem:[#allocation5 + $0xe4] ss:$16 sps:$4 sm:$0xff]   ;;  %v5359_v8 = vld [vmem:[#allocation5 + $0xe0] ss:$16 sps:$4 sm:$0xff]  }
 0x274   : > { %3416 = vmatprep.mubr.bf16.mxu0 %v5219_v39  ;;  %v5266_v39 = vld [vmem:[#allocation7 + $0x108] ss:$16 sps:$4 sm:$0xff]  }
 0x27a   : > { %1774 = vmatmul.mubr.bf16.gmra.mrb[96].mxu1 %v7100_v55  ;;  %v5270_v55 = vld [vmem:[#allocation7 + $0x14c] ss:$16 sps:$4 sm:$0xff]  }
 0x27b   : > { %3417 = vmatmul.mubr.bf16.gmra.mrb[100].mxu0 %v5221_v15  ;;  %1781 = vmatprep.mubr.bf16.mxu1 %v7101_v56  ;;  %v5360_v15 = vld [vmem:[#allocation5 + $0x104] ss:$16 sps:$4 sm:$0xff]   ;;  %v5361_v56 = vld [vmem:[#allocation5 + $0x100] ss:$16 sps:$4 sm:$0xff]  }
 0x27c   : > { %3424 = vmatprep.mubr.bf16.mxu0 %v5222_v16  ;;  %v5269_v16 = vld [vmem:[#allocation7 + $0x128] ss:$16 sps:$4 sm:$0xff]  }
 0x282   : > { %1782 = vmatmul.mubr.bf16.gmra.mrb[100].mxu1 %v7102_v0  ;;  %v5273_v0 = vld [vmem:[#allocation7 + $0x16c] ss:$16 sps:$4 sm:$0xff]  }
 0x283   : > { %3425 = vmatmul.mubr.bf16.gmra.mrb[104].mxu0 %v5224_v9  ;;  %1789 = vmatprep.mubr.bf16.mxu1 %v7103_v29  ;;  %v5362_v9 = vld [vmem:[#allocation5 + $0x124] ss:$16 sps:$4 sm:$0xff]   ;;  %v5363_v29 = vld [vmem:[#allocation5 + $0x120] ss:$16 sps:$4 sm:$0xff]  }
 0x284   : > { %3432 = vmatprep.mubr.bf16.mxu0 %v5225_v19  ;;  %v5272_v19 = vld [vmem:[#allocation7 + $0x148] ss:$16 sps:$4 sm:$0xff]  }
 0x28a   : > { %1790 = vmatmul.mubr.bf16.gmra.mrb[104].mxu1 %v7104_v63  ;;  %v5276_v63 = vld [vmem:[#allocation7 + $0x18c] ss:$16 sps:$4 sm:$0xff]  }
 0x28b   : > { %3433 = vmatmul.mubr.bf16.gmra.mrb[108].mxu0 %v5227_v21  ;;  %1797 = vmatprep.mubr.bf16.mxu1 %v7105_v42  ;;  %v5364_v21 = vld [vmem:[#allocation5 + $0x144] ss:$16 sps:$4 sm:$0xff]   ;;  %v5365_v42 = vld [vmem:[#allocation5 + $0x140] ss:$16 sps:$4 sm:$0xff]  }
 0x28c   : > { %3440 = vmatprep.mubr.bf16.mxu0 %v5228_v45  ;;  %v5275_v45 = vld [vmem:[#allocation7 + $0x168] ss:$16 sps:$4 sm:$0xff]  }
 0x292   : > { %1798 = vmatmul.mubr.bf16.gmra.mrb[108].mxu1 %v7106_v23  ;;  %v5279_v23 = vld [vmem:[#allocation7 + $0x1ac] ss:$16 sps:$4 sm:$0xff]  }
 0x293   : > { %3441 = vmatmul.mubr.bf16.gmra.mrb[112].mxu0 %v5230_v49  ;;  %1805 = vmatprep.mubr.bf16.mxu1 %v7107_v34  ;;  %v5366_v49 = vld [vmem:[#allocation5 + $0x164] ss:$16 sps:$4 sm:$0xff]   ;;  %v7115_v34 = vld [vmem:[#allocation25_spill] sm:$0xff] }
 0x294   : > { %3448 = vmatprep.mubr.bf16.mxu0 %v5231_v6  ;;  %v5278_v6 = vld [vmem:[#allocation7 + $0x188] ss:$16 sps:$4 sm:$0xff]  }
 0x29a   : > { %1806 = vmatmul.mubr.bf16.gmra.mrb[112].mxu1 %v7108_v18  ;;  %v5282_v18 = vld [vmem:[#allocation7 + $0x1cc] ss:$16 sps:$4 sm:$0xff]  }
 0x29b   : > { %3449 = vmatmul.mubr.bf16.gmra.mrb[116].mxu0 %v5233_v61  ;;  %1813 = vmatprep.mubr.bf16.mxu1 %v7109_v26  ;;  %v7116_v61 = vld [vmem:[#allocation22_spill] sm:$0xff]  ;;  %v7117_v26 = vld [vmem:[#allocation20_spill] sm:$0xff] }
 0x29c   : > { %3456 = vmatprep.mubr.bf16.mxu0 %v5234_v3  ;;  %v5281_v3 = vld [vmem:[#allocation7 + $0x1a8] ss:$16 sps:$4 sm:$0xff]  }
 0x2a2   : > { %1814 = vmatmul.mubr.bf16.gmra.mrb[116].mxu1 %v7110_v47  ;;  %v5285_v47 = vld [vmem:[#allocation7 + $0x1ec] ss:$16 sps:$4 sm:$0xff]  }
 0x2a3   : > { %3457 = vmatmul.mubr.bf16.gmra.mrb[120].mxu0 %v5236_v62  ;;  %1821 = vmatprep.mubr.bf16.mxu1 %v7111_v27  ;;  %v7118_v62 = vld [vmem:[#allocation21_spill] sm:$0xff]  ;;  %v7119_v27 = vld [vmem:[#allocation23_spill] sm:$0xff] }
 0x2a4   : > { %3464 = vmatprep.mubr.bf16.mxu0 %v5237_v24  ;;  %v5284_v24 = vld [vmem:[#allocation7 + $0x1c8] ss:$16 sps:$4 sm:$0xff]  }
 0x2aa   : > { %1822 = vmatmul.mubr.bf16.gmra.mrb[120].mxu1 %v7112_v52  ;;  %v5288_v52 = vld [vmem:[#allocation7 + $0x20c] ss:$16 sps:$4 sm:$0xff]  }
 0x2ab   : > { %3465 = vmatmul.mubr.bf16.gmra.mrb[124].mxu0 %v5239_v38  ;;  %1829 = vmatprep.mubr.bf16.mxu1 %v7113_v57  ;;  %v7120_v38 = vld [vmem:[#allocation24_spill] sm:$0xff] }
 0x2ac   : > { %3505 = vmatprep.mubr.bf16.mxu0 %v5242_v5  ;;  %v5287_v5 = vld [vmem:[#allocation7 + $0x1e8] ss:$16 sps:$4 sm:$0xff]   ;;  %v7121_v57 = vld [vmem:[#allocation28_spill] sm:$0xff] }
 0x2b2   : > { %1830 = vmatmul.mubr.bf16.gmra.mrb[124].mxu1 %v7114_v28  ;;  %v5291_v28 = vld [vmem:[#allocation7 + $0x22c] ss:$16 sps:$4 sm:$0xff]  }
 0x2b3   : > { %3506 = vmatmul.mubr.bf16.vlgmr.msra.gmra.mrb[0].mxu0 %v5240_v20  ;;  %1870 = vmatprep.mubr.bf16.mxu1 %v5344_v60  ;;  %v7122_v20 = vld [vmem:[#allocation26_spill] sm:$0xff]  ;;  %v7123_v60 = vld [vmem:[#allocation27_spill] sm:$0xff] }
 0x2b4   : > { %3513 = vmatprep.mubr.bf16.mxu0 %v5243_v22  ;;  %v5290_v22 = vld [vmem:[#allocation7 + $0x208] ss:$16 sps:$4 sm:$0xff]  }
 0x2ba   : > { %1871 = vmatmul.mubr.bf16.vlgmr.msra.gmra.mrb[0].mxu1 %v5345_v1  ;;  %v5294_v1 = vld [vmem:[#allocation7 + $0x24c] ss:$16 sps:$4 sm:$0xff]  }
 0x2bb   : > { %3514 = vmatmul.mubr.bf16.gmra.mrb[4].mxu0 %v5245_v51  ;;  %1878 = vmatprep.mubr.bf16.mxu1 %v5346_v46  ;;  %v7124_v51 = vld [vmem:[#allocation29_spill] sm:$0xff]  ;;  %v7125_v46 = vld [vmem:[#allocation30_spill] sm:$0xff] }
 0x2bc   : > { %3521 = vmatprep.mubr.bf16.mxu0 %v5246_v4  ;;  %v5293_v4 = vld [vmem:[#allocation7 + $0x228] ss:$16 sps:$4 sm:$0xff]  }
 0x2c2   : > { %1879 = vmatmul.mubr.bf16.gmra.mrb[4].mxu1 %v5347_v12  ;;  %v5297_v12 = vld [vmem:[#allocation7 + $0x26c] ss:$16 sps:$4 sm:$0xff]  }
 0x2c3   : > { %3522 = vmatmul.mubr.bf16.gmra.mrb[8].mxu0 %v5248_v36  ;;  %1886 = vmatprep.mubr.bf16.mxu1 %v5348_v13  ;;  %v7126_v36 = vld [vmem:[#allocation31_spill] sm:$0xff]  ;;  %v7127_v13 = vld [vmem:[#allocation32_spill] sm:$0xff] }
 0x2c4   : > { %3529 = vmatprep.mubr.bf16.mxu0 %v5249_v17  ;;  %v5296_v17 = vld [vmem:[#allocation7 + $0x248] ss:$16 sps:$4 sm:$0xff]  }
 0x2ca   : > { %1887 = vmatmul.mubr.bf16.gmra.mrb[8].mxu1 %v5349_v50  ;;  %v5300_v50 = vld [vmem:[#allocation7 + $0x28c] ss:$16 sps:$4 sm:$0xff]  }
 0x2cb   : > { %3530 = vmatmul.mubr.bf16.gmra.mrb[12].mxu0 %v5251_v31  ;;  %1894 = vmatprep.mubr.bf16.mxu1 %v5350_v37  ;;  %v7128_v31 = vld [vmem:[#allocation34_spill] sm:$0xff]  ;;  %v7129_v37 = vld [vmem:[#allocation36_spill] sm:$0xff] }
 0x2cc   : > { %3537 = vmatprep.mubr.bf16.mxu0 %v5252_v2  ;;  %v5299_v2 = vld [vmem:[#allocation7 + $0x268] ss:$16 sps:$4 sm:$0xff]  }
 0x2d2   : > { %1895 = vmatmul.mubr.bf16.gmra.mrb[12].mxu1 %v5351_v41  ;;  %v5303_v41 = vld [vmem:[#allocation7 + $0x2ac] ss:$16 sps:$4 sm:$0xff]  }
 0x2d3   : > { %3538 = vmatmul.mubr.bf16.gmra.mrb[16].mxu0 %v5254_v11  ;;  %1902 = vmatprep.mubr.bf16.mxu1 %v5352_v40  ;;  %v7130_v11 = vld [vmem:[#allocation38_spill] sm:$0xff]  ;;  %v7131_v40 = vld [vmem:[#allocation40_spill] sm:$0xff] }
 0x2d4   : > { %3545 = vmatprep.mubr.bf16.mxu0 %v5255_v35  ;;  %v5302_v35 = vld [vmem:[#allocation7 + $0x288] ss:$16 sps:$4 sm:$0xff]  }
 0x2da   : > { %1903 = vmatmul.mubr.bf16.gmra.mrb[16].mxu1 %v5353_v25  ;;  %v5306_v25 = vld [vmem:[#allocation7 + $0x2cc] ss:$16 sps:$4 sm:$0xff]  }
 0x2db   : > { %3546 = vmatmul.mubr.bf16.gmra.mrb[20].mxu0 %v5257_v59  ;;  %1910 = vmatprep.mubr.bf16.mxu1 %v5354_v32  ;;  %v7132_v59 = vld [vmem:[#allocation42_spill] sm:$0xff]  ;;  %v7133_v32 = vld [vmem:[#allocation44_spill] sm:$0xff] }
 0x2dc   : > { %3553 = vmatprep.mubr.bf16.mxu0 %v5258_v58  ;;  %v5305_v58 = vld [vmem:[#allocation7 + $0x2a8] ss:$16 sps:$4 sm:$0xff]  }
 0x2e2   : > { %1911 = vmatmul.mubr.bf16.gmra.mrb[20].mxu1 %v5355_v7  ;;  %v5309_v7 = vld [vmem:[#allocation7 + $0x2ec] ss:$16 sps:$4 sm:$0xff]  }
 0x2e3   : > { %3554 = vmatmul.mubr.bf16.gmra.mrb[24].mxu0 %v5260_v48  ;;  %1918 = vmatprep.mubr.bf16.mxu1 %v5356_v30  ;;  %v7134_v48 = vld [vmem:[#allocation46_spill] sm:$0xff]  ;;  %v7135_v30 = vld [vmem:[#allocation48_spill] sm:$0xff] }
 0x2e4   : > { %3561 = vmatprep.mubr.bf16.mxu0 %v5261_v44  ;;  %v5308_v44 = vld [vmem:[#allocation7 + $0x2c8] ss:$16 sps:$4 sm:$0xff]  }
 0x2ea   : > { %1919 = vmatmul.mubr.bf16.gmra.mrb[24].mxu1 %v5357_v53  ;;  %v5312_v53 = vld [vmem:[#allocation7 + $0x30c] ss:$16 sps:$4 sm:$0xff]  }
 0x2eb   : > { %3562 = vmatmul.mubr.bf16.gmra.mrb[28].mxu0 %v5263_v33  ;;  %1926 = vmatprep.mubr.bf16.mxu1 %v5358_v10  ;;  %v7136_v33 = vld [vmem:[#allocation50_spill] sm:$0xff]  ;;  %v7137_v10 = vld [vmem:[#allocation52_spill] sm:$0xff] }
 0x2ec   : > { %3569 = vmatprep.mubr.bf16.mxu0 %v5264_v54  ;;  %v5311_v54 = vld [vmem:[#allocation7 + $0x2e8] ss:$16 sps:$4 sm:$0xff]  }
 0x2f2   : > { %1927 = vmatmul.mubr.bf16.gmra.mrb[28].mxu1 %v5359_v8  ;;  %v5315_v8 = vld [vmem:[#allocation7 + $0x32c] ss:$16 sps:$4 sm:$0xff]  }
 0x2f3   : > { %3570 = vmatmul.mubr.bf16.gmra.mrb[32].mxu0 %v5266_v39  ;;  %1934 = vmatprep.mubr.bf16.mxu1 %v5360_v15  ;;  %v7138_v39 = vld [vmem:[#allocation54_spill] sm:$0xff]  ;;  %v7139_v15 = vld [vmem:[#allocation56_spill] sm:$0xff] }
 0x2f4   : > { %3577 = vmatprep.mubr.bf16.mxu0 %v5267_v14  ;;  %v5314_v14 = vld [vmem:[#allocation7 + $0x308] ss:$16 sps:$4 sm:$0xff]  }
 0x2fa   : > { %1935 = vmatmul.mubr.bf16.gmra.mrb[32].mxu1 %v5361_v56  ;;  %v5318_v56 = vld [vmem:[#allocation7 + $0x34c] ss:$16 sps:$4 sm:$0xff]  }
 0x2fb   : > { %3578 = vmatmul.mubr.bf16.gmra.mrb[36].mxu0 %v5269_v16  ;;  %1942 = vmatprep.mubr.bf16.mxu1 %v5362_v9  ;;  %v7140_v16 = vld [vmem:[#allocation58_spill] sm:$0xff]  ;;  %v7141_v9 = vld [vmem:[#allocation60_spill] sm:$0xff] }
 0x2fc   : > { %3585 = vmatprep.mubr.bf16.mxu0 %v5270_v55  ;;  %v5317_v55 = vld [vmem:[#allocation7 + $0x328] ss:$16 sps:$4 sm:$0xff]  }
 0x302   : > { %1943 = vmatmul.mubr.bf16.gmra.mrb[36].mxu1 %v5363_v29  ;;  %v5321_v29 = vld [vmem:[#allocation7 + $0x36c] ss:$16 sps:$4 sm:$0xff]  }
 0x303   : > { %3586 = vmatmul.mubr.bf16.gmra.mrb[40].mxu0 %v5272_v19  ;;  %1950 = vmatprep.mubr.bf16.mxu1 %v5364_v21  ;;  %v7142_v19 = vld [vmem:[#allocation62_spill] sm:$0xff]  ;;  %v7143_v21 = vld [vmem:[#allocation64_spill] sm:$0xff] }
 0x304   : > { %3593 = vmatprep.mubr.bf16.mxu0 %v5273_v0  ;;  %v5320_v0 = vld [vmem:[#allocation7 + $0x348] ss:$16 sps:$4 sm:$0xff]  }
 0x30a   : > { %1951 = vmatmul.mubr.bf16.gmra.mrb[40].mxu1 %v5365_v42 }
 0x30b   : > { %3594 = vmatmul.mubr.bf16.gmra.mrb[44].mxu0 %v5275_v45  ;;  %1958 = vmatprep.mubr.bf16.mxu1 %v5366_v49  ;;  %v7144_v45 = vld [vmem:[#allocation66_spill] sm:$0xff]  ;;  %v5323_v49 = vld [vmem:[#allocation7 + $0x368] ss:$16 sps:$4 sm:$0xff]  }
 0x30c   : > { %3601 = vmatprep.mubr.bf16.mxu0 %v5276_v63 }
 0x312   : > { %1959 = vmatmul.mubr.bf16.gmra.mrb[44].mxu1 %v7115_v34 }
 0x313   : > { %3602 = vmatmul.mubr.bf16.gmra.mrb[48].mxu0 %v5278_v6  ;;  %1966 = vmatprep.mubr.bf16.mxu1 %v7116_v61  ;;  %v7145_v61 = vld [vmem:[#allocation68_spill] sm:$0xff] }
 0x314   : > { %3609 = vmatprep.mubr.bf16.mxu0 %v5279_v23  ;;  %v5324_v23 = vld [vmem:[#allocation7 + $0x38c] ss:$16 sps:$4 sm:$0xff]  }
 0x31a   : > { %1967 = vmatmul.mubr.bf16.gmra.mrb[48].mxu1 %v7117_v26 }
 0x31b   : > { %3610 = vmatmul.mubr.bf16.gmra.mrb[52].mxu0 %v5281_v3  ;;  %1974 = vmatprep.mubr.bf16.mxu1 %v7118_v62  ;;  %v7146_v3 = vld [vmem:[#allocation70_spill] sm:$0xff] }
 0x31c   : > { %3617 = vmatprep.mubr.bf16.mxu0 %v5282_v18 }
 0x322   : > { %1975 = vmatmul.mubr.bf16.gmra.mrb[52].mxu1 %v7119_v27 }
 0x323   : > { %3618 = vmatmul.mubr.bf16.gmra.mrb[56].mxu0 %v5284_v24  ;;  %1982 = vmatprep.mubr.bf16.mxu1 %v7120_v38  ;;  %v5326_v38 = vld [vmem:[#allocation7 + $0x388] ss:$16 sps:$4 sm:$0xff]  }
 0x324   : > { %3625 = vmatprep.mubr.bf16.mxu0 %v5285_v47 }
 0x32a   : > { %1983 = vmatmul.mubr.bf16.gmra.mrb[56].mxu1 %v7121_v57 }
 0x32b   : > { %3626 = vmatmul.mubr.bf16.gmra.mrb[60].mxu0 %v5287_v5  ;;  %1990 = vmatprep.mubr.bf16.mxu1 %v7122_v20  ;;  %v5327_v20 = vld [vmem:[#allocation7 + $0x3ac] ss:$16 sps:$4 sm:$0xff]  }
 0x32c   : > { %3633 = vmatprep.mubr.bf16.mxu0 %v5288_v52 }
 0x332   : > { %1991 = vmatmul.mubr.bf16.gmra.mrb[60].mxu1 %v7123_v60  ;;  %v7148_v60 = vld [vmem:[#allocation74_spill] sm:$0xff] }
 0x333   : > { %3634 = vmatmul.mubr.bf16.gmra.mrb[64].mxu0 %v5290_v22  ;;  %1998 = vmatprep.mubr.bf16.mxu1 %v7124_v51 }
 0x334   : > { %3641 = vmatprep.mubr.bf16.mxu0 %v5291_v28  ;;  %v7147_v28 = vld [vmem:[#allocation72_spill] sm:$0xff] }
 0x33a   : > { %1999 = vmatmul.mubr.bf16.gmra.mrb[64].mxu1 %v7125_v46 }
 0x33b   : > { %3642 = vmatmul.mubr.bf16.gmra.mrb[68].mxu0 %v5293_v4  ;;  %2006 = vmatprep.mubr.bf16.mxu1 %v7126_v36 }
 0x33c   : > { %3649 = vmatprep.mubr.bf16.mxu0 %v5294_v1 }
 0x342   : > { %2007 = vmatmul.mubr.bf16.gmra.mrb[68].mxu1 %v7127_v13 }
 0x343   : > { %3650 = vmatmul.mubr.bf16.gmra.mrb[72].mxu0 %v5296_v17  ;;  %2014 = vmatprep.mubr.bf16.mxu1 %v7128_v31 }
 0x344   : > { %3657 = vmatprep.mubr.bf16.mxu0 %v5297_v12  ;;  %v5329_v12 = vld [vmem:[#allocation7 + $0x3a8] ss:$16 sps:$4 sm:$0xff]  }
 0x34a   : > { %2015 = vmatmul.mubr.bf16.gmra.mrb[72].mxu1 %v7129_v37 }
 0x34b   : > { %3658 = vmatmul.mubr.bf16.gmra.mrb[76].mxu0 %v5299_v2  ;;  %2022 = vmatprep.mubr.bf16.mxu1 %v7130_v11  ;;  %v7149_v11 = vld [vmem:[#allocation76_spill] sm:$0xff] }
 0x34c   : > { %3665 = vmatprep.mubr.bf16.mxu0 %v5300_v50  ;;  %v5330_v50 = vld [vmem:[#allocation7 + $0x3cc] ss:$16 sps:$4 sm:$0xff]  }
 0x352   : > { %2023 = vmatmul.mubr.bf16.gmra.mrb[76].mxu1 %v7131_v40 }
 0x353   : > { %3666 = vmatmul.mubr.bf16.gmra.mrb[80].mxu0 %v5302_v35  ;;  %2030 = vmatprep.mubr.bf16.mxu1 %v7132_v59  ;;  %v7150_v35 = vld [vmem:[#allocation78_spill] sm:$0xff] }
 0x354   : > { %3673 = vmatprep.mubr.bf16.mxu0 %v5303_v41 }
 0x35a   : > { %2031 = vmatmul.mubr.bf16.gmra.mrb[80].mxu1 %v7133_v32 }
 0x35b   : > { %3674 = vmatmul.mubr.bf16.gmra.mrb[84].mxu0 %v5305_v58  ;;  %2038 = vmatprep.mubr.bf16.mxu1 %v7134_v48  ;;  %v5332_v48 = vld [vmem:[#allocation7 + $0x3c8] ss:$16 sps:$4 sm:$0xff]  }
 0x35c   : > { %3681 = vmatprep.mubr.bf16.mxu0 %v5306_v25 }
 0x362   : > { %2039 = vmatmul.mubr.bf16.gmra.mrb[84].mxu1 %v7135_v30 }
 0x363   : > { %3682 = vmatmul.mubr.bf16.gmra.mrb[88].mxu0 %v5308_v44  ;;  %2046 = vmatprep.mubr.bf16.mxu1 %v7136_v33  ;;  %v5333_v33 = vld [vmem:[#allocation7 + $0x3ec] ss:$16 sps:$4 sm:$0xff]  }
 0x364   : > { %3689 = vmatprep.mubr.bf16.mxu0 %v5309_v7 }
 0x36a   : > { %2047 = vmatmul.mubr.bf16.gmra.mrb[88].mxu1 %v7137_v10  ;;  %v7152_v10 = vld [vmem:[#allocation82_spill] sm:$0xff] }
 0x36b   : > { %3690 = vmatmul.mubr.bf16.gmra.mrb[92].mxu0 %v5311_v54  ;;  %2054 = vmatprep.mubr.bf16.mxu1 %v7138_v39 }
 0x36c   : > { %3697 = vmatprep.mubr.bf16.mxu0 %v5312_v53  ;;  %v7151_v53 = vld [vmem:[#allocation80_spill] sm:$0xff] }
 0x372   : > { %2055 = vmatmul.mubr.bf16.gmra.mrb[92].mxu1 %v7139_v15 }
 0x373   : > { %3698 = vmatmul.mubr.bf16.gmra.mrb[96].mxu0 %v5314_v14  ;;  %2062 = vmatprep.mubr.bf16.mxu1 %v7140_v16 }
 0x374   : > { %3705 = vmatprep.mubr.bf16.mxu0 %v5315_v8 }
 0x37a   : > { %2063 = vmatmul.mubr.bf16.gmra.mrb[96].mxu1 %v7141_v9 }
 0x37b   : > { %3706 = vmatmul.mubr.bf16.gmra.mrb[100].mxu0 %v5317_v55  ;;  %2070 = vmatprep.mubr.bf16.mxu1 %v7142_v19 }
 0x37c   : > { %3713 = vmatprep.mubr.bf16.mxu0 %v5318_v56  ;;  %v5335_v56 = vld [vmem:[#allocation7 + $0x3e8] ss:$16 sps:$4 sm:$0xff]  }
 0x382   : > { %2071 = vmatmul.mubr.bf16.gmra.mrb[100].mxu1 %v7143_v21  ;;  %v7153_v21 = vld [vmem:[#allocation84_spill] sm:$0xff] }
 0x383   : > { %3714 = vmatmul.mubr.bf16.gmra.mrb[104].mxu0 %v5320_v0  ;;  %2078 = vmatprep.mubr.bf16.mxu1 %v7144_v45 }
 0x384   : > { %3721 = vmatprep.mubr.bf16.mxu0 %v5321_v29 }
 0x386   : > { %v3507_v63 = vpop.f32.mrb[0].mxu0 }
 0x387   : > { %v3509_v42 = vpop.f32.mrb[1].mxu0 }
 0x388   : > { %v3510_v6 = vpop.f32.mrb[2].mxu0 }
 0x389   : > { %v3512_v34 = vpop.f32.mrb[3].mxu0 }
 0x38a   : > { %2079 = vmatmul.mubr.bf16.gmra.mrb[104].mxu1 %v7145_v61 }
 0x38b   : > { %3722 = vmatmul.mubr.bf16.gmra.mrb[108].mxu0 %v5323_v49  ;;  %2086 = vmatprep.mubr.bf16.mxu1 %v7146_v3 }
 0x38c   : > { %3729 = vmatprep.mubr.bf16.mxu0 %v5324_v23 }
 0x38d   : > { %v1872_v18 = vpop.f32.mrb[0].mxu1 }
 0x38e   : > { %v4286_v26 = vadd.f32 %v3507_v63, %v1872_v18  ;;  %v1874_v62 = vpop.f32.mrb[1].mxu1  ;;  %v3515_v24 = vpop.f32.mrb[4].mxu0 }
 0x38f   : > { %v1875_v47 = vpop.f32.mrb[2].mxu1  ;;  %v3517_v27 = vpop.f32.mrb[5].mxu0 }
 0x390   : > { %3826 = vst [vmem:[%s6738_s20] sm:$0xff] %v4286_v26  ;;  %v4287_v5 = vadd.f32 %v3510_v6, %v1875_v47  ;;  %v1877_v52 = vpop.f32.mrb[3].mxu1  ;;  %v3518_v57 = vpop.f32.mrb[6].mxu0  ;;  %v7154_v26 = vld [vmem:[#allocation86_spill] sm:$0xff] }
 0x391   : > { %v3520_v22 = vpop.f32.mrb[7].mxu0 }
 0x392   : > { %3827 = vst [vmem:[%s6738_s20 + $0x8] sm:$0xff] %v4287_v5  ;;  %2087 = vmatmul.mubr.bf16.gmra.mrb[108].mxu1 %v7147_v28 }
 0x393   : > { %3730 = vmatmul.mubr.bf16.gmra.mrb[112].mxu0 %v5326_v38  ;;  %2094 = vmatprep.mubr.bf16.mxu1 %v7148_v60 }
 0x394   : > { %3737 = vmatprep.mubr.bf16.mxu0 %v5327_v20 }
 0x395   : > { %v1880_v51 = vpop.f32.mrb[4].mxu1 }
 0x396   : > { %v4288_v4 = vadd.f32 %v3515_v24, %v1880_v51  ;;  %v1882_v1 = vpop.f32.mrb[5].mxu1  ;;  %v3523_v46 = vpop.f32.mrb[8].mxu0 }
 0x397   : > { %v1883_v36 = vpop.f32.mrb[6].mxu1  ;;  %v3525_v17 = vpop.f32.mrb[9].mxu0 }
 0x398   : > { %3828 = vst [vmem:[%s6738_s20 + $0x10] sm:$0xff] %v4288_v4  ;;  %v4289_v13 = vadd.f32 %v3518_v57, %v1883_v36  ;;  %v1885_v31 = vpop.f32.mrb[7].mxu1  ;;  %v3526_v2 = vpop.f32.mrb[10].mxu0 }
 0x399   : > { %v3528_v37 = vpop.f32.mrb[11].mxu0 }
 0x39a   : > { %3829 = vst [vmem:[%s6738_s20 + $0x18] sm:$0xff] %v4289_v13  ;;  %2095 = vmatmul.mubr.bf16.gmra.mrb[112].mxu1 %v7149_v11 }
 0x39b   : > { %3738 = vmatmul.mubr.bf16.gmra.mrb[116].mxu0 %v5329_v12  ;;  %2102 = vmatprep.mubr.bf16.mxu1 %v7150_v35 }
 0x39c   : > { %3745 = vmatprep.mubr.bf16.mxu0 %v5330_v50 }
 0x39d   : > { %v1888_v41 = vpop.f32.mrb[8].mxu1 }
 0x39e   : > { %v4290_v40 = vadd.f32 %v3523_v46, %v1888_v41  ;;  %v1890_v59 = vpop.f32.mrb[9].mxu1  ;;  %v3531_v58 = vpop.f32.mrb[12].mxu0 }
 0x39f   : > { %v1891_v25 = vpop.f32.mrb[10].mxu1  ;;  %v3533_v32 = vpop.f32.mrb[13].mxu0 }
 0x3a0   : > { %3830 = vst [vmem:[%s6738_s20 + $0x20] sm:$0xff] %v4290_v40  ;;  %v4291_v44 = vadd.f32 %v3526_v2, %v1891_v25  ;;  %v1893_v7 = vpop.f32.mrb[11].mxu1  ;;  %v3534_v30 = vpop.f32.mrb[14].mxu0 }
 0x3a1   : > { %v3536_v54 = vpop.f32.mrb[15].mxu0 }
 0x3a2   : > { %3831 = vst [vmem:[%s6738_s20 + $0x28] sm:$0xff] %v4291_v44  ;;  %2103 = vmatmul.mubr.bf16.gmra.mrb[116].mxu1 %v7151_v53 }
 0x3a3   : > { %3746 = vmatmul.mubr.bf16.gmra.mrb[120].mxu0 %v5332_v48  ;;  %2110 = vmatprep.mubr.bf16.mxu1 %v7152_v10 }
 0x3a4   : > { %3753 = vmatprep.mubr.bf16.mxu0 %v5333_v33 }
 0x3a5   : > { %v1896_v39 = vpop.f32.mrb[12].mxu1 }
 0x3a6   : > { %v4292_v14 = vadd.f32 %v3531_v58, %v1896_v39  ;;  %v1898_v8 = vpop.f32.mrb[13].mxu1  ;;  %v3539_v15 = vpop.f32.mrb[16].mxu0 }
 0x3a7   : > { %v1899_v16 = vpop.f32.mrb[14].mxu1  ;;  %v3541_v55 = vpop.f32.mrb[17].mxu0 }
 0x3a8   : > { %3832 = vst [vmem:[%s6738_s20 + $0x30] sm:$0xff] %v4292_v14  ;;  %v4293_v9 = vadd.f32 %v3534_v30, %v1899_v16  ;;  %v1901_v19 = vpop.f32.mrb[15].mxu1  ;;  %v3542_v0 = vpop.f32.mrb[18].mxu0 }
 0x3a9   : > { %v3544_v29 = vpop.f32.mrb[19].mxu0 }
 0x3aa   : > { %3833 = vst [vmem:[%s6738_s20 + $0x38] sm:$0xff] %v4293_v9  ;;  %2111 = vmatmul.mubr.bf16.gmra.mrb[120].mxu1 %v7153_v21 }
 0x3ab   : > { %3754 = vmatmul.mubr.bf16.gmra.mrb[124].mxu0 %v5335_v56  ;;  %2118 = vmatprep.mubr.bf16.mxu1 %v6578_v43 }
 0x3ad   : > { %v1904_v45 = vpop.f32.mrb[16].mxu1 }
 0x3ae   : > { %v4294_v63 = vadd.f32 %v3539_v15, %v1904_v45  ;;  %v1906_v42 = vpop.f32.mrb[17].mxu1  ;;  %v3547_v49 = vpop.f32.mrb[20].mxu0 }
 0x3af   : > { %v1907_v6 = vpop.f32.mrb[18].mxu1  ;;  %v3549_v23 = vpop.f32.mrb[21].mxu0 }
 0x3b0   : > { %3834 = vst [vmem:[%s6738_s20 + $0x40] sm:$0xff] %v4294_v63  ;;  %v4295_v34 = vadd.f32 %v3542_v0, %v1907_v6  ;;  %v1909_v61 = vpop.f32.mrb[19].mxu1  ;;  %v3550_v3 = vpop.f32.mrb[22].mxu0 }
 0x3b1   : > { %v3552_v18 = vpop.f32.mrb[23].mxu0 }
 0x3b2   : > { %3835 = vst [vmem:[%s6738_s20 + $0x48] sm:$0xff] %v4295_v34  ;;  %2119 = vmatmul.mubr.bf16.gmra.mrb[124].mxu1 %v7154_v26 }
 0x3b5   : > { %v1912_v62 = vpop.f32.mrb[20].mxu1 }
 0x3b6   : > { %v4296_v24 = vadd.f32 %v3547_v49, %v1912_v62  ;;  %v1914_v47 = vpop.f32.mrb[21].mxu1  ;;  %v3555_v43 = vpop.f32.mrb[24].mxu0 }
 0x3b7   : > { %v1915_v27 = vpop.f32.mrb[22].mxu1  ;;  %v3557_v38 = vpop.f32.mrb[25].mxu0 }
 0x3b8   : > { %3836 = vst [vmem:[%s6738_s20 + $0x50] sm:$0xff] %v4296_v24  ;;  %v4297_v5 = vadd.f32 %v3550_v3, %v1915_v27  ;;  %v1917_v52 = vpop.f32.mrb[23].mxu1  ;;  %v3558_v57 = vpop.f32.mrb[26].mxu0 }
 0x3b9   : > { %v3560_v20 = vpop.f32.mrb[27].mxu0 }
 0x3ba   : > { %3837 = vst [vmem:[%s6738_s20 + $0x58] sm:$0xff] %v4297_v5 }
 0x3bd   : > { %v1920_v22 = vpop.f32.mrb[24].mxu1 }
 0x3be   : > { %v4298_v28 = vadd.f32 %v3555_v43, %v1920_v22  ;;  %v1922_v60 = vpop.f32.mrb[25].mxu1  ;;  %v3563_v51 = vpop.f32.mrb[28].mxu0 }
 0x3bf   : > { %v1923_v4 = vpop.f32.mrb[26].mxu1  ;;  %v3565_v1 = vpop.f32.mrb[29].mxu0 }
 0x3c0   : > { %3838 = vst [vmem:[%s6738_s20 + $0x60] sm:$0xff] %v4298_v28  ;;  %v4299_v46 = vadd.f32 %v3558_v57, %v1923_v4  ;;  %v1925_v36 = vpop.f32.mrb[27].mxu1  ;;  %v3566_v17 = vpop.f32.mrb[30].mxu0 }
 0x3c1   : > { %v3568_v12 = vpop.f32.mrb[31].mxu0 }
 0x3c2   : > { %3839 = vst [vmem:[%s6738_s20 + $0x68] sm:$0xff] %v4299_v46 }
 0x3c5   : > { %v1928_v13 = vpop.f32.mrb[28].mxu1 }
 0x3c6   : > { %v4300_v31 = vadd.f32 %v3563_v51, %v1928_v13  ;;  %v1930_v2 = vpop.f32.mrb[29].mxu1  ;;  %v3571_v50 = vpop.f32.mrb[32].mxu0 }
 0x3c7   : > { %v1931_v37 = vpop.f32.mrb[30].mxu1  ;;  %v3573_v11 = vpop.f32.mrb[33].mxu0 }
 0x3c8   : > { %3840 = vst [vmem:[%s6738_s20 + $0x70] sm:$0xff] %v4300_v31  ;;  %v4301_v35 = vadd.f32 %v3566_v17, %v1931_v37  ;;  %v1933_v41 = vpop.f32.mrb[31].mxu1  ;;  %v3574_v40 = vpop.f32.mrb[34].mxu0 }
 0x3c9   : > { %v3576_v59 = vpop.f32.mrb[35].mxu0 }
 0x3ca   : > { %3841 = vst [vmem:[%s6738_s20 + $0x78] sm:$0xff] %v4301_v35 }
 0x3cd   : > { %v1936_v58 = vpop.f32.mrb[32].mxu1 }
 0x3ce   : > { %v4302_v25 = vadd.f32 %v3571_v50, %v1936_v58  ;;  %v1938_v32 = vpop.f32.mrb[33].mxu1  ;;  %v3579_v48 = vpop.f32.mrb[36].mxu0 }
 0x3cf   : > { %v1939_v44 = vpop.f32.mrb[34].mxu1  ;;  %v3581_v7 = vpop.f32.mrb[37].mxu0 }
 0x3d0   : > { %3842 = vst [vmem:[%s6738_s20 + $0x80] sm:$0xff] %v4302_v25  ;;  %v4303_v30 = vadd.f32 %v3574_v40, %v1939_v44  ;;  %v1941_v33 = vpop.f32.mrb[35].mxu1  ;;  %v3582_v54 = vpop.f32.mrb[38].mxu0 }
 0x3d1   : > { %v3584_v53 = vpop.f32.mrb[39].mxu0 }
 0x3d2   : > { %3843 = vst [vmem:[%s6738_s20 + $0x88] sm:$0xff] %v4303_v30 }
 0x3d5   : > { %v1944_v10 = vpop.f32.mrb[36].mxu1 }
 0x3d6   : > { %v4304_v39 = vadd.f32 %v3579_v48, %v1944_v10  ;;  %v1946_v14 = vpop.f32.mrb[37].mxu1  ;;  %v3587_v8 = vpop.f32.mrb[40].mxu0 }
 0x3d7   : > { %v1947_v15 = vpop.f32.mrb[38].mxu1  ;;  %v3589_v16 = vpop.f32.mrb[41].mxu0 }
 0x3d8   : > { %3844 = vst [vmem:[%s6738_s20 + $0x90] sm:$0xff] %v4304_v39  ;;  %v4305_v55 = vadd.f32 %v3582_v54, %v1947_v15  ;;  %v1949_v56 = vpop.f32.mrb[39].mxu1  ;;  %v3590_v9 = vpop.f32.mrb[42].mxu0 }
 0x3d9   : > { %v3592_v19 = vpop.f32.mrb[43].mxu0 }
 0x3da   : > { %3845 = vst [vmem:[%s6738_s20 + $0x98] sm:$0xff] %v4305_v55 }
 0x3dd   : > { %v1952_v0 = vpop.f32.mrb[40].mxu1 }
 0x3de   : > { %v4306_v29 = vadd.f32 %v3587_v8, %v1952_v0  ;;  %v1954_v21 = vpop.f32.mrb[41].mxu1  ;;  %v3595_v45 = vpop.f32.mrb[44].mxu0 }
 0x3df   : > { %v1955_v63 = vpop.f32.mrb[42].mxu1  ;;  %v3597_v42 = vpop.f32.mrb[45].mxu0 }
 0x3e0   : > { %3846 = vst [vmem:[%s6738_s20 + $0xa0] sm:$0xff] %v4306_v29  ;;  %v4307_v49 = vadd.f32 %v3590_v9, %v1955_v63  ;;  %v1957_v6 = vpop.f32.mrb[43].mxu1  ;;  %v3598_v23 = vpop.f32.mrb[46].mxu0 }
 0x3e1   : > { %v3600_v34 = vpop.f32.mrb[47].mxu0 }
 0x3e2   : > { %3847 = vst [vmem:[%s6738_s20 + $0xa8] sm:$0xff] %v4307_v49 }
 0x3e5   : > { %v1960_v61 = vpop.f32.mrb[44].mxu1 }
 0x3e6   : > { %v4308_v3 = vadd.f32 %v3595_v45, %v1960_v61  ;;  %v1962_v18 = vpop.f32.mrb[45].mxu1  ;;  %v3603_v26 = vpop.f32.mrb[48].mxu0 }
 0x3e7   : > { %v1963_v62 = vpop.f32.mrb[46].mxu1  ;;  %v3605_v24 = vpop.f32.mrb[49].mxu0 }
 0x3e8   : > { %3848 = vst [vmem:[%s6738_s20 + $0xb0] sm:$0xff] %v4308_v3  ;;  %v4309_v47 = vadd.f32 %v3598_v23, %v1963_v62  ;;  %v1965_v43 = vpop.f32.mrb[47].mxu1  ;;  %v3606_v27 = vpop.f32.mrb[50].mxu0 }
 0x3e9   : > { %v3608_v38 = vpop.f32.mrb[51].mxu0 }
 0x3ea   : > { %3849 = vst [vmem:[%s6738_s20 + $0xb8] sm:$0xff] %v4309_v47 }
 0x3ed   : > { %v1968_v5 = vpop.f32.mrb[48].mxu1 }
 0x3ee   : > { %v4310_v52 = vadd.f32 %v3603_v26, %v1968_v5  ;;  %v1970_v57 = vpop.f32.mrb[49].mxu1  ;;  %v3611_v20 = vpop.f32.mrb[52].mxu0 }
 0x3ef   : > { %v1971_v22 = vpop.f32.mrb[50].mxu1  ;;  %v3613_v28 = vpop.f32.mrb[53].mxu0 }
 0x3f0   : > { %3850 = vst [vmem:[%s6738_s20 + $0xc0] sm:$0xff] %v4310_v52  ;;  %v4311_v60 = vadd.f32 %v3606_v27, %v1971_v22  ;;  %v1973_v51 = vpop.f32.mrb[51].mxu1  ;;  %v3614_v4 = vpop.f32.mrb[54].mxu0 }
 0x3f1   : > { %v3616_v1 = vpop.f32.mrb[55].mxu0 }
 0x3f2   : > { %3851 = vst [vmem:[%s6738_s20 + $0xc8] sm:$0xff] %v4311_v60 }
 0x3f5   : > { %v1976_v46 = vpop.f32.mrb[52].mxu1 }
 0x3f6   : > { %v4312_v36 = vadd.f32 %v3611_v20, %v1976_v46  ;;  %v1978_v17 = vpop.f32.mrb[53].mxu1  ;;  %v3619_v12 = vpop.f32.mrb[56].mxu0 }
 0x3f7   : > { %v1979_v13 = vpop.f32.mrb[54].mxu1  ;;  %v3621_v31 = vpop.f32.mrb[57].mxu0 }
 0x3f8   : > { %3852 = vst [vmem:[%s6738_s20 + $0xd0] sm:$0xff] %v4312_v36  ;;  %v4313_v2 = vadd.f32 %v3614_v4, %v1979_v13  ;;  %v1981_v50 = vpop.f32.mrb[55].mxu1  ;;  %v3622_v37 = vpop.f32.mrb[58].mxu0 }
 0x3f9   : > { %v3624_v11 = vpop.f32.mrb[59].mxu0 }
 0x3fa   : > { %3853 = vst [vmem:[%s6738_s20 + $0xd8] sm:$0xff] %v4313_v2 }
 0x3fd   : > { %v1984_v35 = vpop.f32.mrb[56].mxu1 }
 0x3fe   : > { %v4314_v41 = vadd.f32 %v3619_v12, %v1984_v35  ;;  %v1986_v40 = vpop.f32.mrb[57].mxu1  ;;  %v3627_v59 = vpop.f32.mrb[60].mxu0 }
 0x3ff   : > { %v1987_v58 = vpop.f32.mrb[58].mxu1  ;;  %v3629_v25 = vpop.f32.mrb[61].mxu0 }
 0x400   : > { %3854 = vst [vmem:[%s6738_s20 + $0xe0] sm:$0xff] %v4314_v41  ;;  %v4315_v32 = vadd.f32 %v3622_v37, %v1987_v58  ;;  %v1989_v48 = vpop.f32.mrb[59].mxu1  ;;  %v3630_v44 = vpop.f32.mrb[62].mxu0 }
 0x401   : > { %v3632_v7 = vpop.f32.mrb[63].mxu0 }
 0x402   : > { %3855 = vst [vmem:[%s6738_s20 + $0xe8] sm:$0xff] %v4315_v32 }
 0x405   : > { %v1992_v30 = vpop.f32.mrb[60].mxu1 }
 0x406   : > { %v4316_v33 = vadd.f32 %v3627_v59, %v1992_v30  ;;  %v1994_v54 = vpop.f32.mrb[61].mxu1  ;;  %v3635_v53 = vpop.f32.mrb[64].mxu0 }
 0x407   : > { %v1995_v10 = vpop.f32.mrb[62].mxu1  ;;  %v3637_v39 = vpop.f32.mrb[65].mxu0 }
 0x408   : > { %3856 = vst [vmem:[%s6738_s20 + $0xf0] sm:$0xff] %v4316_v33  ;;  %v4317_v14 = vadd.f32 %v3630_v44, %v1995_v10  ;;  %v1997_v8 = vpop.f32.mrb[63].mxu1  ;;  %v3638_v15 = vpop.f32.mrb[66].mxu0 }
 0x409   : > { %v3640_v16 = vpop.f32.mrb[67].mxu0 }
 0x40a   : > { %3857 = vst [vmem:[%s6738_s20 + $0xf8] sm:$0xff] %v4317_v14 }
 0x40d   : > { %v2000_v55 = vpop.f32.mrb[64].mxu1 }
 0x40e   : > { %v4318_v56 = vadd.f32 %v3635_v53, %v2000_v55  ;;  %v2002_v9 = vpop.f32.mrb[65].mxu1  ;;  %v3643_v19 = vpop.f32.mrb[68].mxu0 }
 0x40f   : > { %v2003_v0 = vpop.f32.mrb[66].mxu1  ;;  %v3645_v29 = vpop.f32.mrb[69].mxu0 }
 0x410   : > { %3858 = vst [vmem:[%s6738_s20 + $0x100] sm:$0xff] %v4318_v56  ;;  %v4319_v21 = vadd.f32 %v3638_v15, %v2003_v0  ;;  %v2005_v45 = vpop.f32.mrb[67].mxu1  ;;  %v3646_v63 = vpop.f32.mrb[70].mxu0 }
 0x411   : > { %v3648_v42 = vpop.f32.mrb[71].mxu0 }
 0x412   : > { %3859 = vst [vmem:[%s6738_s20 + $0x108] sm:$0xff] %v4319_v21 }
 0x415   : > { %v2008_v49 = vpop.f32.mrb[68].mxu1 }
 0x416   : > { %v4320_v6 = vadd.f32 %v3643_v19, %v2008_v49  ;;  %v2010_v23 = vpop.f32.mrb[69].mxu1  ;;  %v3651_v34 = vpop.f32.mrb[72].mxu0 }
 0x417   : > { %v2011_v61 = vpop.f32.mrb[70].mxu1  ;;  %v3653_v3 = vpop.f32.mrb[73].mxu0 }
 0x418   : > { %3860 = vst [vmem:[%s6738_s20 + $0x110] sm:$0xff] %v4320_v6  ;;  %v4321_v18 = vadd.f32 %v3646_v63, %v2011_v61  ;;  %v2013_v26 = vpop.f32.mrb[71].mxu1  ;;  %v3654_v62 = vpop.f32.mrb[74].mxu0 }
 0x419   : > { %v3656_v24 = vpop.f32.mrb[75].mxu0 }
 0x41a   : > { %3861 = vst [vmem:[%s6738_s20 + $0x118] sm:$0xff] %v4321_v18 }
 0x41d   : > { %v2016_v47 = vpop.f32.mrb[72].mxu1 }
 0x41e   : > { %v4322_v43 = vadd.f32 %v3651_v34, %v2016_v47  ;;  %v2018_v27 = vpop.f32.mrb[73].mxu1  ;;  %v3659_v38 = vpop.f32.mrb[76].mxu0 }
 0x41f   : > { %v2019_v5 = vpop.f32.mrb[74].mxu1  ;;  %v3661_v52 = vpop.f32.mrb[77].mxu0 }
 0x420   : > { %3862 = vst [vmem:[%s6738_s20 + $0x120] sm:$0xff] %v4322_v43  ;;  %v4323_v57 = vadd.f32 %v3654_v62, %v2019_v5  ;;  %v2021_v20 = vpop.f32.mrb[75].mxu1  ;;  %v3662_v22 = vpop.f32.mrb[78].mxu0 }
 0x421   : > { %v3664_v28 = vpop.f32.mrb[79].mxu0 }
 0x422   : > { %3863 = vst [vmem:[%s6738_s20 + $0x128] sm:$0xff] %v4323_v57 }
 0x425   : > { %v2024_v60 = vpop.f32.mrb[76].mxu1 }
 0x426   : > { %v4324_v51 = vadd.f32 %v3659_v38, %v2024_v60  ;;  %v2026_v4 = vpop.f32.mrb[77].mxu1  ;;  %v3667_v1 = vpop.f32.mrb[80].mxu0 }
 0x427   : > { %v2027_v46 = vpop.f32.mrb[78].mxu1  ;;  %v3669_v36 = vpop.f32.mrb[81].mxu0 }
 0x428   : > { %3864 = vst [vmem:[%s6738_s20 + $0x130] sm:$0xff] %v4324_v51  ;;  %v4325_v17 = vadd.f32 %v3662_v22, %v2027_v46  ;;  %v2029_v12 = vpop.f32.mrb[79].mxu1  ;;  %v3670_v13 = vpop.f32.mrb[82].mxu0 }
 0x429   : > { %v3672_v31 = vpop.f32.mrb[83].mxu0 }
 0x42a   : > { %3865 = vst [vmem:[%s6738_s20 + $0x138] sm:$0xff] %v4325_v17 }
 0x42d   : > { %v2032_v2 = vpop.f32.mrb[80].mxu1 }
 0x42e   : > { %v4326_v50 = vadd.f32 %v3667_v1, %v2032_v2  ;;  %v2034_v37 = vpop.f32.mrb[81].mxu1  ;;  %v3675_v11 = vpop.f32.mrb[84].mxu0 }
 0x42f   : > { %v2035_v35 = vpop.f32.mrb[82].mxu1  ;;  %v3677_v41 = vpop.f32.mrb[85].mxu0 }
 0x430   : > { %3866 = vst [vmem:[%s6738_s20 + $0x140] sm:$0xff] %v4326_v50  ;;  %v4327_v40 = vadd.f32 %v3670_v13, %v2035_v35  ;;  %v2037_v59 = vpop.f32.mrb[83].mxu1  ;;  %v3678_v58 = vpop.f32.mrb[86].mxu0 }
 0x431   : > { %v3680_v25 = vpop.f32.mrb[87].mxu0 }
 0x432   : > { %3867 = vst [vmem:[%s6738_s20 + $0x148] sm:$0xff] %v4327_v40 }
 0x435   : > { %v2040_v32 = vpop.f32.mrb[84].mxu1 }
 0x436   : > { %v4328_v48 = vadd.f32 %v3675_v11, %v2040_v32  ;;  %v2042_v44 = vpop.f32.mrb[85].mxu1  ;;  %v3683_v7 = vpop.f32.mrb[88].mxu0 }
 0x437   : > { %v2043_v30 = vpop.f32.mrb[86].mxu1  ;;  %v3685_v33 = vpop.f32.mrb[89].mxu0 }
 0x438   : > { %3868 = vst [vmem:[%s6738_s20 + $0x150] sm:$0xff] %v4328_v48  ;;  %v4329_v54 = vadd.f32 %v3678_v58, %v2043_v30  ;;  %v2045_v53 = vpop.f32.mrb[87].mxu1  ;;  %v3686_v10 = vpop.f32.mrb[90].mxu0 }
 0x439   : > { %v3688_v39 = vpop.f32.mrb[91].mxu0 }
 0x43a   : > { %3869 = vst [vmem:[%s6738_s20 + $0x158] sm:$0xff] %v4329_v54 }
 0x43d   : > { %v2048_v14 = vpop.f32.mrb[88].mxu1 }
 0x43e   : > { %v4330_v8 = vadd.f32 %v3683_v7, %v2048_v14  ;;  %v2050_v15 = vpop.f32.mrb[89].mxu1  ;;  %v3691_v16 = vpop.f32.mrb[92].mxu0 }
 0x43f   : > { %v2051_v55 = vpop.f32.mrb[90].mxu1  ;;  %v3693_v56 = vpop.f32.mrb[93].mxu0 }
 0x440   : > { %3870 = vst [vmem:[%s6738_s20 + $0x160] sm:$0xff] %v4330_v8  ;;  %v4331_v9 = vadd.f32 %v3686_v10, %v2051_v55  ;;  %v2053_v19 = vpop.f32.mrb[91].mxu1  ;;  %v3694_v0 = vpop.f32.mrb[94].mxu0 }
 0x441   : > { %v3696_v29 = vpop.f32.mrb[95].mxu0 }
 0x442   : > { %3871 = vst [vmem:[%s6738_s20 + $0x168] sm:$0xff] %v4331_v9 }
 0x445   : > { %v2056_v21 = vpop.f32.mrb[92].mxu1 }
 0x446   : > { %v4332_v45 = vadd.f32 %v3691_v16, %v2056_v21  ;;  %v2058_v63 = vpop.f32.mrb[93].mxu1  ;;  %v3699_v42 = vpop.f32.mrb[96].mxu0 }
 0x447   : > { %v2059_v49 = vpop.f32.mrb[94].mxu1  ;;  %v3701_v6 = vpop.f32.mrb[97].mxu0 }
 0x448   : > { %3872 = vst [vmem:[%s6738_s20 + $0x170] sm:$0xff] %v4332_v45  ;;  %v4333_v23 = vadd.f32 %v3694_v0, %v2059_v49  ;;  %v2061_v34 = vpop.f32.mrb[95].mxu1  ;;  %v3702_v61 = vpop.f32.mrb[98].mxu0 }
 0x449   : > { %v3704_v3 = vpop.f32.mrb[99].mxu0 }
 0x44a   : > { %3873 = vst [vmem:[%s6738_s20 + $0x178] sm:$0xff] %v4333_v23 }
 0x44d   : > { %v2064_v18 = vpop.f32.mrb[96].mxu1 }
 0x44e   : > { %v4334_v26 = vadd.f32 %v3699_v42, %v2064_v18  ;;  %v2066_v62 = vpop.f32.mrb[97].mxu1  ;;  %v3707_v24 = vpop.f32.mrb[100].mxu0 }
 0x44f   : > { %v2067_v47 = vpop.f32.mrb[98].mxu1  ;;  %v3709_v43 = vpop.f32.mrb[101].mxu0 }
 0x450   : > { %3874 = vst [vmem:[%s6738_s20 + $0x180] sm:$0xff] %v4334_v26  ;;  %v4335_v27 = vadd.f32 %v3702_v61, %v2067_v47  ;;  %v2069_v38 = vpop.f32.mrb[99].mxu1  ;;  %v3710_v5 = vpop.f32.mrb[102].mxu0 }
 0x451   : > { %v3712_v52 = vpop.f32.mrb[103].mxu0 }
 0x452   : > { %3875 = vst [vmem:[%s6738_s20 + $0x188] sm:$0xff] %v4335_v27 }
 0x455   : > { %v2072_v57 = vpop.f32.mrb[100].mxu1 }
 0x456   : > { %v4336_v20 = vadd.f32 %v3707_v24, %v2072_v57  ;;  %v2074_v22 = vpop.f32.mrb[101].mxu1  ;;  %v3715_v28 = vpop.f32.mrb[104].mxu0 }
 0x457   : > { %v2075_v60 = vpop.f32.mrb[102].mxu1  ;;  %v3717_v51 = vpop.f32.mrb[105].mxu0 }
 0x458   : > { %3876 = vst [vmem:[%s6738_s20 + $0x190] sm:$0xff] %v4336_v20  ;;  %v4337_v4 = vadd.f32 %v3710_v5, %v2075_v60  ;;  %v2077_v1 = vpop.f32.mrb[103].mxu1  ;;  %v3718_v46 = vpop.f32.mrb[106].mxu0 }
 0x459   : > { %v3720_v36 = vpop.f32.mrb[107].mxu0 }
 0x45a   : > { %3877 = vst [vmem:[%s6738_s20 + $0x198] sm:$0xff] %v4337_v4 }
 0x45d   : > { %v2080_v17 = vpop.f32.mrb[104].mxu1 }
 0x45e   : > { %v4338_v12 = vadd.f32 %v3715_v28, %v2080_v17  ;;  %v2082_v13 = vpop.f32.mrb[105].mxu1  ;;  %v3723_v31 = vpop.f32.mrb[108].mxu0 }
 0x45f   : > { %v2083_v2 = vpop.f32.mrb[106].mxu1  ;;  %v3725_v50 = vpop.f32.mrb[109].mxu0 }
 0x460   : > { %3878 = vst [vmem:[%s6738_s20 + $0x1a0] sm:$0xff] %v4338_v12  ;;  %v4339_v37 = vadd.f32 %v3718_v46, %v2083_v2  ;;  %v2085_v11 = vpop.f32.mrb[107].mxu1  ;;  %v3726_v35 = vpop.f32.mrb[110].mxu0 }
 0x461   : > { %v3728_v41 = vpop.f32.mrb[111].mxu0 }
 0x462   : > { %3879 = vst [vmem:[%s6738_s20 + $0x1a8] sm:$0xff] %v4339_v37 }
 0x465   : > { %v2088_v40 = vpop.f32.mrb[108].mxu1 }
 0x466   : > { %v4340_v59 = vadd.f32 %v3723_v31, %v2088_v40  ;;  %v2090_v58 = vpop.f32.mrb[109].mxu1  ;;  %v3731_v25 = vpop.f32.mrb[112].mxu0 }
 0x467   : > { %v2091_v32 = vpop.f32.mrb[110].mxu1  ;;  %v3733_v48 = vpop.f32.mrb[113].mxu0 }
 0x468   : > { %3880 = vst [vmem:[%s6738_s20 + $0x1b0] sm:$0xff] %v4340_v59  ;;  %v4341_v44 = vadd.f32 %v3726_v35, %v2091_v32  ;;  %v2093_v7 = vpop.f32.mrb[111].mxu1  ;;  %v3734_v30 = vpop.f32.mrb[114].mxu0 }
 0x469   : > { %v3736_v33 = vpop.f32.mrb[115].mxu0 }
 0x46a   : > { %3881 = vst [vmem:[%s6738_s20 + $0x1b8] sm:$0xff] %v4341_v44 }
 0x46d   : > { %v2096_v54 = vpop.f32.mrb[112].mxu1 }
 0x46e   : > { %v4342_v53 = vadd.f32 %v3731_v25, %v2096_v54  ;;  %v2098_v10 = vpop.f32.mrb[113].mxu1  ;;  %v3739_v39 = vpop.f32.mrb[116].mxu0 }
 0x46f   : > { %v2099_v14 = vpop.f32.mrb[114].mxu1  ;;  %v3741_v8 = vpop.f32.mrb[117].mxu0 }
 0x470   : > { %3882 = vst [vmem:[%s6738_s20 + $0x1c0] sm:$0xff] %v4342_v53  ;;  %v4343_v15 = vadd.f32 %v3734_v30, %v2099_v14  ;;  %v2101_v16 = vpop.f32.mrb[115].mxu1  ;;  %v3742_v55 = vpop.f32.mrb[118].mxu0 }
 0x471   : > { %v3744_v56 = vpop.f32.mrb[119].mxu0 }
 0x472   : > { %3883 = vst [vmem:[%s6738_s20 + $0x1c8] sm:$0xff] %v4343_v15 }
 0x475   : > { %v2104_v9 = vpop.f32.mrb[116].mxu1 }
 0x476   : > { %v4344_v19 = vadd.f32 %v3739_v39, %v2104_v9  ;;  %v2106_v0 = vpop.f32.mrb[117].mxu1  ;;  %v3747_v29 = vpop.f32.mrb[120].mxu0 }
 0x477   : > { %v2107_v21 = vpop.f32.mrb[118].mxu1  ;;  %v3749_v45 = vpop.f32.mrb[121].mxu0 }
 0x478   : > { %3884 = vst [vmem:[%s6738_s20 + $0x1d0] sm:$0xff] %v4344_v19  ;;  %v4345_v63 = vadd.f32 %v3742_v55, %v2107_v21  ;;  %v2109_v42 = vpop.f32.mrb[119].mxu1  ;;  %v3750_v49 = vpop.f32.mrb[122].mxu0 }
 0x479   : > { %v3752_v6 = vpop.f32.mrb[123].mxu0 }
 0x47a   : > { %3885 = vst [vmem:[%s6738_s20 + $0x1d8] sm:$0xff] %v4345_v63 }
 0x47d   : > { %v2112_v23 = vpop.f32.mrb[120].mxu1 }
 0x47e   : > { %v4346_v34 = vadd.f32 %v3747_v29, %v2112_v23  ;;  %v2114_v61 = vpop.f32.mrb[121].mxu1  ;;  %v3755_v3 = vpop.f32.mrb[124].mxu0 }
 0x47f   : > { %v2115_v18 = vpop.f32.mrb[122].mxu1  ;;  %v3757_v26 = vpop.f32.mrb[125].mxu0 }
 0x480   : > { %3886 = vst [vmem:[%s6738_s20 + $0x1e0] sm:$0xff] %v4346_v34  ;;  %v4347_v62 = vadd.f32 %v3750_v49, %v2115_v18  ;;  %v2117_v24 = vpop.f32.mrb[123].mxu1  ;;  %v3758_v47 = vpop.f32.mrb[126].mxu0 }
 0x481   : > { %v3760_v43 = vpop.f32.mrb[127].mxu0 }
 0x482   : > { %3887 = vst [vmem:[%s6738_s20 + $0x1e8] sm:$0xff] %v4347_v62 }
 0x485   : > { %v2120_v27 = vpop.f32.mrb[124].mxu1 }
 0x486   : > { %v4348_v38 = vadd.f32 %v3755_v3, %v2120_v27  ;;  %v2122_v5 = vpop.f32.mrb[125].mxu1 }
 0x487   : > { %v2123_v52 = vpop.f32.mrb[126].mxu1 }
 0x488   : > { %3888 = vst [vmem:[%s6738_s20 + $0x1f0] sm:$0xff] %v4348_v38  ;;  %v4349_v57 = vadd.f32 %v3758_v47, %v2123_v52  ;;  %v2125_v20 = vpop.f32.mrb[127].mxu1 }
 0x48a   : > { %3889 = vst [vmem:[%s6738_s20 + $0x1f8] sm:$0xff] %v4349_v57 }
 0x48b   : > { %5466 = shalt.err (!%p5463_p11)
}
 0x48c   : > { %s5467_s21 = scalar_lea.hbm %s6816_s8, 8192  ;;  %s5471_s28 = scalar_lea.hbm %s6872_s3, 16384 }
 0x48d   : > { %p5468_p0 = scmp.ne.s32.totalorder %s6816_s8, %s5467_s21  ;;  %p5472_p6 = scmp.lt.u32.totalorder %s6816_s8, %s6872_s3 }
 0x48e   : > { %p5473_p7 = scmp.lt.u32.totalorder %s5471_s28, %s5467_s21  ;;  %p5475_p8 = scmp.lt.u32.totalorder %s5467_s21, %s6816_s8 }
 0x48f   : > { %p5469_p4 = pnand %p5468_p0, %p7155_p12 }
 0x490   : > { %p5474_p2 = por %p5473_p7, %p5472_p6 }
 0x491   : > { %p5470_p13 = pneg %p5469_p4 }
 0x492   : > { %p5476_p1 = por %p5475_p8, %p5474_p2 }
 0x494   : > { %p5477_p10 = pnand %p5476_p1, %p5470_p13 }
 0x496   : > { %5480 = shalt.err (!%p5477_p10)
}
 0x497   : > { %s5550_s20 = smov 128   ;;  %s5551_s22 = smov 8  }
 0x498   : > { %4872 = dma.vmem_to_hbm [thread:$0]  (%p7155_p12), %s6818_s24, 8192, %s6816_s8, %s3891_s15, %s5550_s20, %s5550_s20, %s5551_s22  }
 0x499 PF: > { %s3920_s6 = sand.u32 1, %s5519_s12   ;;  %p7156_p3 = scmp.ne.s32.totalorder %s6970_s23, 0 }
 0x49a   : > { %p7157_p5 = scmp.ge.s32.totalorder %s5539_s17, 2  ;;  %s3921_s7 = scalar_lea.sflag [#allocation4], %s3920_s6 }
 0x49c   : > { %p4886_p9 = pnand %p7157_p5, %p7156_p3 }
 0x49e   : > { %5514 = dma.done.wait (!%p4886_p9), %s3921_s7, 8192  }
 0x49f   : > { %5516 = vsyncadd (!%p4886_p9), %s3921_s7, 4294959104  ;;  %s20_s17 = sadd.s32 1, %s5539_s17   ;;  %s7158_s12 = smov %s5523_s13 }
 0x4a0   : > { %p17_p11 = scmp.ge.s32.totalorder %s20_s17, 4   ;;  %s7159_s13 = smov %s5527_s14 }
 0x4a1   : > { %s7160_s14 = smov %s5714_s18  ;;  %s7161_s15 = smov %s5535_s16 }
 0x4a2   : > { %s7162_s16 = smov %s7164_s19  ;;  %19 = sbr.rel (!%p17_p11) target bundleno = 7 (0x7), region = 85 }
 0x4a9   :  { %3926 = vsyncpa [#allocation3], 1 }
 0x4aa   :  { %3928 = vsyncpa [#allocation3 + $0x1], 1 }
 0x4ab   :  { %3929 = vsyncpa [#allocation6], 1 }
 0x4ac   :  { %3930 = vsyncpa [#allocation4], 1 }
 0x4ad   :  { %3932 = vsyncpa [#allocation4 + $0x1], 1 }

</bundles_post_ra>
